<compile_context>
chip_gen: v7x
topology: tpu7x:2x2x1
jax: 0.10.0
libtpu: 0.0.40
codegen_flags: <defaults>
</compile_context>

<pallas_src>
import functools

import jax
import jax.numpy as jnp
from jax.experimental import pallas as pl
from jax.experimental.pallas import tpu as pltpu


def _round_up(x, m):
    return ((x + m - 1) // m) * m


def _conv_bn_act_kernel(x_ref, w_ref, scale_ref, bias_ref, o_ref, acc_ref,
                        *, k, stride, row_tile, wout, fold_kw):
    # x_ref:     (Hp, Wp, Cinp)                bf16 padded NHWC plane (one batch element)
    # w_ref:     fold:   (k, k*Cinp, cout_t)   bf16 weights (kw folded into K)
    #            no-fold:(k*k, Cinp, cout_t)   bf16 per-tap weights
    # scale_ref: (1, cout_t) f32   folded BN scale (applied in epilogue)
    # bias_ref:  (1, cout_t) f32   folded BN bias
    # o_ref:     (row_tile*wout, cout_t) bf16  flat, lane-dense output slab
    # acc_ref:   (row_tile*wout, cout_t) f32   VMEM scratch accumulator
    cinp = x_ref.shape[-1]
    m = row_tile * wout

    rt_s = row_tile * stride
    ih0 = pl.program_id(2) * rt_s                 # first input row of this row tile
    if rt_s & (rt_s - 1) == 0:                    # alignment hint when rt_s is a power of 2
        ih0 = pl.multiple_of(ih0, rt_s)

    def window(kh, kw):
        if stride == 1:
            return x_ref[pl.ds(ih0 + kh, row_tile), pl.ds(kw, wout), :]
        return x_ref[pl.ds(ih0 + kh, row_tile, stride=stride),
                     pl.ds(kw, wout, stride=stride), :]

    if fold_kw:
        # One matmul per kh: lhs K = k*cinp (lane-aligned concat of the kw-shifted windows).
        for kh in range(k):
            parts = [window(kh, kw) for kw in range(k)]
            lhs = jnp.concatenate(parts, axis=-1).reshape(m, k * cinp)
            contrib = jnp.dot(lhs, w_ref[kh], preferred_element_type=jnp.float32)
            if kh == 0:
                acc_ref[...] = contrib
            else:
                acc_ref[...] += contrib
    else:
        # Safe per-tap path (small / lane-unaligned Cin): k*k matmuls into the scratch acc.
        for kh in range(k):
            for kw in range(k):
                lhs = window(kh, kw).reshape(m, cinp)
                contrib = jnp.dot(lhs, w_ref[kh * k + kw],
                                  preferred_element_type=jnp.float32)
                if kh == 0 and kw == 0:
                    acc_ref[...] = contrib
                else:
                    acc_ref[...] += contrib

    # Epilogue in f32: BN scale + bias, SiLU, cast to bf16 for the lane-dense store.
    y = acc_ref[...] * scale_ref[...] + bias_ref[...]
    y = y * jax.nn.sigmoid(y)
    o_ref[...] = y.astype(o_ref.dtype)


@functools.partial(jax.jit, static_argnames=("kernel_s", "stride", "groups", "eps",
                                              "row_tile", "cout_tile", "fold_kw"))
def conv_bn_act(x_nchw, weight, gamma, beta, running_mean, running_var,
                *, kernel_s=3, stride=1, groups=1, eps=1e-5,
                row_tile=None, cout_tile=None, fold_kw=None):
    """Forward pass of ConvBnAct. x_nchw: [N, Cin, H, W]; weight: [Cout, Cin/groups, k, k]."""
    assert groups == 1, "groups != 1 not supported in this synthetic kernel"
    N, Cin, H, W = x_nchw.shape
    Cout = weight.shape[0]
    k = kernel_s
    p = (k - 1) // 2

    Hout = (H + 2 * p - k) // stride + 1
    Wout = (W + 2 * p - k) // stride + 1

    Cinp = _round_up(Cin, 8)                      # sublane alignment for the lhs reshape
    Coutp = _round_up(Cout, 128)                  # lane-dense output / full MXU N
    Wp = W + 2 * p

    if fold_kw is None:
        fold_kw = (Cinp % 128 == 0)               # lane-aligned concat only

    # ---- static tiling decisions (Python ints at trace time) ----------------
    if cout_tile is None:
        if Coutp <= 512:
            cout_tile = Coutp
        elif Coutp % 256 == 0:
            cout_tile = 256
        else:
            cout_tile = 128
    if row_tile is None:
        row_tile = max(1, min(Hout, -(-512 // max(Wout, 1))))   # target M ~ 512
    row_tile = min(row_tile, Hout)

    # ---- VMEM budgeting (generation aware) ----------------------------------
    try:
        info = pltpu.get_tpu_info()
        vmem_cap = int(getattr(info, "vmem_capacity_bytes", 64 << 20))
    except Exception:
        vmem_cap = 64 << 20                       # v7x-safe fallback
    vmem_cap = max(vmem_cap, 48 << 20)

    def _vmem_est(rt, ct):
        lanes = max(_round_up(Cinp, 128), 128)
        hp_est = H + 2 * p + rt * stride + k
        plane = hp_est * _round_up(Wp, 16) * lanes * 2 * 2          # bf16, double buffered
        wslab = k * k * _round_up(Cinp, 8) * ct * 2 * 2             # bf16, double buffered
        outb = _round_up(rt * Wout, 16) * ct * 2 * 2                # bf16, double buffered
        acc = _round_up(rt * Wout, 8) * ct * 4                      # f32 scratch
        return plane + wslab + outb + acc + (2 << 20)

    budget = max(32 << 20, int(vmem_cap * 0.6))
    while _vmem_est(row_tile, cout_tile) > budget:
        if cout_tile > 128 and Coutp % (cout_tile // 2) == 0:
            cout_tile //= 2
        elif row_tile > 1:
            row_tile = max(1, row_tile // 2)
        else:
            break                                   # see H-band TODO at top of file

    # Sublane alignment: make M = row_tile*Wout a multiple of 8, or cover all rows at once.
    while (row_tile * Wout) % 8 != 0 and row_tile < Hout:
        row_tile += 1

    n_row_blocks = -(-Hout // row_tile)
    Hout_pad = n_row_blocks * row_tile
    n_cout_blocks = Coutp // cout_tile

    vmem_limit = int(min(100 << 20, min(vmem_cap - (4 << 20),
                                        max(32 << 20, _vmem_est(row_tile, cout_tile) + (8 << 20)))))

    # ---- glue (cheap, XLA): layout + zero padding + BN folding --------------
    Hin_need = (Hout_pad - 1) * stride + k
    pad_bottom = max(0, Hin_need - H - p)
    Hp2 = H + p + pad_bottom

    x_nhwc = jnp.transpose(x_nchw, (0, 2, 3, 1))
    x_pad = jnp.pad(x_nhwc, ((0, 0), (p, pad_bottom), (p, p), (0, Cinp - Cin)))
    x_pad = x_pad.astype(jnp.bfloat16)            # bf16 operands -> 2x MXU rate, 1/2 HBM bytes

    # weight [Cout, Cin, kh, kw] -> [kh, kw, Cinp, Coutp]  (no BN scale folded in)
    wt = jnp.transpose(weight, (2, 3, 1, 0))
    wt = jnp.pad(wt, ((0, 0), (0, 0), (0, Cinp - Cin), (0, Coutp - Cout)))
    if fold_kw:
        w = wt.reshape(k, k * Cinp, Coutp).astype(jnp.bfloat16)
        w_block = (k, k * Cinp, cout_tile)
    else:
        w = wt.reshape(k * k, Cinp, Coutp).astype(jnp.bfloat16)
        w_block = (k * k, Cinp, cout_tile)

    scale = gamma / jnp.sqrt(running_var + eps)                     # [Cout]
    bias = beta - running_mean * scale                              # [Cout]
    scale_p = jnp.pad(scale, (0, Coutp - Cout)).reshape(1, Coutp).astype(jnp.float32)
    bias_p = jnp.pad(bias, (0, Coutp - Cout)).reshape(1, Coutp).astype(jnp.float32)

    kernel = functools.partial(_conv_bn_act_kernel, k=k, stride=stride,
                               row_tile=row_tile, wout=Wout, fold_kw=fold_kw)

    out_flat = pl.pallas_call(
        kernel,
        out_shape=jax.ShapeDtypeStruct((N, Hout_pad * Wout, Coutp), jnp.bfloat16),
        grid_spec=pltpu.PrefetchScalarGridSpec(
            num_scalar_prefetch=0,
            grid=(N, n_cout_blocks, n_row_blocks),
            in_specs=[
                # full padded plane per batch element; resident across row tiles
                pl.BlockSpec((None, Hp2, Wp, Cinp), lambda n, c, r: (n, 0, 0, 0)),
                # weight slab for this Cout tile; resident across the inner row loop
                pl.BlockSpec(w_block, lambda n, c, r: (0, 0, c)),
                pl.BlockSpec((1, cout_tile), lambda n, c, r: (0, c)),
                pl.BlockSpec((1, cout_tile), lambda n, c, r: (0, c)),
            ],
            out_specs=pl.BlockSpec((None, row_tile * Wout, cout_tile),
                                   lambda n, c, r: (n, r, c)),
            scratch_shapes=[pltpu.VMEM((row_tile * Wout, cout_tile), jnp.float32)],
        ),
        compiler_params=pltpu.CompilerParams(
            dimension_semantics=("parallel", "parallel", "arbitrary"),
            vmem_limit_bytes=vmem_limit),
    )(x_pad, w, scale_p, bias_p)

    out = out_flat.reshape(N, Hout_pad, Wout, Coutp)[:, :Hout, :, :Cout]
    # NHWC bf16 -> NCHW caller dtype (see TODO at top: return NHWC to skip this).
    return jnp.transpose(out, (0, 3, 1, 2)).astype(x_nchw.dtype)


def _reference(x_nchw, weight, gamma, beta, running_mean, running_var,
               *, stride=1, eps=1e-5):
    """Pure-JAX f32 reference (lax conv + eval BN + SiLU)."""
    k = weight.shape[-1]
    padding = (k - 1) // 2
    y = jax.lax.conv_general_dilated(
        x_nchw.astype(jnp.float32), weight.astype(jnp.float32),
        window_strides=(stride, stride),
        padding=((padding, padding), (padding, padding)),
        dimension_numbers=("NCHW", "OIHW", "NCHW"))
    scale = gamma / jnp.sqrt(running_var + eps)
    bias = beta - running_mean * scale
    y = y * scale[None, :, None, None] + bias[None, :, None, None]
    return y * jax.nn.sigmoid(y)


def _make_inputs(key, n, cin, cout, h, w, k):
    kx, kw_, kg, kb, km, kv = jax.random.split(key, 6)
    x = jax.random.normal(kx, (n, cin, h, w), dtype=jnp.float32)
    weight = jax.random.normal(kw_, (cout, cin, k, k), dtype=jnp.float32) * 0.1
    gamma = 1.0 + 0.1 * jax.random.normal(kg, (cout,), dtype=jnp.float32)
    beta = 0.1 * jax.random.normal(kb, (cout,), dtype=jnp.float32)
    rmean = 0.1 * jax.random.normal(km, (cout,), dtype=jnp.float32)
    rvar = jnp.abs(1.0 + 0.1 * jax.random.normal(kv, (cout,), dtype=jnp.float32))
    return x, weight, gamma, beta, rmean, rvar


if __name__ == "__main__":
    key = jax.random.PRNGKey(0)
    k1, k2 = jax.random.split(key, 2)

    # Config 1: the module's small reference shape (N=2, in_c=4, out_c=8, 16x16, k=3, s=1).
    N, Cin, Cout, H, W, k = 2, 4, 8, 16, 16, 3
    x, weight, gamma, beta, rmean, rvar = _make_inputs(k1, N, Cin, Cout, H, W, k)
    out = conv_bn_act(x, weight, gamma, beta, rmean, rvar,
                      kernel_s=k, stride=1, groups=1)
    out = jax.block_until_ready(out)
    ref = _reference(x, weight, gamma, beta, rmean, rvar, stride=1)
    assert out.shape == (N, Cout, H, W), out.shape
    assert jnp.allclose(out, ref, atol=3e-2, rtol=3e-2), \
        float(jnp.max(jnp.abs(out - ref)))

    # Config 2: unaligned channel counts + multiple row tiles (Cout padded to 128).
    N2, C2i, C2o, H2, W2 = 1, 24, 40, 16, 16
    x2, w2, g2, b2, rm2, rv2 = _make_inputs(k2, N2, C2i, C2o, H2, W2, k)
    out2 = conv_bn_act(x2, w2, g2, b2, rm2, rv2,
                       kernel_s=k, stride=1, groups=1, row_tile=8)
    out2 = jax.block_until_ready(out2)
    ref2 = _reference(x2, w2, g2, b2, rm2, rv2, stride=1)
    assert out2.shape == (N2, C2o, H2, W2), out2.shape
    assert jnp.allclose(out2, ref2, atol=3e-2, rtol=3e-2), \
        float(jnp.max(jnp.abs(out2 - ref2)))

    print("KERNEL_OK")
</pallas_src>

<mosaic_0001>
module attributes {stable_mosaic.version = 11 : i64} {
  func.func @_conv_bn_act_kernel(%arg0: i32, %arg1: i32, %arg2: i32, %arg3: memref<1x18x18x8xbf16, #tpu.memory_space<vmem>>, %arg4: memref<9x8x128xbf16, #tpu.memory_space<vmem>>, %arg5: memref<1x128xf32, #tpu.memory_space<vmem>>, %arg6: memref<1x128xf32, #tpu.memory_space<vmem>>, %arg7: memref<1x256x128xbf16, #tpu.memory_space<vmem>>, %arg8: memref<256x128xf32, #tpu.memory_space<vmem>>) attributes {dimension_semantics = [#tpu.dimension_semantics<parallel>, #tpu.dimension_semantics<parallel>, #tpu.dimension_semantics<arbitrary>], iteration_bounds = array<i64: 2, 1, 1>, scalar_prefetch = 0 : i64, scratch_operands = 1 : i64, tpu.core_type = #tpu.core_type<tc>, window_params = [{transform_indices = @transform_0, window_bounds = array<i64: 1, 18, 18, 8>}, {transform_indices = @transform_1, window_bounds = array<i64: 9, 8, 128>}, {transform_indices = @transform_2, window_bounds = array<i64: 1, 128>}, {transform_indices = @transform_3, window_bounds = array<i64: 1, 128>}, {transform_indices = @transform_4, window_bounds = array<i64: 1, 256, 128>}]} {
    %c16_i32 = arith.constant 16 : i32
    %0 = arith.muli %arg2, %c16_i32 : i32
    %1 = tpu.assume_multiple %0, 16 : i32
    %c0_i32 = arith.constant 0 : i32
    %2 = arith.addi %1, %c0_i32 : i32
    %c0 = arith.constant 0 : index
    %3 = arith.index_cast %2 : i32 to index
    %c0_0 = arith.constant 0 : index
    %c0_1 = arith.constant 0 : index
    %4 = vector.load %arg3[%c0, %3, %c0_0, %c0_1] : memref<1x18x18x8xbf16, #tpu.memory_space<vmem>>, vector<1x16x16x8xbf16>
    %5 = vector.shape_cast %4 : vector<1x16x16x8xbf16> to vector<16x16x8xbf16>
    %6 = vector.shape_cast %5 : vector<16x16x8xbf16> to vector<256x8xbf16>
    %c0_2 = arith.constant 0 : index
    %c0_3 = arith.constant 0 : index
    %c0_4 = arith.constant 0 : index
    %7 = vector.load %arg4[%c0_2, %c0_3, %c0_4] : memref<9x8x128xbf16, #tpu.memory_space<vmem>>, vector<1x8x128xbf16>
    %8 = vector.shape_cast %7 : vector<1x8x128xbf16> to vector<8x128xbf16>
    %cst = arith.constant dense<0.000000e+00> : vector<256x128xf32>
    %9 = tpu.matmul %6, %8, %cst {dimension_numbers = #tpu.dot_dimension_numbers<[1], [0], [0], [1], [0, 0, 1, 1], [], []>} : vector<256x8xbf16>, vector<8x128xbf16>, vector<256x128xf32> -> vector<256x128xf32>
    %c0_5 = arith.constant 0 : index
    %c0_6 = arith.constant 0 : index
    %10 = vector.load %arg8[%c0_5, %c0_6] : memref<256x128xf32, #tpu.memory_space<vmem>>, vector<256x128xf32>
    tpu.vector_store %arg8[%c0_5, %c0_6], %9 {strides = array<i32>} : memref<256x128xf32, #tpu.memory_space<vmem>>, vector<256x128xf32>,
    %c0_i32_7 = arith.constant 0 : i32
    %11 = arith.addi %1, %c0_i32_7 : i32
    %c0_8 = arith.constant 0 : index
    %12 = arith.index_cast %11 : i32 to index
    %c1 = arith.constant 1 : index
    %c0_9 = arith.constant 0 : index
    %13 = vector.load %arg3[%c0_8, %12, %c1, %c0_9] : memref<1x18x18x8xbf16, #tpu.memory_space<vmem>>, vector<1x16x16x8xbf16>
    %14 = vector.shape_cast %13 : vector<1x16x16x8xbf16> to vector<16x16x8xbf16>
    %15 = vector.shape_cast %14 : vector<16x16x8xbf16> to vector<256x8xbf16>
    %c1_10 = arith.constant 1 : index
    %c0_11 = arith.constant 0 : index
    %c0_12 = arith.constant 0 : index
    %16 = vector.load %arg4[%c1_10, %c0_11, %c0_12] : memref<9x8x128xbf16, #tpu.memory_space<vmem>>, vector<1x8x128xbf16>
    %17 = vector.shape_cast %16 : vector<1x8x128xbf16> to vector<8x128xbf16>
    %cst_13 = arith.constant dense<0.000000e+00> : vector<256x128xf32>
    %18 = tpu.matmul %15, %17, %cst_13 {dimension_numbers = #tpu.dot_dimension_numbers<[1], [0], [0], [1], [0, 0, 1, 1], [], []>} : vector<256x8xbf16>, vector<8x128xbf16>, vector<256x128xf32> -> vector<256x128xf32>
    %c0_14 = arith.constant 0 : index
    %c0_15 = arith.constant 0 : index
    %19 = vector.load %arg8[%c0_14, %c0_15] : memref<256x128xf32, #tpu.memory_space<vmem>>, vector<256x128xf32>
    %20 = arith.addf %19, %18 : vector<256x128xf32>
    %c0_16 = arith.constant 0 : index
    %c0_17 = arith.constant 0 : index
    %21 = vector.load %arg8[%c0_16, %c0_17] : memref<256x128xf32, #tpu.memory_space<vmem>>, vector<256x128xf32>
    tpu.vector_store %arg8[%c0_16, %c0_17], %20 {strides = array<i32>} : memref<256x128xf32, #tpu.memory_space<vmem>>, vector<256x128xf32>,
    %c0_i32_18 = arith.constant 0 : i32
    %22 = arith.addi %1, %c0_i32_18 : i32
    %c0_19 = arith.constant 0 : index
    %23 = arith.index_cast %22 : i32 to index
    %c2 = arith.constant 2 : index
    %c0_20 = arith.constant 0 : index
    %24 = vector.load %arg3[%c0_19, %23, %c2, %c0_20] : memref<1x18x18x8xbf16, #tpu.memory_space<vmem>>, vector<1x16x16x8xbf16>
    %25 = vector.shape_cast %24 : vector<1x16x16x8xbf16> to vector<16x16x8xbf16>
    %26 = vector.shape_cast %25 : vector<16x16x8xbf16> to vector<256x8xbf16>
    %c2_21 = arith.constant 2 : index
    %c0_22 = arith.constant 0 : index
    %c0_23 = arith.constant 0 : index
    %27 = vector.load %arg4[%c2_21, %c0_22, %c0_23] : memref<9x8x128xbf16, #tpu.memory_space<vmem>>, vector<1x8x128xbf16>
    %28 = vector.shape_cast %27 : vector<1x8x128xbf16> to vector<8x128xbf16>
    %cst_24 = arith.constant dense<0.000000e+00> : vector<256x128xf32>
    %29 = tpu.matmul %26, %28, %cst_24 {dimension_numbers = #tpu.dot_dimension_numbers<[1], [0], [0], [1], [0, 0, 1, 1], [], []>} : vector<256x8xbf16>, vector<8x128xbf16>, vector<256x128xf32> -> vector<256x128xf32>
    %c0_25 = arith.constant 0 : index
    %c0_26 = arith.constant 0 : index
    %30 = vector.load %arg8[%c0_25, %c0_26] : memref<256x128xf32, #tpu.memory_space<vmem>>, vector<256x128xf32>
    %31 = arith.addf %30, %29 : vector<256x128xf32>
    %c0_27 = arith.constant 0 : index
    %c0_28 = arith.constant 0 : index
    %32 = vector.load %arg8[%c0_27, %c0_28] : memref<256x128xf32, #tpu.memory_space<vmem>>, vector<256x128xf32>
    tpu.vector_store %arg8[%c0_27, %c0_28], %31 {strides = array<i32>} : memref<256x128xf32, #tpu.memory_space<vmem>>, vector<256x128xf32>,
    %c1_i32 = arith.constant 1 : i32
    %33 = arith.addi %1, %c1_i32 : i32
    %c0_29 = arith.constant 0 : index
    %34 = arith.index_cast %33 : i32 to index
    %c0_30 = arith.constant 0 : index
    %c0_31 = arith.constant 0 : index
    %35 = vector.load %arg3[%c0_29, %34, %c0_30, %c0_31] : memref<1x18x18x8xbf16, #tpu.memory_space<vmem>>, vector<1x16x16x8xbf16>
    %36 = vector.shape_cast %35 : vector<1x16x16x8xbf16> to vector<16x16x8xbf16>
    %37 = vector.shape_cast %36 : vector<16x16x8xbf16> to vector<256x8xbf16>
    %c3 = arith.constant 3 : index
    %c0_32 = arith.constant 0 : index
    %c0_33 = arith.constant 0 : index
    %38 = vector.load %arg4[%c3, %c0_32, %c0_33] : memref<9x8x128xbf16, #tpu.memory_space<vmem>>, vector<1x8x128xbf16>
    %39 = vector.shape_cast %38 : vector<1x8x128xbf16> to vector<8x128xbf16>
    %cst_34 = arith.constant dense<0.000000e+00> : vector<256x128xf32>
    %40 = tpu.matmul %37, %39, %cst_34 {dimension_numbers = #tpu.dot_dimension_numbers<[1], [0], [0], [1], [0, 0, 1, 1], [], []>} : vector<256x8xbf16>, vector<8x128xbf16>, vector<256x128xf32> -> vector<256x128xf32>
    %c0_35 = arith.constant 0 : index
    %c0_36 = arith.constant 0 : index
    %41 = vector.load %arg8[%c0_35, %c0_36] : memref<256x128xf32, #tpu.memory_space<vmem>>, vector<256x128xf32>
    %42 = arith.addf %41, %40 : vector<256x128xf32>
    %c0_37 = arith.constant 0 : index
    %c0_38 = arith.constant 0 : index
    %43 = vector.load %arg8[%c0_37, %c0_38] : memref<256x128xf32, #tpu.memory_space<vmem>>, vector<256x128xf32>
    tpu.vector_store %arg8[%c0_37, %c0_38], %42 {strides = array<i32>} : memref<256x128xf32, #tpu.memory_space<vmem>>, vector<256x128xf32>,
    %c1_i32_39 = arith.constant 1 : i32
    %44 = arith.addi %1, %c1_i32_39 : i32
    %c0_40 = arith.constant 0 : index
    %45 = arith.index_cast %44 : i32 to index
    %c1_41 = arith.constant 1 : index
    %c0_42 = arith.constant 0 : index
    %46 = vector.load %arg3[%c0_40, %45, %c1_41, %c0_42] : memref<1x18x18x8xbf16, #tpu.memory_space<vmem>>, vector<1x16x16x8xbf16>
    %47 = vector.shape_cast %46 : vector<1x16x16x8xbf16> to vector<16x16x8xbf16>
    %48 = vector.shape_cast %47 : vector<16x16x8xbf16> to vector<256x8xbf16>
    %c4 = arith.constant 4 : index
    %c0_43 = arith.constant 0 : index
    %c0_44 = arith.constant 0 : index
    %49 = vector.load %arg4[%c4, %c0_43, %c0_44] : memref<9x8x128xbf16, #tpu.memory_space<vmem>>, vector<1x8x128xbf16>
    %50 = vector.shape_cast %49 : vector<1x8x128xbf16> to vector<8x128xbf16>
    %cst_45 = arith.constant dense<0.000000e+00> : vector<256x128xf32>
    %51 = tpu.matmul %48, %50, %cst_45 {dimension_numbers = #tpu.dot_dimension_numbers<[1], [0], [0], [1], [0, 0, 1, 1], [], []>} : vector<256x8xbf16>, vector<8x128xbf16>, vector<256x128xf32> -> vector<256x128xf32>
    %c0_46 = arith.constant 0 : index
    %c0_47 = arith.constant 0 : index
    %52 = vector.load %arg8[%c0_46, %c0_47] : memref<256x128xf32, #tpu.memory_space<vmem>>, vector<256x128xf32>
    %53 = arith.addf %52, %51 : vector<256x128xf32>
    %c0_48 = arith.constant 0 : index
    %c0_49 = arith.constant 0 : index
    %54 = vector.load %arg8[%c0_48, %c0_49] : memref<256x128xf32, #tpu.memory_space<vmem>>, vector<256x128xf32>
    tpu.vector_store %arg8[%c0_48, %c0_49], %53 {strides = array<i32>} : memref<256x128xf32, #tpu.memory_space<vmem>>, vector<256x128xf32>,
    %c1_i32_50 = arith.constant 1 : i32
    %55 = arith.addi %1, %c1_i32_50 : i32
    %c0_51 = arith.constant 0 : index
    %56 = arith.index_cast %55 : i32 to index
    %c2_52 = arith.constant 2 : index
    %c0_53 = arith.constant 0 : index
    %57 = vector.load %arg3[%c0_51, %56, %c2_52, %c0_53] : memref<1x18x18x8xbf16, #tpu.memory_space<vmem>>, vector<1x16x16x8xbf16>
    %58 = vector.shape_cast %57 : vector<1x16x16x8xbf16> to vector<16x16x8xbf16>
    %59 = vector.shape_cast %58 : vector<16x16x8xbf16> to vector<256x8xbf16>
    %c5 = arith.constant 5 : index
    %c0_54 = arith.constant 0 : index
    %c0_55 = arith.constant 0 : index
    %60 = vector.load %arg4[%c5, %c0_54, %c0_55] : memref<9x8x128xbf16, #tpu.memory_space<vmem>>, vector<1x8x128xbf16>
    %61 = vector.shape_cast %60 : vector<1x8x128xbf16> to vector<8x128xbf16>
    %cst_56 = arith.constant dense<0.000000e+00> : vector<256x128xf32>
    %62 = tpu.matmul %59, %61, %cst_56 {dimension_numbers = #tpu.dot_dimension_numbers<[1], [0], [0], [1], [0, 0, 1, 1], [], []>} : vector<256x8xbf16>, vector<8x128xbf16>, vector<256x128xf32> -> vector<256x128xf32>
    %c0_57 = arith.constant 0 : index
    %c0_58 = arith.constant 0 : index
    %63 = vector.load %arg8[%c0_57, %c0_58] : memref<256x128xf32, #tpu.memory_space<vmem>>, vector<256x128xf32>
    %64 = arith.addf %63, %62 : vector<256x128xf32>
    %c0_59 = arith.constant 0 : index
    %c0_60 = arith.constant 0 : index
    %65 = vector.load %arg8[%c0_59, %c0_60] : memref<256x128xf32, #tpu.memory_space<vmem>>, vector<256x128xf32>
    tpu.vector_store %arg8[%c0_59, %c0_60], %64 {strides = array<i32>} : memref<256x128xf32, #tpu.memory_space<vmem>>, vector<256x128xf32>,
    %c2_i32 = arith.constant 2 : i32
    %66 = arith.addi %1, %c2_i32 : i32
    %c0_61 = arith.constant 0 : index
    %67 = arith.index_cast %66 : i32 to index
    %c0_62 = arith.constant 0 : index
    %c0_63 = arith.constant 0 : index
    %68 = vector.load %arg3[%c0_61, %67, %c0_62, %c0_63] : memref<1x18x18x8xbf16, #tpu.memory_space<vmem>>, vector<1x16x16x8xbf16>
    %69 = vector.shape_cast %68 : vector<1x16x16x8xbf16> to vector<16x16x8xbf16>
    %70 = vector.shape_cast %69 : vector<16x16x8xbf16> to vector<256x8xbf16>
    %c6 = arith.constant 6 : index
    %c0_64 = arith.constant 0 : index
    %c0_65 = arith.constant 0 : index
    %71 = vector.load %arg4[%c6, %c0_64, %c0_65] : memref<9x8x128xbf16, #tpu.memory_space<vmem>>, vector<1x8x128xbf16>
    %72 = vector.shape_cast %71 : vector<1x8x128xbf16> to vector<8x128xbf16>
    %cst_66 = arith.constant dense<0.000000e+00> : vector<256x128xf32>
    %73 = tpu.matmul %70, %72, %cst_66 {dimension_numbers = #tpu.dot_dimension_numbers<[1], [0], [0], [1], [0, 0, 1, 1], [], []>} : vector<256x8xbf16>, vector<8x128xbf16>, vector<256x128xf32> -> vector<256x128xf32>
    %c0_67 = arith.constant 0 : index
    %c0_68 = arith.constant 0 : index
    %74 = vector.load %arg8[%c0_67, %c0_68] : memref<256x128xf32, #tpu.memory_space<vmem>>, vector<256x128xf32>
    %75 = arith.addf %74, %73 : vector<256x128xf32>
    %c0_69 = arith.constant 0 : index
    %c0_70 = arith.constant 0 : index
    %76 = vector.load %arg8[%c0_69, %c0_70] : memref<256x128xf32, #tpu.memory_space<vmem>>, vector<256x128xf32>
    tpu.vector_store %arg8[%c0_69, %c0_70], %75 {strides = array<i32>} : memref<256x128xf32, #tpu.memory_space<vmem>>, vector<256x128xf32>,
    %c2_i32_71 = arith.constant 2 : i32
    %77 = arith.addi %1, %c2_i32_71 : i32
    %c0_72 = arith.constant 0 : index
    %78 = arith.index_cast %77 : i32 to index
    %c1_73 = arith.constant 1 : index
    %c0_74 = arith.constant 0 : index
    %79 = vector.load %arg3[%c0_72, %78, %c1_73, %c0_74] : memref<1x18x18x8xbf16, #tpu.memory_space<vmem>>, vector<1x16x16x8xbf16>
    %80 = vector.shape_cast %79 : vector<1x16x16x8xbf16> to vector<16x16x8xbf16>
    %81 = vector.shape_cast %80 : vector<16x16x8xbf16> to vector<256x8xbf16>
    %c7 = arith.constant 7 : index
    %c0_75 = arith.constant 0 : index
    %c0_76 = arith.constant 0 : index
    %82 = vector.load %arg4[%c7, %c0_75, %c0_76] : memref<9x8x128xbf16, #tpu.memory_space<vmem>>, vector<1x8x128xbf16>
    %83 = vector.shape_cast %82 : vector<1x8x128xbf16> to vector<8x128xbf16>
    %cst_77 = arith.constant dense<0.000000e+00> : vector<256x128xf32>
    %84 = tpu.matmul %81, %83, %cst_77 {dimension_numbers = #tpu.dot_dimension_numbers<[1], [0], [0], [1], [0, 0, 1, 1], [], []>} : vector<256x8xbf16>, vector<8x128xbf16>, vector<256x128xf32> -> vector<256x128xf32>
    %c0_78 = arith.constant 0 : index
    %c0_79 = arith.constant 0 : index
    %85 = vector.load %arg8[%c0_78, %c0_79] : memref<256x128xf32, #tpu.memory_space<vmem>>, vector<256x128xf32>
    %86 = arith.addf %85, %84 : vector<256x128xf32>
    %c0_80 = arith.constant 0 : index
    %c0_81 = arith.constant 0 : index
    %87 = vector.load %arg8[%c0_80, %c0_81] : memref<256x128xf32, #tpu.memory_space<vmem>>, vector<256x128xf32>
    tpu.vector_store %arg8[%c0_80, %c0_81], %86 {strides = array<i32>} : memref<256x128xf32, #tpu.memory_space<vmem>>, vector<256x128xf32>,
    %c2_i32_82 = arith.constant 2 : i32
    %88 = arith.addi %1, %c2_i32_82 : i32
    %c0_83 = arith.constant 0 : index
    %89 = arith.index_cast %88 : i32 to index
    %c2_84 = arith.constant 2 : index
    %c0_85 = arith.constant 0 : index
    %90 = vector.load %arg3[%c0_83, %89, %c2_84, %c0_85] : memref<1x18x18x8xbf16, #tpu.memory_space<vmem>>, vector<1x16x16x8xbf16>
    %91 = vector.shape_cast %90 : vector<1x16x16x8xbf16> to vector<16x16x8xbf16>
    %92 = vector.shape_cast %91 : vector<16x16x8xbf16> to vector<256x8xbf16>
    %c8 = arith.constant 8 : index
    %c0_86 = arith.constant 0 : index
    %c0_87 = arith.constant 0 : index
    %93 = vector.load %arg4[%c8, %c0_86, %c0_87] : memref<9x8x128xbf16, #tpu.memory_space<vmem>>, vector<1x8x128xbf16>
    %94 = vector.shape_cast %93 : vector<1x8x128xbf16> to vector<8x128xbf16>
    %cst_88 = arith.constant dense<0.000000e+00> : vector<256x128xf32>
    %95 = tpu.matmul %92, %94, %cst_88 {dimension_numbers = #tpu.dot_dimension_numbers<[1], [0], [0], [1], [0, 0, 1, 1], [], []>} : vector<256x8xbf16>, vector<8x128xbf16>, vector<256x128xf32> -> vector<256x128xf32>
    %c0_89 = arith.constant 0 : index
    %c0_90 = arith.constant 0 : index
    %96 = vector.load %arg8[%c0_89, %c0_90] : memref<256x128xf32, #tpu.memory_space<vmem>>, vector<256x128xf32>
    %97 = arith.addf %96, %95 : vector<256x128xf32>
    %c0_91 = arith.constant 0 : index
    %c0_92 = arith.constant 0 : index
    %98 = vector.load %arg8[%c0_91, %c0_92] : memref<256x128xf32, #tpu.memory_space<vmem>>, vector<256x128xf32>
    tpu.vector_store %arg8[%c0_91, %c0_92], %97 {strides = array<i32>} : memref<256x128xf32, #tpu.memory_space<vmem>>, vector<256x128xf32>,
    %c0_93 = arith.constant 0 : index
    %c0_94 = arith.constant 0 : index
    %99 = vector.load %arg8[%c0_93, %c0_94] : memref<256x128xf32, #tpu.memory_space<vmem>>, vector<256x128xf32>
    %c0_95 = arith.constant 0 : index
    %c0_96 = arith.constant 0 : index
    %100 = vector.load %arg5[%c0_95, %c0_96] : memref<1x128xf32, #tpu.memory_space<vmem>>, vector<1x128xf32>
    %101 = vector.broadcast %100 : vector<1x128xf32> to vector<256x128xf32>
    %102 = arith.mulf %99, %101 : vector<256x128xf32>
    %c0_97 = arith.constant 0 : index
    %c0_98 = arith.constant 0 : index
    %103 = vector.load %arg6[%c0_97, %c0_98] : memref<1x128xf32, #tpu.memory_space<vmem>>, vector<1x128xf32>
    %104 = vector.broadcast %103 : vector<1x128xf32> to vector<256x128xf32>
    %105 = arith.addf %102, %104 : vector<256x128xf32>
    %106 = arith.negf %105 : vector<256x128xf32>
    %107 = math.exp %106 : vector<256x128xf32>
    %cst_99 = arith.constant 1.000000e+00 : f32
    %108 = vector.broadcast %cst_99 : f32 to vector<256x128xf32>
    %109 = arith.addf %108, %107 : vector<256x128xf32>
    %110 = arith.divf %108, %109 : vector<256x128xf32>
    %111 = arith.mulf %105, %110 : vector<256x128xf32>
    %112 = arith.truncf %111 : vector<256x128xf32> to vector<256x128xbf16>
    %c0_100 = arith.constant 0 : index
    %c0_101 = arith.constant 0 : index
    %c0_102 = arith.constant 0 : index
    %113 = vector.load %arg7[%c0_100, %c0_101, %c0_102] : memref<1x256x128xbf16, #tpu.memory_space<vmem>>, vector<1x256x128xbf16>
    %114 = vector.shape_cast %113 : vector<1x256x128xbf16> to vector<256x128xbf16>
    %115 = vector.shape_cast %112 : vector<256x128xbf16> to vector<1x256x128xbf16>
    tpu.vector_store %arg7[%c0_100, %c0_101, %c0_102], %115 {strides = array<i32>} : memref<1x256x128xbf16, #tpu.memory_space<vmem>>, vector<1x256x128xbf16>,
    return
  }
  func.func @transform_0(%arg0: i32, %arg1: i32, %arg2: i32) -> (i32, i32, i32, i32) {
    %c0_i32 = arith.constant 0 : i32
    %c0_i32_0 = arith.constant 0 : i32
    %c0_i32_1 = arith.constant 0 : i32
    %c0_i32_2 = arith.constant 0 : i32
    return %arg0, %c0_i32, %c0_i32_0, %c0_i32_1 : i32, i32, i32, i32
  }
  func.func @transform_1(%arg0: i32, %arg1: i32, %arg2: i32) -> (i32, i32, i32) {
    %c0_i32 = arith.constant 0 : i32
    %c0_i32_0 = arith.constant 0 : i32
    %c0_i32_1 = arith.constant 0 : i32
    return %c0_i32, %c0_i32_0, %arg1 : i32, i32, i32
  }
  func.func @transform_2(%arg0: i32, %arg1: i32, %arg2: i32) -> (i32, i32) {
    %c0_i32 = arith.constant 0 : i32
    %c0_i32_0 = arith.constant 0 : i32
    return %c0_i32, %arg1 : i32, i32
  }
  func.func @transform_3(%arg0: i32, %arg1: i32, %arg2: i32) -> (i32, i32) {
    %c0_i32 = arith.constant 0 : i32
    %c0_i32_0 = arith.constant 0 : i32
    return %c0_i32, %arg1 : i32, i32
  }
  func.func @transform_4(%arg0: i32, %arg1: i32, %arg2: i32) -> (i32, i32, i32) {
    %c0_i32 = arith.constant 0 : i32
    return %arg0, %arg2, %arg1 : i32, i32, i32
  }
}

</mosaic_0001>

<bundles_post_ra>
// kernel: conv_bn_act.1
= control target key start
LH: loop header
LB: loop body
LE: loop exit
PB: predicated region body
PF: predicated region fallthrough
CT: control target
= control target key end

     0   :  { %s7993_s15 = smov 0   ;;  %s7995_s16 = smov 0   ;;  %s9516_s0 = inlined_call_operand.vmem [shape: bf16[2,18,18,8], index: 0, kind: input, shape index: {}]   ;;  %s9517_s1 = inlined_call_operand.vmem [shape: bf16[9,8,128], index: 1, kind: input, shape index: {}]   ;;  %s9518_s2 = inlined_call_operand.vmem [shape: f32[1,128], index: 2, kind: input, shape index: {}]   ;;  %s9519_s3 = inlined_call_operand.vmem [shape: f32[1,128], index: 3, kind: input, shape index: {}]   ;;  %s9520_s4 = inlined_call_operand.vmem [shape: bf16[2,256,128], index: 4, kind: output, shape index: {}]  }
   0x1   :  { %s7997_s17 = smov 0  }
   0x2 LB: > { %s33_s18 = sadd.s32 1, %s7962_s16  ;;  %p6215_p0 = scmp.ge.s32.totalorder %s7966_s17, 1  ;;  %s7966_s17 = sphi %s7997_s17, %s14_s17   ;;  %s7962_s16 = sphi %s7995_s16, %s9526_s16   ;;  %s7958_s15 = sphi %s7993_s15, %s9525_s15  }
   0x3   : > { %p35_p1 = scmp.ge.s32.totalorder %s33_s18, 2  ;;  %p210_p2 = scmp.lt.s32.totalorder %s7966_s17, 3 }
   0x5   : > { %s9528_s18 = smov (%p35_p1, %s33_s18), 0  ;;  %p211_p3 = pnand %p6215_p0, %p210_p2 }
   0x6   : > { %v318_v0 = vld [vmem:[%s9517_s1] sm:$0xf] (!%p211_p3)  ;;  %vm448_vm0 = vcmask (!%p211_p3), 1043456   ;;  %p253_p4 = scmp.lt.s32.totalorder (!%p211_p3), %s7958_s15, 1  ;;  %v6446_v2 = vld [vmem:[%s9517_s1 + $0x10] sm:$0xf] (!%p211_p3) }
   0x7   : > { %214 = sbr.rel (%p211_p3) target bundleno = 582 (0x246), region = 36  ;;  %7732 = vmatprep.subr.msk.bf16.mxu1 (!%p211_p3), %vm448_vm0, %v318_v0  ;;  %v450_v1 = vsel (!%p211_p3), %vm448_vm0, %v318_v0, 0  ;;  %v6251_v3 = vld [vmem:[%s9517_s1 + $0x4] sm:$0xf] (!%p211_p3)  ;;  %7736 = vmatprep.subr.msk.bf16.mxu0 (!%p211_p3), %vm448_vm0, %v6446_v2  ;;  %v8026_v4 = vsel (!%p211_p3), %vm448_vm0, %v6446_v2, 0  ;;  %vm399_vm1 = vcmask (!%p211_p3), 64512  }
   0x8   : > { %7169 = vmatpush3.bf16.msra.mxu1 (!%p211_p3), %v450_v1  ;;  %7305 = vmatpush3.bf16.msra.mxu0 (!%p211_p3), %v8026_v4  ;;  %v6543_v5 = vld [vmem:[%s9517_s1 + $0x14] sm:$0xf] (!%p211_p3)  ;;  %vm693_vm2 = vsmask.f32 (!%p211_p3), 3328  ;;  %vm694_vm3 = vsmask.f32 (!%p211_p3), 7440 }
   0x9   : > { %7733 = vmatprep.subr.msk.bf16.mxu1 (!%p211_p3), %vm448_vm0, %v6251_v3  ;;  %7738 = vmatprep.subr.msk.bf16.mxu0 (!%p211_p3), %vm448_vm0, %v6543_v5  ;;  %v8043_v6 = vld [vmem:[%s9517_s1 + $0x18] sm:$0xf] (!%p211_p3)  ;;  %v6300_v7 = vld [vmem:[%s9517_s1 + $0x8] sm:$0xf] (!%p211_p3)  ;;  %v8051_v8 = vld [vmem:[%s9517_s1 + $0x1c] sm:$0xf] (!%p211_p3) }
   0xa   : > { %v1179_v10 = vsel (!%p211_p3), %vm448_vm0, %v6251_v3, 0  ;;  %v8057_v12 = vsel (!%p211_p3), %vm448_vm0, %v6543_v5, 0  ;;  %v8063_v14 = vsel (!%p211_p3), %vm448_vm0, %v8043_v6, 0  ;;  %v8067_v15 = vsel (!%p211_p3), %vm448_vm0, %v6300_v7, 0  ;;  %vm8085_vm4 = vmor (!%p211_p3), %vm693_vm2, %vm694_vm3 }
   0xb   : > { %v8071_v16 = vsel (!%p211_p3), %vm448_vm0, %v8051_v8, 0  ;;  %vm1534_vm5 = vcmask (!%p211_p3), 1042432   ;;  %vm1535_vm6 = vcmask (!%p211_p3), 1046532  }
   0xc   : > { %vm8160_vm7 = vmor (!%p211_p3), %vm1534_vm5, %vm1535_vm6 }
   0xe   : > { %s9530_s15 = smov (!%p253_p4, %s7958_s15), 1 }
   0xf   : > { %s7742_s27 = smul.u32 216, %s9530_s15  ;;  %s6887_s25 = sshll.u32 %s9530_s15, 7 }
  0x11   : > { %s8038_s30 = scalar_lea.vmem %s9516_s0, %s7742_s27  ;;  %s9381_s27 = scalar_lea.vmem %s9520_s4, %s6887_s25 }
  0x12   : > { %v7767_v9 = vld [vmem:[%s8038_s30] sm:$0xff]   ;;  %v7768_v11 = vld [vmem:[%s8038_s30 + $0xc] sm:$0xff]   ;;  %v7769_v13 = vld [vmem:[%s8038_s30 + $0x18] sm:$0xff]  }
  0x13   : > { %7170 = vmatprep.mubr.msk.bf16.mxu1 %vm399_vm1, %v7767_v9  ;;  %v6398_v17 = vld [vmem:[%s8038_s30 + $0xc] sm:$0xf]  ;;  %v6399_v18 = vld [vmem:[%s8038_s30 + $0x10] sm:$0xf]  ;;  %v6400_v19 = vld [vmem:[%s8038_s30 + $0x14] sm:$0x1] }
  0x14   : > { %7171 = vmatmul.mubr.msk.bf16.vlgmr.msra.gmra.mrb[0].mxu1 %vm399_vm1, %v7768_v11  ;;  %v7770_v20 = vld [vmem:[%s8038_s30 + $0x24] sm:$0xff]   ;;  %v2482_v21 = vshrl.u32 %v6398_v17, 16  ;;  %v2485_v22 = vshll.u32 %v6398_v17, 16  ;;  %v2491_v23 = vshll.u32 %v6399_v18, 16  ;;  %v2495_v24 = vshrl.u32 %v6399_v18, 16  ;;  %v7771_v42 = vld [vmem:[%s8038_s30 + $0x30] sm:$0xff]  }
  0x15   : > { %7174 = vmatprep.mubr.msk.bf16.mxu1 %vm399_vm1, %v7769_v13  ;;  %7203 = vmatpush3.bf16.msra.mxu1 %v1179_v10  ;;  %v6401_v25 = vld [vmem:[%s8038_s30 + $0x18] sm:$0xf]  ;;  %v2501_v26 = vshll.u32 %v6400_v19, 16  ;;  %v6402_v27 = vld [vmem:[%s8038_s30 + $0x1c] sm:$0xf] }
  0x16   : > { %7734 = vmatprep.subr.msk.bf16.mxu1 %vm448_vm0, %v6300_v7  ;;  %v6403_v28 = vld [vmem:[%s8038_s30 + $0x20] sm:$0x1]  ;;  %v2506_v29 = vshrl.u32 %v6401_v25, 16  ;;  %v2484_v30 = vrot.slane %v2482_v21, 4  ;;  %v2487_v31 = vrot.slane %v2485_v22, 5  ;;  %v2493_v32 = vrot.slane %v2491_v23, 5 }
  0x17   : > { %v2497_v33 = vrot.slane %v2495_v24, 4  ;;  %v2503_v34 = vrot.slane %v2501_v26, 5  ;;  %v2509_v36 = vshll.u32 %v6401_v25, 16  ;;  %v2515_v37 = vshll.u32 %v6402_v27, 16  ;;  %v6404_v46 = vld [vmem:[%s8038_s30 + $0x24] sm:$0xf] }
  0x18   : > { %v2508_v35 = vrot.slane %v2506_v29, 4  ;;  %v2488_v38 = vor.u32 %v2487_v31, %v2484_v30  ;;  %v2519_v40 = vshrl.u32 %v6402_v27, 16  ;;  %v2525_v41 = vshll.u32 %v6403_v28, 16  ;;  %v6405_v51 = vld [vmem:[%s8038_s30 + $0x28] sm:$0xf]  ;;  %v7772_v60 = vld [vmem:[%s8038_s30 + $0x3c] sm:$0xff]  }
  0x19   : > { %v2498_v39 = vor.u32 %v2497_v33, %v2493_v32  ;;  %v2511_v44 = vrot.slane %v2509_v36, 5  ;;  %v2517_v45 = vrot.slane %v2515_v37, 5  ;;  %v6406_v53 = vld [vmem:[%s8038_s30 + $0x2c] sm:$0x1]  ;;  %v2530_v54 = vshrl.u32 %v6404_v46, 16 }
  0x1a   : > { %v2489_v47 = vrot.slane %v2488_v38, 4  ;;  %v2521_v49 = vrot.slane %v2519_v40, 4  ;;  %v2527_v50 = vrot.slane %v2525_v41, 5  ;;  %v2533_v55 = vshll.u32 %v6404_v46, 16  ;;  %v6407_v62 = vld [vmem:[%s8038_s30 + $0x30] sm:$0xf] }
  0x1b   : > { %v2499_v48 = vrot.slane %v2498_v39, 4  ;;  %v2512_v52 = vor.u32 %v2511_v44, %v2508_v35  ;;  %v2539_v56 = vshll.u32 %v6405_v51, 16  ;;  %v2543_v61 = vshrl.u32 %v6405_v51, 16  ;;  %v6408_v63 = vld [vmem:[%s8038_s30 + $0x34] sm:$0xf]  ;;  %v7773_v7 = vld [vmem:[%s8038_s30 + $0x48] sm:$0xff]  }
  0x1c   : > { %7175 = vmatmul.mubr.msk.bf16.gmra.mrb[4].mxu1 %vm399_vm1, %v7770_v20  ;;  %v2494_v57 = vsel %vm8085_vm4, %v2489_v47, %v2493_v32  ;;  %v2522_v59 = vor.u32 %v2521_v49, %v2517_v45  ;;  %v2532_v2 = vrot.slane %v2530_v54, 4  ;;  %v2535_v3 = vrot.slane %v2533_v55, 5  ;;  %v6409_v5 = vld [vmem:[%s8038_s30 + $0x38] sm:$0x1]  ;;  %v6410_v25 = vld [vmem:[%s8038_s30 + $0x3c] sm:$0xf] }
  0x1d   : > { %7178 = vmatprep.mubr.msk.bf16.mxu1 %vm399_vm1, %v7771_v42  ;;  %v2504_v58 = vsel %vm8085_vm4, %v2499_v48, %v2503_v34  ;;  %v2513_v1 = vrot.slane %v2512_v52, 4  ;;  %v2541_v10 = vrot.slane %v2539_v56, 5  ;;  %v2545_v11 = vrot.slane %v2543_v61, 4  ;;  %v6411_v30 = vld [vmem:[%s8038_s30 + $0x40] sm:$0xf]  ;;  %v7774_v49 = vld [vmem:[%s8038_s30 + $0x54] sm:$0xff]  }
  0x1e   : > { %v6447_v0 = vcombine.low %v2494_v57, %v2504_v58  ;;  %v2523_v9 = vrot.slane %v2522_v59, 4  ;;  %v2549_v13 = vshll.u32 %v6406_v53, 16  ;;  %v2536_v18 = vor.u32 %v2535_v3, %v2532_v2  ;;  %v6412_v37 = vld [vmem:[%s8038_s30 + $0x44] sm:$0x1]  ;;  %v6413_v40 = vld [vmem:[%s8038_s30 + $0x48] sm:$0xf] }
  0x1f   : > { %v2518_v17 = vsel %vm8085_vm4, %v2513_v1, %v2517_v45  ;;  %v2554_v19 = vshrl.u32 %v6407_v62, 16  ;;  %v2557_v20 = vshll.u32 %v6407_v62, 16  ;;  %v2546_v22 = vor.u32 %v2545_v11, %v2541_v10  ;;  %v6414_v46 = vld [vmem:[%s8038_s30 + $0x4c] sm:$0xf]  ;;  %v6415_v52 = vld [vmem:[%s8038_s30 + $0x50] sm:$0x1] }
  0x20   : > { %7306 = vmatprep.mubr.msk.bf16.mxu0 %vm399_vm1, %v6447_v0  ;;  %v2528_v21 = vsel %vm8085_vm4, %v2523_v9, %v2527_v50  ;;  %v2551_v23 = vrot.slane %v2549_v13, 5  ;;  %v2563_v24 = vshll.u32 %v6408_v63, 16  ;;  %v2537_v27 = vrot.slane %v2536_v18, 4  ;;  %v7775_v56 = vld [vmem:[%s8038_s30 + $0x60] sm:$0xff]   ;;  %v6417_v13 = vld [vmem:[%s8038_s30 + $0x58] sm:$0xf] }
  0x21   : > { %v6448_v26 = vcombine.low %v2518_v17, %v2528_v21  ;;  %v2556_v28 = vrot.slane %v2554_v19, 4  ;;  %v2559_v29 = vrot.slane %v2557_v20, 5  ;;  %v2547_v31 = vrot.slane %v2546_v22, 4  ;;  %v6418_v21 = vld [vmem:[%s8038_s30 + $0x5c] sm:$0x1] }
  0x22   : > { %v2565_v32 = vrot.slane %v2563_v24, 5  ;;  %v2567_v33 = vshrl.u32 %v6408_v63, 16  ;;  %v2573_v34 = vshll.u32 %v6409_v5, 16  ;;  %v2542_v35 = vsel %vm8085_vm4, %v2537_v27, %v2541_v10  ;;  %v6416_v5 = vld [vmem:[%s8038_s30 + $0x54] sm:$0xf] }
  0x23   : > { %7307 = vmatmul.mubr.msk.bf16.vlgmr.msra.gmra.mrb[0].mxu0 %vm399_vm1, %v6448_v26  ;;  %v2560_v36 = vor.u32 %v2559_v29, %v2556_v28  ;;  %v2578_v38 = vshrl.u32 %v6410_v25, 16  ;;  %v2581_v39 = vshll.u32 %v6410_v25, 16  ;;  %v2552_v41 = vsel %vm8085_vm4, %v2547_v31, %v2551_v23  ;;  %v6419_v22 = vld [vmem:[%s8038_s30 + $0x60] sm:$0xf]  ;;  %v6420_v27 = vld [vmem:[%s8038_s30 + $0x64] sm:$0xf] }
  0x24   : > { %7179 = vmatmul.mubr.msk.bf16.gmra.mrb[8].mxu1 %vm399_vm1, %v7772_v60  ;;  %7339 = vmatpush3.bf16.msra.mxu0 %v8057_v12  ;;  %v2569_v42 = vrot.slane %v2567_v33, 4  ;;  %v2575_v44 = vrot.slane %v2573_v34, 5  ;;  %v2587_v45 = vshll.u32 %v6411_v30, 16  ;;  %v6449_v47 = vcombine.low %v2542_v35, %v2552_v41 }
  0x25   : > { %7182 = vmatprep.mubr.msk.bf16.mxu1 %vm399_vm1, %v7773_v7  ;;  %v2561_v48 = vrot.slane %v2560_v36, 4  ;;  %v2580_v50 = vrot.slane %v2578_v38, 4  ;;  %v2583_v51 = vrot.slane %v2581_v39, 5  ;;  %7739 = vmatprep.subr.msk.bf16.mxu0 %vm448_vm0, %v8043_v6  ;;  %v2591_v12 = vshrl.u32 %v6411_v30, 16  ;;  %v7776_v30 = vld [vmem:[%s8038_s30 + $0x6c] sm:$0xff]   ;;  %v7777_v38 = vld [vmem:[%s8038_s30 + $0x78] sm:$0xff]  }
  0x26   : > { %v2570_v53 = vor.u32 %v2569_v42, %v2565_v32  ;;  %v2589_v54 = vrot.slane %v2587_v45, 5  ;;  %v2597_v55 = vshll.u32 %v6412_v37, 16  ;;  %7310 = vmatprep.mubr.msk.bf16.mxu0 %vm399_vm1, %v6449_v47  ;;  %v2602_v59 = vshrl.u32 %v6413_v40, 16  ;;  %v6421_v37 = vld [vmem:[%s8038_s30 + $0x68] sm:$0x1] }
  0x27   : > { %v2566_v57 = vsel %vm8085_vm4, %v2561_v48, %v2565_v32  ;;  %v2584_v58 = vor.u32 %v2583_v51, %v2580_v50  ;;  %v2605_v60 = vshll.u32 %v6413_v40, 16  ;;  %v2593_v62 = vrot.slane %v2591_v12, 4 }
  0x28   : > { %v2571_v61 = vrot.slane %v2570_v53, 4  ;;  %v2599_v63 = vrot.slane %v2597_v55, 5  ;;  %v2611_v0 = vshll.u32 %v6414_v46, 16  ;;  %v2604_v1 = vrot.slane %v2602_v59, 4  ;;  %v6483_v59 = vld [vmem:[%s8038_s30 + $0x1c] sm:$0xf] }
  0x29   : > { %v2585_v6 = vrot.slane %v2584_v58, 4  ;;  %v2607_v2 = vrot.slane %v2605_v60, 5  ;;  %v2615_v3 = vshrl.u32 %v6414_v46, 16  ;;  %v2594_v9 = vor.u32 %v2593_v62, %v2589_v54  ;;  %v6482_v58 = vld [vmem:[%s8038_s30 + $0x18] sm:$0xe] }
  0x2a   : > { %v2576_v7 = vsel %vm8085_vm4, %v2571_v61, %v2575_v44  ;;  %v2613_v10 = vrot.slane %v2611_v0, 5  ;;  %v2621_v11 = vshll.u32 %v6415_v52, 16  ;;  %v2626_v25 = vshrl.u32 %v6416_v5, 16  ;;  %v6479_v44 = vld [vmem:[%s8038_s30 + $0xc] sm:$0xe] }
  0x2b   : > { %v6450_v17 = vcombine.low %v2566_v57, %v2576_v7  ;;  %v2590_v18 = vsel %vm8085_vm4, %v2585_v6, %v2589_v54  ;;  %v2608_v19 = vor.u32 %v2607_v2, %v2604_v1  ;;  %v2617_v20 = vrot.slane %v2615_v3, 4  ;;  %v6481_v54 = vld [vmem:[%s8038_s30 + $0x14] sm:$0x1]  ;;  %v6484_v6 = vld [vmem:[%s8038_s30 + $0x20] sm:$0x1]  ;;  %v7778_v3 = vld [vmem:[%s8038_s30 + $0x84] sm:$0xff]  }
  0x2c   : > { %7183 = vmatmul.mubr.msk.bf16.gmra.mrb[12].mxu1 %vm399_vm1, %v7774_v49  ;;  %v2595_v23 = vrot.slane %v2594_v9, 4  ;;  %v2623_v24 = vrot.slane %v2621_v11, 5  ;;  %v2629_v26 = vshll.u32 %v6416_v5, 16  ;;  %v2635_v31 = vshll.u32 %v6417_v13, 16  ;;  %v6480_v49 = vld [vmem:[%s8038_s30 + $0x10] sm:$0xf] }
  0x2d   : > { %7186 = vmatprep.mubr.msk.bf16.mxu1 %vm399_vm1, %v7775_v56  ;;  %7311 = vmatmul.mubr.msk.bf16.gmra.mrb[4].mxu0 %vm399_vm1, %v6450_v17  ;;  %v2609_v28 = vrot.slane %v2608_v19, 4  ;;  %v2618_v29 = vor.u32 %v2617_v20, %v2613_v10  ;;  %v2639_v32 = vshrl.u32 %v6417_v13, 16  ;;  %v2628_v34 = vrot.slane %v2626_v25, 4 }
  0x2e   : > { %v2600_v33 = vsel %vm8085_vm4, %v2595_v23, %v2599_v63  ;;  %v2631_v35 = vrot.slane %v2629_v26, 5  ;;  %v2645_v36 = vshll.u32 %v6418_v21, 16  ;;  %v2637_v42 = vrot.slane %v2635_v31, 5  ;;  %v6485_v21 = vld [vmem:[%s8038_s30 + $0x24] sm:$0xe]  ;;  %v7779_v26 = vld [vmem:[%s8038_s30 + $0x90] sm:$0xff]  }
  0x2f   : > { %v6451_v39 = vcombine.low %v2590_v18, %v2600_v33  ;;  %v2614_v40 = vsel %vm8085_vm4, %v2609_v28, %v2613_v10  ;;  %v2619_v41 = vrot.slane %v2618_v29, 4  ;;  %v2641_v46 = vrot.slane %v2639_v32, 4 }
  0x30   : > { %v2632_v45 = vor.u32 %v2631_v35, %v2628_v34  ;;  %v2647_v47 = vrot.slane %v2645_v36, 5  ;;  %v2650_v48 = vshrl.u32 %v6419_v22, 16  ;;  %v2653_v51 = vshll.u32 %v6419_v22, 16  ;;  %v6488_v36 = vld [vmem:[%s8038_s30 + $0x30] sm:$0xe] }
  0x31   : > { %7314 = vmatprep.mubr.msk.bf16.mxu0 %vm399_vm1, %v6451_v39  ;;  %v2624_v50 = vsel %vm8085_vm4, %v2619_v41, %v2623_v24  ;;  %v2659_v52 = vshll.u32 %v6420_v27, 16  ;;  %v2663_v53 = vshrl.u32 %v6420_v27, 16  ;;  %v2642_v56 = vor.u32 %v2641_v46, %v2637_v42  ;;  %v6486_v27 = vld [vmem:[%s8038_s30 + $0x28] sm:$0xf] }
  0x32   : > { %v6452_v12 = vcombine.low %v2614_v40, %v2624_v50  ;;  %v2633_v55 = vrot.slane %v2632_v45, 4  ;;  %v2652_v57 = vrot.slane %v2650_v48, 4  ;;  %v2655_v60 = vrot.slane %v2653_v51, 5  ;;  %v6491_v50 = vld [vmem:[%s8038_s30 + $0x3c] sm:$0xe] }
  0x33   : > { %v2661_v61 = vrot.slane %v2659_v52, 5  ;;  %v2665_v62 = vrot.slane %v2663_v53, 4  ;;  %v2669_v63 = vshll.u32 %v6421_v37, 16  ;;  %v2643_v2 = vrot.slane %v2642_v56, 4  ;;  %v6489_v37 = vld [vmem:[%s8038_s30 + $0x34] sm:$0xf] }
  0x34   : > { %7187 = vmatmul.mubr.msk.bf16.gmra.mrb[16].mxu1 %vm399_vm1, %v7776_v30  ;;  %v2638_v1 = vsel %vm8085_vm4, %v2633_v55, %v2637_v42  ;;  %v6527_v5 = vrot.slane %v6479_v44, 9  ;;  %v3321_v7 = vrot.slane %v6480_v49, 5  ;;  %v2656_v9 = vor.u32 %v2655_v60, %v2652_v57  ;;  %v6487_v30 = vld [vmem:[%s8038_s30 + $0x2c] sm:$0x1]  ;;  %v6492_v51 = vld [vmem:[%s8038_s30 + $0x40] sm:$0xf] }
  0x35   : > { %7190 = vmatprep.mubr.msk.bf16.mxu1 %vm399_vm1, %v7777_v38  ;;  %7315 = vmatmul.mubr.msk.bf16.gmra.mrb[8].mxu0 %vm399_vm1, %v6452_v12  ;;  %v2666_v10 = vor.u32 %v2665_v62, %v2661_v61  ;;  %v2671_v11 = vrot.slane %v2669_v63, 5  ;;  %v3324_v13 = vrot.slane %v6481_v54, 5  ;;  %v2648_v17 = vsel %vm8085_vm4, %v2643_v2, %v2647_v47  ;;  %v6490_v38 = vld [vmem:[%s8038_s30 + $0x38] sm:$0x1]  ;;  %v7780_v52 = vld [vmem:[%s8038_s30 + $0x9c] sm:$0xff]  }
  0x36   : > { %v3322_v18 = vsel %vm8160_vm7, %v6527_v5, %v3321_v7  ;;  %v3323_v19 = vrot.slane %v3321_v7, 4  ;;  %v6528_v20 = vrot.slane %v6482_v58, 9  ;;  %v6453_v22 = vcombine.low %v2638_v1, %v2648_v17  ;;  %v6493_v55 = vld [vmem:[%s8038_s30 + $0x44] sm:$0x1]  ;;  %v6494_v56 = vld [vmem:[%s8038_s30 + $0x48] sm:$0xe] }
  0x37   : > { %v2657_v23 = vrot.slane %v2656_v9, 4  ;;  %v2667_v24 = vrot.slane %v2666_v10, 4  ;;  %v3328_v25 = vrot.slane %v6483_v59, 5  ;;  %v3331_v29 = vrot.slane %v6484_v6, 5  ;;  %v7781_v58 = vld [vmem:[%s8038_s30 + $0xa8] sm:$0xff]  }
  0x38   : > { %v3325_v28 = vsel %vm8160_vm7, %v3323_v19, %v3324_v13  ;;  %v6529_v31 = vrot.slane %v6485_v21, 9  ;;  %v3335_v32 = vrot.slane %v6486_v27, 5  ;;  %7318 = vmatprep.mubr.msk.bf16.mxu0 %vm399_vm1, %v6453_v22  ;;  %v3338_v44 = vrot.slane %v6487_v30, 5  ;;  %v6495_v62 = vld [vmem:[%s8038_s30 + $0x4c] sm:$0xf] }
  0x39   : > { %v2662_v33 = vsel %vm8085_vm4, %v2657_v23, %v2661_v61  ;;  %v2672_v34 = vsel %vm8085_vm4, %v2667_v24, %v2671_v11  ;;  %v6544_v35 = vcombine.low %v3322_v18, %v3325_v28  ;;  %v3329_v40 = vsel %vm8160_vm7, %v6528_v20, %v3328_v25  ;;  %v6496_v1 = vld [vmem:[%s8038_s30 + $0x50] sm:$0x1]  ;;  %v645_v5 = vld [vmem:[%s8038_s30] sm:$0xf]  ;;  %v646_v13 = vld [vmem:[%s8038_s30 + $0x4] sm:$0xf] }
  0x3a   : > { %v6454_v39 = vcombine.low %v2662_v33, %v2672_v34  ;;  %v3330_v41 = vrot.slane %v3328_v25, 4  ;;  %v3337_v42 = vrot.slane %v3335_v32, 4  ;;  %v6530_v45 = vrot.slane %v6488_v36, 9  ;;  %v647_v17 = vld [vmem:[%s8038_s30 + $0x8] sm:$0x1] }
  0x3b   : > { %v3342_v46 = vrot.slane %v6489_v37, 5  ;;  %v3345_v47 = vrot.slane %v6490_v38, 5  ;;  %v3336_v49 = vsel %vm8160_vm7, %v6529_v31, %v3335_v32  ;;  %v6531_v59 = vrot.slane %v6491_v50, 9  ;;  %v648_v22 = vld [vmem:[%s8038_s30 + $0xc] sm:$0xf] }
  0x3c   : > { %7191 = vmatmul.mubr.msk.bf16.gmra.mrb[20].mxu1 %vm399_vm1, %v7778_v3  ;;  %v3332_v48 = vsel %vm8160_vm7, %v3330_v41, %v3331_v29  ;;  %v3339_v53 = vsel %vm8160_vm7, %v3337_v42, %v3338_v44  ;;  %v3349_v60 = vrot.slane %v6492_v51, 5  ;;  %v3352_v61 = vrot.slane %v6493_v55, 5  ;;  %v649_v27 = vld [vmem:[%s8038_s30 + $0x10] sm:$0xf]  ;;  %v650_v32 = vld [vmem:[%s8038_s30 + $0x14] sm:$0x1] }
  0x3d   : > { %7194 = vmatprep.mubr.msk.bf16.mxu1 %vm399_vm1, %v7779_v26  ;;  %7319 = vmatmul.mubr.msk.bf16.gmra.mrb[12].mxu0 %vm399_vm1, %v6454_v39  ;;  %v8203_v54 = vsel %vm8160_vm7, %v6530_v45, %v3342_v46  ;;  %v3344_v12 = vrot.slane %v3342_v46, 4  ;;  %v6545_v57 = vcombine.low %v3329_v40, %v3332_v48  ;;  %v6546_v63 = vcombine.low %v3336_v49, %v3339_v53  ;;  %v6497_v33 = vld [vmem:[%s8038_s30 + $0x54] sm:$0xe]  ;;  %v6498_v38 = vld [vmem:[%s8038_s30 + $0x58] sm:$0xf] }
  0x3e   : > { %7340 = vmatprep.mubr.msk.bf16.mxu0 %vm399_vm1, %v6544_v35  ;;  %v6532_v2 = vrot.slane %v6494_v56, 9  ;;  %v3356_v3 = vrot.slane %v6495_v62, 5  ;;  %v8220_v9 = vsel %vm8160_vm7, %v6531_v59, %v3349_v60  ;;  %v3351_v10 = vrot.slane %v3349_v60, 4  ;;  %v6499_v44 = vld [vmem:[%s8038_s30 + $0x5c] sm:$0x1]  ;;  %v7782_v45 = vld [vmem:[%s8038_s30 + $0xb4] sm:$0xff]  }
  0x3f   : > { %v8212_v6 = vsel %vm8160_vm7, %v3344_v12, %v3345_v47  ;;  %v3359_v11 = vrot.slane %v6496_v1, 5  ;;  %v697_v20 = vshrl.u32 %v645_v5, 16  ;;  %v700_v21 = vshll.u32 %v645_v5, 16  ;;  %v6500_v50 = vld [vmem:[%s8038_s30 + $0x60] sm:$0xe] }
  0x40   : > { %v6547_v7 = vcombine.low %v8203_v54, %v8212_v6  ;;  %v8226_v18 = vsel %vm8160_vm7, %v6532_v2, %v3356_v3  ;;  %v3358_v19 = vrot.slane %v3356_v3, 4  ;;  %v8232_v23 = vsel %vm8160_vm7, %v3351_v10, %v3352_v61  ;;  %v6501_v55 = vld [vmem:[%s8038_s30 + $0x64] sm:$0xf]  ;;  %v6502_v59 = vld [vmem:[%s8038_s30 + $0x68] sm:$0x1] }
  0x41   : > { %v706_v24 = vshll.u32 %v646_v13, 16  ;;  %v710_v25 = vshrl.u32 %v646_v13, 16  ;;  %v716_v26 = vshll.u32 %v647_v17, 16  ;;  %v6548_v28 = vcombine.low %v8220_v9, %v8232_v23  ;;  %v651_v1 = vld [vmem:[%s8038_s30 + $0x18] sm:$0xf] }
  0x42   : > { %v8240_v29 = vsel %vm8160_vm7, %v3358_v19, %v3359_v11  ;;  %v699_v30 = vrot.slane %v697_v20, 4  ;;  %v702_v31 = vrot.slane %v700_v21, 5  ;;  %v721_v40 = vshrl.u32 %v648_v22, 16  ;;  %v652_v19 = vld [vmem:[%s8038_s30 + $0x1c] sm:$0xf] }
  0x43   : > { %v6549_v34 = vcombine.low %v8226_v18, %v8240_v29  ;;  %v708_v35 = vrot.slane %v706_v24, 5  ;;  %v712_v36 = vrot.slane %v710_v25, 4  ;;  %v718_v37 = vrot.slane %v716_v26, 5  ;;  %v656_v9 = vld [vmem:[%s8038_s30 + $0x2c] sm:$0x1] }
  0x44   : > { %7195 = vmatmul.mubr.msk.bf16.gmra.mrb[24].mxu1 %vm399_vm1, %v7780_v52  ;;  %v703_v39 = vor.u32 %v702_v31, %v699_v30  ;;  %v724_v41 = vshll.u32 %v648_v22, 16  ;;  %v730_v42 = vshll.u32 %v649_v27, 16  ;;  %v734_v47 = vshrl.u32 %v649_v27, 16  ;;  %v653_v22 = vld [vmem:[%s8038_s30 + $0x20] sm:$0x1] }
  0x45   : > { %7198 = vmatprep.mubr.msk.bf16.mxu1 %vm399_vm1, %v7781_v58  ;;  %7341 = vmatmul.mubr.msk.bf16.vlgmr.msra.gmra.mrb[0].mxu0 %vm399_vm1, %v6545_v57  ;;  %v713_v46 = vor.u32 %v712_v36, %v708_v35  ;;  %v740_v48 = vshll.u32 %v650_v32, 16  ;;  %v6533_v49 = vrot.slane %v6497_v33, 9  ;;  %v723_v52 = vrot.slane %v721_v40, 4  ;;  %v654_v32 = vld [vmem:[%s8038_s30 + $0x24] sm:$0xf] }
  0x46   : > { %7373 = vmatpush3.bf16.msra.mxu0 %v8063_v14  ;;  %7344 = vmatprep.mubr.msk.bf16.mxu0 %vm399_vm1, %v6546_v63  ;;  %v704_v51 = vrot.slane %v703_v39, 4  ;;  %v726_v53 = vrot.slane %v724_v41, 5  ;;  %v732_v12 = vrot.slane %v730_v42, 5  ;;  %v736_v14 = vrot.slane %v734_v47, 4  ;;  %v6503_v23 = vld [vmem:[%s8038_s30 + $0x6c] sm:$0xe] }
  0x47   : > { %7740 = vmatprep.subr.msk.bf16.mxu0 %vm448_vm0, %v8051_v8  ;;  %v714_v56 = vrot.slane %v713_v46, 4  ;;  %v742_v57 = vrot.slane %v740_v48, 5  ;;  %v3363_v58 = vrot.slane %v6498_v38, 5  ;;  %v3366_v62 = vrot.slane %v6499_v44, 5  ;;  %v6504_v44 = vld [vmem:[%s8038_s30 + $0x70] sm:$0xf] }
  0x48   : > { %v709_v60 = vsel %vm8085_vm4, %v704_v51, %v708_v35  ;;  %v727_v61 = vor.u32 %v726_v53, %v723_v52  ;;  %v6534_v63 = vrot.slane %v6500_v50, 9  ;;  %v737_v8 = vor.u32 %v736_v14, %v732_v12  ;;  %v655_v35 = vld [vmem:[%s8038_s30 + $0x28] sm:$0xf]  ;;  %v6506_v50 = vld [vmem:[%s8038_s30 + $0x78] sm:$0xe] }
  0x49   : > { %v719_v2 = vsel %vm8085_vm4, %v714_v56, %v718_v37  ;;  %v8265_v3 = vsel %vm8160_vm7, %v6533_v49, %v3363_v58  ;;  %v3365_v5 = vrot.slane %v3363_v58, 4  ;;  %v3370_v13 = vrot.slane %v6501_v55, 5  ;;  %v6507_v55 = vld [vmem:[%s8038_s30 + $0x7c] sm:$0xf] }
  0x4a   : > { %v6252_v10 = vcombine.low %v709_v60, %v719_v2  ;;  %v728_v11 = vrot.slane %v727_v61, 4  ;;  %v3373_v17 = vrot.slane %v6502_v59, 5  ;;  %v738_v20 = vrot.slane %v737_v8, 4  ;;  %v6508_v59 = vld [vmem:[%s8038_s30 + $0x80] sm:$0x1] }
  0x4b   : > { %v3367_v21 = vsel %vm8160_vm7, %v3365_v5, %v3366_v62  ;;  %v745_v24 = vshrl.u32 %v651_v1, 16  ;;  %v748_v25 = vshll.u32 %v651_v1, 16  ;;  %v8281_v30 = vsel %vm8160_vm7, %v6534_v63, %v3370_v13  ;;  %v657_v1 = vld [vmem:[%s8038_s30 + $0x30] sm:$0xf] }
  0x4c   : > { %7199 = vmatmul.mubr.msk.bf16.gmra.mrb[28].mxu1 %vm399_vm1, %v7782_v45  ;;  %v733_v26 = vsel %vm8085_vm4, %v728_v11, %v732_v12  ;;  %v6550_v27 = vcombine.low %v8265_v3, %v3367_v21  ;;  %v3372_v31 = vrot.slane %v3370_v13, 4  ;;  %v743_v54 = vsel %vm8085_vm4, %v738_v20, %v742_v57  ;;  %v6505_v45 = vld [vmem:[%s8038_s30 + $0x74] sm:$0x1] }
  0x4d   : > { %7345 = vmatmul.mubr.msk.bf16.gmra.mrb[4].mxu0 %vm399_vm1, %v6547_v7  ;;  %7204 = vmatprep.mubr.msk.bf16.mxu1 %vm399_vm1, %v6252_v10  ;;  %v747_v6 = vrot.slane %v745_v24, 4  ;;  %v750_v7 = vrot.slane %v748_v25, 5  ;;  %v754_v33 = vshll.u32 %v652_v19, 16  ;;  %v6253_v36 = vcombine.low %v733_v26, %v743_v54  ;;  %v659_v25 = vld [vmem:[%s8038_s30 + $0x38] sm:$0x1] }
  0x4e   : > { %7348 = vmatprep.mubr.msk.bf16.mxu0 %vm399_vm1, %v6548_v28  ;;  %v8293_v37 = vsel %vm8160_vm7, %v3372_v31, %v3373_v17  ;;  %v758_v38 = vshrl.u32 %v652_v19, 16  ;;  %v764_v39 = vshll.u32 %v653_v22, 16  ;;  %v769_v42 = vshrl.u32 %v654_v32, 16  ;;  %v660_v26 = vld [vmem:[%s8038_s30 + $0x3c] sm:$0xf] }
  0x4f   : > { %v6551_v28 = vcombine.low %v8281_v30, %v8293_v37  ;;  %v751_v40 = vor.u32 %v750_v7, %v747_v6  ;;  %v756_v41 = vrot.slane %v754_v33, 5  ;;  %v772_v48 = vshll.u32 %v654_v32, 16 }
  0x50   : > { %v760_v46 = vrot.slane %v758_v38, 4  ;;  %v766_v47 = vrot.slane %v764_v39, 5  ;;  %v778_v49 = vshll.u32 %v655_v35, 16  ;;  %v771_v52 = vrot.slane %v769_v42, 4 }
  0x51   : > { %v752_v51 = vrot.slane %v751_v40, 4  ;;  %v782_v53 = vshrl.u32 %v655_v35, 16  ;;  %v788_v12 = vshll.u32 %v656_v9, 16  ;;  %v774_v14 = vrot.slane %v772_v48, 5 }
  0x52   : > { %v761_v56 = vor.u32 %v760_v46, %v756_v41  ;;  %v780_v57 = vrot.slane %v778_v49, 5  ;;  %v6535_v58 = vrot.slane %v6503_v23, 9  ;;  %v3377_v63 = vrot.slane %v6504_v44, 5  ;;  %v662_v23 = vld [vmem:[%s8038_s30 + $0x44] sm:$0x1] }
  0x53   : > { %v757_v60 = vsel %vm8085_vm4, %v752_v51, %v756_v41  ;;  %v784_v61 = vrot.slane %v782_v53, 4  ;;  %v790_v62 = vrot.slane %v788_v12, 5  ;;  %v775_v8 = vor.u32 %v774_v14, %v771_v52  ;;  %v6509_v41 = vld [vmem:[%s8038_s30 + $0x84] sm:$0xe] }
  0x54   : > { %7205 = vmatmul.mubr.msk.bf16.vlgmr.msra.gmra.mrb[0].mxu1 %vm399_vm1, %v6253_v36  ;;  %v762_v2 = vrot.slane %v761_v56, 4  ;;  %v3380_v3 = vrot.slane %v6505_v45, 5  ;;  %v6536_v5 = vrot.slane %v6506_v50, 9  ;;  %v3378_v10 = vsel %vm8160_vm7, %v6535_v58, %v3377_v63  ;;  %v661_v36 = vld [vmem:[%s8038_s30 + $0x40] sm:$0xf] }
  0x55   : > { %7237 = vmatpush3.bf16.msra.mxu1 %v8067_v15  ;;  %7349 = vmatmul.mubr.msk.bf16.gmra.mrb[8].mxu0 %vm399_vm1, %v6549_v34  ;;  %v785_v15 = vor.u32 %v784_v61, %v780_v57  ;;  %v3379_v11 = vrot.slane %v3377_v63, 4  ;;  %v3384_v13 = vrot.slane %v6507_v55, 5  ;;  %v776_v18 = vrot.slane %v775_v8, 4  ;;  %v658_v34 = vld [vmem:[%s8038_s30 + $0x34] sm:$0xf] }
  0x56   : > { %7352 = vmatprep.mubr.msk.bf16.mxu0 %vm399_vm1, %v6550_v27  ;;  %v767_v17 = vsel %vm8085_vm4, %v762_v2, %v766_v47  ;;  %v3387_v29 = vrot.slane %v6508_v59, 5  ;;  %v793_v19 = vshrl.u32 %v657_v1, 16  ;;  %v796_v7 = vshll.u32 %v657_v1, 16  ;;  %v6510_v47 = vld [vmem:[%s8038_s30 + $0x88] sm:$0xf] }
  0x57   : > { %v6254_v20 = vcombine.low %v757_v60, %v767_v17  ;;  %v786_v21 = vrot.slane %v785_v15, 4  ;;  %v3381_v22 = vsel %vm8160_vm7, %v3379_v11, %v3380_v3  ;;  %v8323_v24 = vsel %vm8160_vm7, %v6536_v5, %v3384_v13  ;;  %v6511_v56 = vld [vmem:[%s8038_s30 + $0x8c] sm:$0x1]  ;;  %v6514_v3 = vld [vmem:[%s8038_s30 + $0x98] sm:$0x1] }
  0x58   : > { %v781_v27 = vsel %vm8085_vm4, %v776_v18, %v780_v57  ;;  %v6552_v31 = vcombine.low %v3378_v10, %v3381_v22  ;;  %v3386_v32 = vrot.slane %v3384_v13, 4  ;;  %v795_v54 = vrot.slane %v793_v19, 4  ;;  %v6512_v57 = vld [vmem:[%s8038_s30 + $0x90] sm:$0xe]  ;;  %v663_v5 = vld [vmem:[%s8038_s30 + $0x48] sm:$0xf] }
  0x59   : > { %7208 = vmatprep.mubr.msk.bf16.mxu1 %vm399_vm1, %v6254_v20  ;;  %v791_v6 = vsel %vm8085_vm4, %v786_v21, %v790_v62  ;;  %v802_v33 = vshll.u32 %v658_v34, 16  ;;  %v806_v35 = vshrl.u32 %v658_v34, 16  ;;  %v812_v9 = vshll.u32 %v659_v25, 16  ;;  %v6513_v62 = vld [vmem:[%s8038_s30 + $0x94] sm:$0xf] }
  0x5a   : > { %v6255_v38 = vcombine.low %v781_v27, %v791_v6  ;;  %v3388_v39 = vsel %vm8160_vm7, %v3386_v32, %v3387_v29  ;;  %v817_v40 = vshrl.u32 %v660_v26, 16  ;;  %v798_v44 = vrot.slane %v796_v7, 5  ;;  %v664_v19 = vld [vmem:[%s8038_s30 + $0x4c] sm:$0xf] }
  0x5b   : > { %v6553_v42 = vcombine.low %v8323_v24, %v3388_v39  ;;  %v804_v45 = vrot.slane %v802_v33, 5  ;;  %v808_v46 = vrot.slane %v806_v35, 4  ;;  %v814_v48 = vrot.slane %v812_v9, 5  ;;  %v665_v24 = vld [vmem:[%s8038_s30 + $0x50] sm:$0x1] }
  0x5c   : > { %7209 = vmatmul.mubr.msk.bf16.gmra.mrb[4].mxu1 %vm399_vm1, %v6255_v38  ;;  %v819_v49 = vrot.slane %v817_v40, 4  ;;  %v820_v50 = vshll.u32 %v660_v26, 16  ;;  %v826_v51 = vshll.u32 %v661_v36, 16  ;;  %v799_v52 = vor.u32 %v798_v44, %v795_v54  ;;  %v666_v54 = vld [vmem:[%s8038_s30 + $0x54] sm:$0xf] }
  0x5d   : > { %7353 = vmatmul.mubr.msk.bf16.gmra.mrb[12].mxu0 %vm399_vm1, %v6551_v28  ;;  %v809_v53 = vor.u32 %v808_v46, %v804_v45  ;;  %v830_v12 = vshrl.u32 %v661_v36, 16  ;;  %v836_v55 = vshll.u32 %v662_v23, 16  ;;  %v6537_v28 = vrot.slane %v6509_v41, 9  ;;  %v667_v36 = vld [vmem:[%s8038_s30 + $0x58] sm:$0xf] }
  0x5e   : > { %7356 = vmatprep.mubr.msk.bf16.mxu0 %vm399_vm1, %v6552_v31  ;;  %v822_v30 = vrot.slane %v820_v50, 5  ;;  %v828_v37 = vrot.slane %v826_v51, 5  ;;  %v3391_v14 = vrot.slane %v6510_v47, 5  ;;  %v800_v58 = vrot.slane %v799_v52, 4  ;;  %v668_v40 = vld [vmem:[%s8038_s30 + $0x5c] sm:$0x1] }
  0x5f   : > { %v810_v59 = vrot.slane %v809_v53, 4  ;;  %v832_v60 = vrot.slane %v830_v12, 4  ;;  %v838_v61 = vrot.slane %v836_v55, 5  ;;  %v3394_v8 = vrot.slane %v6511_v56, 5  ;;  %v6515_v41 = vld [vmem:[%s8038_s30 + $0x9c] sm:$0xe] }
  0x60   : > { %v823_v63 = vor.u32 %v822_v30, %v819_v49  ;;  %v3392_v1 = vsel %vm8160_vm7, %v6537_v28, %v3391_v14  ;;  %v3393_v2 = vrot.slane %v3391_v14, 4  ;;  %v805_v15 = vsel %vm8085_vm4, %v800_v58, %v804_v45  ;;  %v6516_v47 = vld [vmem:[%s8038_s30 + $0xa0] sm:$0xf]  ;;  %v6517_v52 = vld [vmem:[%s8038_s30 + $0xa4] sm:$0x1] }
  0x61   : > { %v815_v10 = vsel %vm8085_vm4, %v810_v59, %v814_v48  ;;  %v833_v11 = vor.u32 %v832_v60, %v828_v37  ;;  %v6538_v13 = vrot.slane %v6512_v57, 9  ;;  %v3398_v34 = vrot.slane %v6513_v62, 5  ;;  %v6518_v30 = vld [vmem:[%s8038_s30 + $0xa8] sm:$0xe]  ;;  %v6519_v58 = vld [vmem:[%s8038_s30 + $0xac] sm:$0xf] }
  0x62   : > { %v6256_v17 = vcombine.low %v805_v15, %v815_v10  ;;  %v824_v18 = vrot.slane %v823_v63, 4  ;;  %v3395_v29 = vsel %vm8160_vm7, %v3393_v2, %v3394_v8  ;;  %v3401_v22 = vrot.slane %v6514_v3, 5  ;;  %v6520_v63 = vld [vmem:[%s8038_s30 + $0xb0] sm:$0x1]  ;;  %v670_v15 = vld [vmem:[%s8038_s30 + $0x64] sm:$0xf] }
  0x63   : > { %v834_v20 = vrot.slane %v833_v11, 4  ;;  %v6554_v21 = vcombine.low %v3392_v1, %v3395_v29  ;;  %v841_v25 = vshrl.u32 %v663_v5, 16  ;;  %v3399_v27 = vsel %vm8160_vm7, %v6538_v13, %v3398_v34 }
  0x64   : > { %7212 = vmatprep.mubr.msk.bf16.mxu1 %vm399_vm1, %v6256_v17  ;;  %v829_v26 = vsel %vm8085_vm4, %v824_v18, %v828_v37  ;;  %v3400_v31 = vrot.slane %v3398_v34, 4  ;;  %v844_v32 = vshll.u32 %v663_v5, 16  ;;  %v850_v33 = vshll.u32 %v664_v19, 16  ;;  %v669_v5 = vld [vmem:[%s8038_s30 + $0x60] sm:$0xf] }
  0x65   : > { %7357 = vmatmul.mubr.msk.bf16.gmra.mrb[16].mxu0 %vm399_vm1, %v6553_v42  ;;  %v839_v6 = vsel %vm8085_vm4, %v834_v20, %v838_v61  ;;  %v843_v7 = vrot.slane %v841_v25, 4  ;;  %v854_v35 = vshrl.u32 %v664_v19, 16  ;;  %v860_v23 = vshll.u32 %v665_v24, 16  ;;  %v671_v18 = vld [vmem:[%s8038_s30 + $0x68] sm:$0x1] }
  0x66   : > { %7360 = vmatprep.mubr.msk.bf16.mxu0 %vm399_vm1, %v6554_v21  ;;  %v6257_v38 = vcombine.low %v829_v26, %v839_v6  ;;  %v3402_v39 = vsel %vm8160_vm7, %v3400_v31, %v3401_v22  ;;  %v846_v9 = vrot.slane %v844_v32, 5  ;;  %v852_v44 = vrot.slane %v850_v33, 5  ;;  %v672_v21 = vld [vmem:[%s8038_s30 + $0x6c] sm:$0xf]  ;;  %v673_v6 = vld [vmem:[%s8038_s30 + $0x70] sm:$0xf] }
  0x67   : > { %v6555_v42 = vcombine.low %v3399_v27, %v3402_v39  ;;  %v856_v45 = vrot.slane %v854_v35, 4  ;;  %v865_v46 = vshrl.u32 %v666_v54, 16  ;;  %v862_v49 = vrot.slane %v860_v23, 5 }
  0x68   : > { %7213 = vmatmul.mubr.msk.bf16.gmra.mrb[8].mxu1 %vm399_vm1, %v6257_v38  ;;  %v847_v48 = vor.u32 %v846_v9, %v843_v7  ;;  %v868_v50 = vshll.u32 %v666_v54, 16  ;;  %v874_v51 = vshll.u32 %v667_v36, 16  ;;  %v878_v55 = vshrl.u32 %v667_v36, 16  ;;  %v674_v38 = vld [vmem:[%s8038_s30 + $0x74] sm:$0x1] }
  0x69   : > { %v857_v53 = vor.u32 %v856_v45, %v852_v44  ;;  %v867_v12 = vrot.slane %v865_v46, 4  ;;  %v884_v56 = vshll.u32 %v668_v40, 16  ;;  %v6539_v57 = vrot.slane %v6515_v41, 9  ;;  %v6521_v41 = vld [vmem:[%s8038_s30 + $0xb4] sm:$0xe] }
  0x6a   : > { %v848_v37 = vrot.slane %v847_v48, 4  ;;  %v870_v28 = vrot.slane %v868_v50, 5  ;;  %v876_v14 = vrot.slane %v874_v51, 5  ;;  %v880_v60 = vrot.slane %v878_v55, 4  ;;  %v6523_v48 = vld [vmem:[%s8038_s30 + $0xbc] sm:$0x1] }
  0x6b   : > { %v858_v59 = vrot.slane %v857_v53, 4  ;;  %v886_v61 = vrot.slane %v884_v56, 5  ;;  %v3405_v62 = vrot.slane %v6516_v47, 5  ;;  %v3408_v8 = vrot.slane %v6517_v52, 5 }
  0x6c   : > { %v853_v1 = vsel %vm8085_vm4, %v848_v37, %v852_v44  ;;  %v871_v2 = vor.u32 %v870_v28, %v867_v12  ;;  %v6540_v3 = vrot.slane %v6518_v30, 9  ;;  %v881_v11 = vor.u32 %v880_v60, %v876_v14  ;;  %v6525_v12 = vld [vmem:[%s8038_s30 + $0xc4] sm:$0xf]  ;;  %v6526_v28 = vld [vmem:[%s8038_s30 + $0xc8] sm:$0x1] }
  0x6d   : > { %7361 = vmatmul.mubr.msk.bf16.gmra.mrb[20].mxu0 %vm399_vm1, %v6555_v42  ;;  %v863_v10 = vsel %vm8085_vm4, %v858_v59, %v862_v49  ;;  %v3406_v13 = vsel %vm8160_vm7, %v6539_v57, %v3405_v62  ;;  %v3407_v17 = vrot.slane %v3405_v62, 4  ;;  %v3412_v19 = vrot.slane %v6519_v58, 5  ;;  %v6522_v42 = vld [vmem:[%s8038_s30 + $0xb8] sm:$0xf]  ;;  %v6524_v49 = vld [vmem:[%s8038_s30 + $0xc0] sm:$0xe] }
  0x6e   : > { %v6258_v29 = vcombine.low %v853_v1, %v863_v10  ;;  %v872_v34 = vrot.slane %v871_v2, 4  ;;  %v3415_v20 = vrot.slane %v6520_v63, 5  ;;  %v882_v22 = vrot.slane %v881_v11, 4 }
  0x6f   : > { %v3409_v24 = vsel %vm8160_vm7, %v3407_v17, %v3408_v8  ;;  %v889_v25 = vshrl.u32 %v669_v5, 16  ;;  %v892_v26 = vshll.u32 %v669_v5, 16  ;;  %v3413_v32 = vsel %vm8160_vm7, %v6540_v3, %v3412_v19  ;;  %v676_v17 = vld [vmem:[%s8038_s30 + $0x7c] sm:$0xf] }
  0x70   : > { %7216 = vmatprep.mubr.msk.bf16.mxu1 %vm399_vm1, %v6258_v29  ;;  %v877_v27 = vsel %vm8085_vm4, %v872_v34, %v876_v14  ;;  %v6556_v31 = vcombine.low %v3406_v13, %v3409_v24  ;;  %v3414_v54 = vrot.slane %v3412_v19, 4  ;;  %v887_v7 = vsel %vm8085_vm4, %v882_v22, %v886_v61  ;;  %v675_v14 = vld [vmem:[%s8038_s30 + $0x78] sm:$0xf]  ;;  %v677_v19 = vld [vmem:[%s8038_s30 + $0x80] sm:$0x1] }
  0x71   : > { %v891_v33 = vrot.slane %v889_v25, 4  ;;  %v894_v35 = vrot.slane %v892_v26, 5  ;;  %v898_v36 = vshll.u32 %v670_v15, 16  ;;  %v6259_v39 = vcombine.low %v877_v27, %v887_v7  ;;  %v678_v26 = vld [vmem:[%s8038_s30 + $0x84] sm:$0xf] }
  0x72   : > { %7364 = vmatprep.mubr.msk.bf16.mxu0 %vm399_vm1, %v6556_v31  ;;  %v3416_v9 = vsel %vm8160_vm7, %v3414_v54, %v3415_v20  ;;  %v902_v23 = vshrl.u32 %v670_v15, 16  ;;  %v908_v40 = vshll.u32 %v671_v18, 16  ;;  %v913_v47 = vshrl.u32 %v672_v21, 16  ;;  %v679_v27 = vld [vmem:[%s8038_s30 + $0x88] sm:$0xf] }
  0x73   : > { %v6557_v44 = vcombine.low %v3413_v32, %v3416_v9  ;;  %v895_v45 = vor.u32 %v894_v35, %v891_v33  ;;  %v900_v46 = vrot.slane %v898_v36, 5  ;;  %7217 = vmatmul.mubr.msk.bf16.gmra.mrb[12].mxu1 %vm399_vm1, %v6259_v39  ;;  %v916_v52 = vshll.u32 %v672_v21, 16 }
  0x74   : > { %v904_v50 = vrot.slane %v902_v23, 4  ;;  %v910_v51 = vrot.slane %v908_v40, 5  ;;  %v922_v53 = vshll.u32 %v673_v6, 16  ;;  %v915_v56 = vrot.slane %v913_v47, 4  ;;  %v680_v40 = vld [vmem:[%s8038_s30 + $0x8c] sm:$0x1] }
  0x75   : > { %7365 = vmatmul.mubr.msk.bf16.gmra.mrb[24].mxu0 %vm399_vm1, %v6557_v44  ;;  %v896_v55 = vrot.slane %v895_v45, 4  ;;  %v926_v30 = vshrl.u32 %v673_v6, 16  ;;  %v932_v37 = vshll.u32 %v674_v38, 16  ;;  %v918_v58 = vrot.slane %v916_v52, 5  ;;  %v7783_v38 = vld [vmem:[%s8038_s30 + $0x18] sm:$0xff]  }
  0x76   : > { %v905_v57 = vor.u32 %v904_v50, %v900_v46  ;;  %v924_v59 = vrot.slane %v922_v53, 5  ;;  %v6541_v60 = vrot.slane %v6521_v41, 9  ;;  %v3419_v1 = vrot.slane %v6522_v42, 5  ;;  %v681_v47 = vld [vmem:[%s8038_s30 + $0x90] sm:$0xf] }
  0x77   : > { %v901_v61 = vsel %vm8085_vm4, %v896_v55, %v900_v46  ;;  %v928_v62 = vrot.slane %v926_v30, 4  ;;  %v934_v63 = vrot.slane %v932_v37, 5  ;;  %v919_v8 = vor.u32 %v918_v58, %v915_v56  ;;  %v682_v56 = vld [vmem:[%s8038_s30 + $0x94] sm:$0xf]  ;;  %v684_v58 = vld [vmem:[%s8038_s30 + $0x9c] sm:$0xf] }
  0x78   : > { %v906_v2 = vrot.slane %v905_v57, 4  ;;  %v3422_v3 = vrot.slane %v6523_v48, 5  ;;  %v6542_v5 = vrot.slane %v6524_v49, 9  ;;  %v3420_v10 = vsel %vm8160_vm7, %v6541_v60, %v3419_v1 }
  0x79   : > { %v929_v15 = vor.u32 %v928_v62, %v924_v59  ;;  %v3421_v11 = vrot.slane %v3419_v1, 4  ;;  %v3426_v13 = vrot.slane %v6525_v12, 5  ;;  %v920_v29 = vrot.slane %v919_v8, 4 }
  0x7a   : > { %v911_v18 = vsel %vm8085_vm4, %v906_v2, %v910_v51  ;;  %v3429_v34 = vrot.slane %v6526_v28, 5  ;;  %v937_v20 = vshrl.u32 %v675_v14, 16  ;;  %v940_v33 = vshll.u32 %v675_v14, 16  ;;  %v683_v28 = vld [vmem:[%s8038_s30 + $0x98] sm:$0x1] }
  0x7b   : > { %v6260_v21 = vcombine.low %v901_v61, %v911_v18  ;;  %v930_v22 = vrot.slane %v929_v15, 4  ;;  %v3423_v24 = vsel %vm8160_vm7, %v3421_v11, %v3422_v3  ;;  %v3427_v25 = vsel %vm8160_vm7, %v6542_v5, %v3426_v13  ;;  %v7784_v11 = vld [vmem:[%s8038_s30 + $0x24] sm:$0xff]  }
  0x7c   : > { %v925_v31 = vsel %vm8085_vm4, %v920_v29, %v924_v59  ;;  %v6558_v32 = vcombine.low %v3420_v10, %v3423_v24  ;;  %v3428_v54 = vrot.slane %v3426_v13, 4  ;;  %v939_v6 = vrot.slane %v937_v20, 4  ;;  %v686_v24 = vld [vmem:[%s8038_s30 + $0xa4] sm:$0x1] }
  0x7d   : > { %7220 = vmatprep.mubr.msk.bf16.mxu1 %vm399_vm1, %v6260_v21  ;;  %v935_v7 = vsel %vm8085_vm4, %v930_v22, %v934_v63  ;;  %v946_v35 = vshll.u32 %v676_v17, 16  ;;  %v950_v36 = vshrl.u32 %v676_v17, 16  ;;  %v956_v23 = vshll.u32 %v677_v19, 16  ;;  %v685_v63 = vld [vmem:[%s8038_s30 + $0xa0] sm:$0xf]  ;;  %v7785_v19 = vld [vmem:[%s8038_s30 + $0x30] sm:$0xff]  }
  0x7e   : > { %v6261_v39 = vcombine.low %v925_v31, %v935_v7  ;;  %7368 = vmatprep.mubr.msk.bf16.mxu0 %vm399_vm1, %v6558_v32  ;;  %v3430_v9 = vsel %vm8160_vm7, %v3428_v54, %v3429_v34  ;;  %v961_v41 = vshrl.u32 %v678_v26, 16  ;;  %v942_v44 = vrot.slane %v940_v33, 5  ;;  %v687_v54 = vld [vmem:[%s8038_s30 + $0xa8] sm:$0xf] }
  0x7f   : > { %v6559_v42 = vcombine.low %v3427_v25, %v3430_v9  ;;  %v948_v45 = vrot.slane %v946_v35, 5  ;;  %v952_v46 = vrot.slane %v950_v36, 4  ;;  %v958_v48 = vrot.slane %v956_v23, 5  ;;  %v688_v36 = vld [vmem:[%s8038_s30 + $0xac] sm:$0xf] }
  0x80   : > { %7221 = vmatmul.mubr.msk.bf16.gmra.mrb[16].mxu1 %vm399_vm1, %v6261_v39  ;;  %v963_v49 = vrot.slane %v961_v41, 4  ;;  %v964_v50 = vshll.u32 %v678_v26, 16  ;;  %v970_v51 = vshll.u32 %v679_v27, 16  ;;  %v943_v52 = vor.u32 %v942_v44, %v939_v6  ;;  %v690_v41 = vld [vmem:[%s8038_s30 + $0xb4] sm:$0xf] }
  0x81   : > { %7369 = vmatmul.mubr.msk.bf16.gmra.mrb[28].mxu0 %vm399_vm1, %v6559_v42  ;;  %v953_v53 = vor.u32 %v952_v46, %v948_v45  ;;  %v974_v12 = vshrl.u32 %v679_v27, 16  ;;  %v980_v55 = vshll.u32 %v680_v40, 16  ;;  %v985_v14 = vshrl.u32 %v681_v47, 16  ;;  %v689_v40 = vld [vmem:[%s8038_s30 + $0xb0] sm:$0x1] }
  0x82   : > { %v966_v30 = vrot.slane %v964_v50, 5  ;;  %v972_v37 = vrot.slane %v970_v51, 5  ;;  %7374 = vmatprep.mubr.msk.bf16.mxu0 %vm399_vm1, %v7783_v38  ;;  %v988_v57 = vshll.u32 %v681_v47, 16  ;;  %v944_v59 = vrot.slane %v943_v52, 4  ;;  %v8471_v42 = vld [vmem:[%s9517_s1 + $0xc] sm:$0xf] }
  0x83   : > { %v954_v60 = vrot.slane %v953_v53, 4  ;;  %v976_v61 = vrot.slane %v974_v12, 4  ;;  %v982_v62 = vrot.slane %v980_v55, 5  ;;  %v987_v2 = vrot.slane %v985_v14, 4  ;;  %7735 = vmatprep.subr.msk.bf16.mxu1 %vm448_vm0, %v8471_v42  ;;  %v7786_v55 = vld [vmem:[%s8038_s30 + $0x3c] sm:$0xff]  }
  0x84   : > { %v967_v1 = vor.u32 %v966_v30, %v963_v49  ;;  %v990_v8 = vrot.slane %v988_v57, 5  ;;  %v994_v3 = vshll.u32 %v682_v56, 16  ;;  %v949_v5 = vsel %vm8085_vm4, %v944_v59, %v948_v45  ;;  %v692_v57 = vld [vmem:[%s8038_s30 + $0xbc] sm:$0x1] }
  0x85   : > { %v959_v15 = vsel %vm8085_vm4, %v954_v60, %v958_v48  ;;  %v977_v10 = vor.u32 %v976_v61, %v972_v37  ;;  %v998_v13 = vshrl.u32 %v682_v56, 16  ;;  %v1004_v22 = vshll.u32 %v683_v28, 16 }
  0x86   : > { %v6262_v17 = vcombine.low %v949_v5, %v959_v15  ;;  %v968_v18 = vrot.slane %v967_v1, 4  ;;  %v991_v29 = vor.u32 %v990_v8, %v987_v2  ;;  %v996_v34 = vrot.slane %v994_v3, 5  ;;  %v1439_v5 = vld [vmem:[%s8038_s30 + $0x4] sm:$0xf]  ;;  %v1440_v15 = vld [vmem:[%s8038_s30 + $0x8] sm:$0x1] }
  0x87   : > { %v978_v20 = vrot.slane %v977_v10, 4  ;;  %v1000_v21 = vrot.slane %v998_v13, 4  ;;  %v1009_v25 = vshrl.u32 %v684_v58, 16  ;;  %v1012_v31 = vshll.u32 %v684_v58, 16  ;;  %v7787_v58 = vld [vmem:[%s8038_s30 + $0x48] sm:$0xff]  }
  0x88   : > { %7224 = vmatprep.mubr.msk.bf16.mxu1 %vm399_vm1, %v6262_v17  ;;  %v973_v26 = vsel %vm8085_vm4, %v968_v18, %v972_v37  ;;  %v992_v27 = vrot.slane %v991_v29, 4  ;;  %v1018_v32 = vshll.u32 %v685_v63, 16  ;;  %v1006_v33 = vrot.slane %v1004_v22, 5  ;;  %v1441_v18 = vld [vmem:[%s8038_s30 + $0xc] sm:$0xe] }
  0x89   : > { %v983_v6 = vsel %vm8085_vm4, %v978_v20, %v982_v62  ;;  %7375 = vmatmul.mubr.msk.bf16.vlgmr.msra.gmra.mrb[0].mxu0 %vm399_vm1, %v7784_v11  ;;  %v1001_v7 = vor.u32 %v1000_v21, %v996_v34  ;;  %v1011_v35 = vrot.slane %v1009_v25, 4  ;;  %v1014_v9 = vrot.slane %v1012_v31, 5  ;;  %v1442_v21 = vld [vmem:[%s8038_s30 + $0x10] sm:$0xf]  ;;  %v1443_v22 = vld [vmem:[%s8038_s30 + $0x14] sm:$0x1] }
  0x8a   : > { %v6263_v38 = vcombine.low %v973_v26, %v983_v6  ;;  %7407 = vmatpush3.bf16.msra.mxu0 %v8071_v16  ;;  %v997_v39 = vsel %vm8085_vm4, %v992_v27, %v996_v34  ;;  %v1020_v23 = vrot.slane %v1018_v32, 5  ;;  %7378 = vmatprep.mubr.msk.bf16.mxu0 %vm399_vm1, %v7785_v19  ;;  %v1022_v45 = vshrl.u32 %v685_v63, 16  ;;  %v691_v16 = vld [vmem:[%s8038_s30 + $0xb8] sm:$0xf]  ;;  %v1438_v63 = vld [vmem:[%s8038_s30] sm:$0xe] }
  0x8b   : > { %v1002_v44 = vrot.slane %v1001_v7, 4  ;;  %v1028_v46 = vshll.u32 %v686_v24, 16  ;;  %v1033_v47 = vshrl.u32 %v687_v54, 16  ;;  %v1015_v48 = vor.u32 %v1014_v9, %v1011_v35  ;;  %v1444_v31 = vld [vmem:[%s8038_s30 + $0x18] sm:$0xe] }
  0x8c   : > { %7225 = vmatmul.mubr.msk.bf16.gmra.mrb[20].mxu1 %vm399_vm1, %v6263_v38  ;;  %v1036_v49 = vshll.u32 %v687_v54, 16  ;;  %v1042_v50 = vshll.u32 %v688_v36, 16  ;;  %v1046_v51 = vshrl.u32 %v688_v36, 16  ;;  %v1024_v53 = vrot.slane %v1022_v45, 4  ;;  %v1445_v32 = vld [vmem:[%s8038_s30 + $0x1c] sm:$0xf] }
  0x8d   : > { %v1007_v52 = vsel %vm8085_vm4, %v1002_v44, %v1006_v33  ;;  %v1030_v12 = vrot.slane %v1028_v46, 5  ;;  %v1035_v56 = vrot.slane %v1033_v47, 4  ;;  %v1016_v37 = vrot.slane %v1015_v48, 4  ;;  %v7788_v35 = vld [vmem:[%s8038_s30 + $0x54] sm:$0xff]   ;;  %v1446_v36 = vld [vmem:[%s8038_s30 + $0x20] sm:$0x1] }
  0x8e   : > { %v6264_v30 = vcombine.low %v997_v39, %v1007_v52  ;;  %v1038_v28 = vrot.slane %v1036_v49, 5  ;;  %v1044_v14 = vrot.slane %v1042_v50, 5  ;;  %v1025_v59 = vor.u32 %v1024_v53, %v1020_v23  ;;  %v1447_v47 = vld [vmem:[%s8038_s30 + $0x24] sm:$0xe]  ;;  %v1449_v52 = vld [vmem:[%s8038_s30 + $0x2c] sm:$0x1] }
  0x8f   : > { %v1048_v60 = vrot.slane %v1046_v51, 4  ;;  %v1052_v61 = vshll.u32 %v689_v40, 16  ;;  %v1057_v62 = vshrl.u32 %v690_v41, 16  ;;  %v1021_v1 = vsel %vm8085_vm4, %v1016_v37, %v1020_v23  ;;  %v7789_v40 = vld [vmem:[%s8038_s30 + $0x60] sm:$0xff]  }
  0x90   : > { %7228 = vmatprep.mubr.msk.bf16.mxu1 %vm399_vm1, %v6264_v30  ;;  %v1039_v2 = vor.u32 %v1038_v28, %v1035_v56  ;;  %v1060_v8 = vshll.u32 %v690_v41, 16  ;;  %v1066_v3 = vshll.u32 %v691_v16, 16  ;;  %v1026_v10 = vrot.slane %v1025_v59, 4  ;;  %v1450_v30 = vld [vmem:[%s8038_s30 + $0x30] sm:$0xe] }
  0x91   : > { %7379 = vmatmul.mubr.msk.bf16.gmra.mrb[4].mxu0 %vm399_vm1, %v7786_v55  ;;  %v1049_v11 = vor.u32 %v1048_v60, %v1044_v14  ;;  %v1054_v13 = vrot.slane %v1052_v61, 5  ;;  %v1059_v17 = vrot.slane %v1057_v62, 4  ;;  %v1070_v20 = vshrl.u32 %v691_v16, 16  ;;  %v1448_v16 = vld [vmem:[%s8038_s30 + $0x28] sm:$0xf] }
  0x92   : > { %v1040_v29 = vrot.slane %v1039_v2, 4  ;;  %v1062_v34 = vrot.slane %v1060_v8, 5  ;;  %v1068_v19 = vrot.slane %v1066_v3, 5  ;;  %7382 = vmatprep.mubr.msk.bf16.mxu0 %vm399_vm1, %v7787_v58  ;;  %v1031_v24 = vsel %vm8085_vm4, %v1026_v10, %v1030_v12  ;;  %v1451_v58 = vld [vmem:[%s8038_s30 + $0x34] sm:$0xf]  ;;  %v7790_v10 = vld [vmem:[%s8038_s30 + $0x6c] sm:$0xff]  }
  0x93   : > { %v1050_v25 = vrot.slane %v1049_v11, 4  ;;  %v1076_v26 = vshll.u32 %v692_v57, 16  ;;  %v6284_v27 = vrot.slane %v1438_v63, 9  ;;  %v6265_v54 = vcombine.low %v1021_v1, %v1031_v24  ;;  %v1452_v59 = vld [vmem:[%s8038_s30 + $0x38] sm:$0x1] }
  0x94   : > { %v1045_v6 = vsel %vm8085_vm4, %v1040_v29, %v1044_v14  ;;  %v1063_v7 = vor.u32 %v1062_v34, %v1059_v17  ;;  %v1072_v33 = vrot.slane %v1070_v20, 4  ;;  %v1539_v9 = vrot.slane %v1439_v5, 5  ;;  %v1453_v60 = vld [vmem:[%s8038_s30 + $0x3c] sm:$0xe]  ;;  %v1454_v61 = vld [vmem:[%s8038_s30 + $0x40] sm:$0xf] }
  0x95   : > { %v1055_v38 = vsel %vm8085_vm4, %v1050_v25, %v1054_v13  ;;  %v1078_v39 = vrot.slane %v1076_v26, 5  ;;  %v1542_v23 = vrot.slane %v1440_v15, 5  ;;  %7229 = vmatmul.mubr.msk.bf16.gmra.mrb[24].mxu1 %vm399_vm1, %v6265_v54  ;;  %v6285_v46 = vrot.slane %v1441_v18, 9  ;;  %v1455_v8 = vld [vmem:[%s8038_s30 + $0x44] sm:$0x1]  ;;  %v7791_v34 = vld [vmem:[%s8038_s30 + $0x78] sm:$0xff]  }
  0x96   : > { %v6266_v41 = vcombine.low %v1045_v6, %v1055_v38  ;;  %v1064_v44 = vrot.slane %v1063_v7, 4  ;;  %v1073_v45 = vor.u32 %v1072_v33, %v1068_v19  ;;  %v1540_v48 = vsel %vm8160_vm7, %v6284_v27, %v1539_v9  ;;  %v1456_v3 = vld [vmem:[%s8038_s30 + $0x48] sm:$0xe]  ;;  %v1457_v20 = vld [vmem:[%s8038_s30 + $0x4c] sm:$0xf] }
  0x97   : > { %v1541_v49 = vrot.slane %v1539_v9, 4  ;;  %v1546_v50 = vrot.slane %v1442_v21, 5  ;;  %v1549_v51 = vrot.slane %v1443_v22, 5  ;;  %v6286_v55 = vrot.slane %v1444_v31, 9  ;;  %v1458_v21 = vld [vmem:[%s8038_s30 + $0x50] sm:$0x1] }
  0x98   : > { %7232 = vmatprep.mubr.msk.bf16.mxu1 %vm399_vm1, %v6266_v41  ;;  %v1069_v53 = vsel %vm8085_vm4, %v1064_v44, %v1068_v19  ;;  %v1074_v12 = vrot.slane %v1073_v45, 4  ;;  %v1553_v56 = vrot.slane %v1445_v32, 5  ;;  %v1556_v57 = vrot.slane %v1446_v36, 5  ;;  %v1459_v27 = vld [vmem:[%s8038_s30 + $0x54] sm:$0xe] }
  0x99   : > { %7383 = vmatmul.mubr.msk.bf16.gmra.mrb[8].mxu0 %vm399_vm1, %v7788_v35  ;;  %v1543_v37 = vsel %vm8160_vm7, %v1541_v49, %v1542_v23  ;;  %v8519_v28 = vsel %vm8160_vm7, %v6285_v46, %v1546_v50  ;;  %v1548_v14 = vrot.slane %v1546_v50, 4  ;;  %v6287_v11 = vrot.slane %v1447_v47, 9  ;;  %v1460_v31 = vld [vmem:[%s8038_s30 + $0x58] sm:$0xf]  ;;  %v1461_v7 = vld [vmem:[%s8038_s30 + $0x5c] sm:$0x1] }
  0x9a   : > { %v1079_v62 = vsel %vm8085_vm4, %v1074_v12, %v1078_v39  ;;  %v6301_v63 = vcombine.low %v1540_v48, %v1543_v37  ;;  %7386 = vmatprep.mubr.msk.bf16.mxu0 %vm399_vm1, %v7789_v40  ;;  %v8530_v1 = vsel %vm8160_vm7, %v6286_v55, %v1553_v56  ;;  %v1555_v2 = vrot.slane %v1553_v56, 4  ;;  %v1462_v39 = vld [vmem:[%s8038_s30 + $0x60] sm:$0xe]  ;;  %v1463_v44 = vld [vmem:[%s8038_s30 + $0x64] sm:$0xf] }
  0x9b   : > { %v6267_v5 = vcombine.low %v1069_v53, %v1079_v62  ;;  %v8536_v15 = vsel %vm8160_vm7, %v1548_v14, %v1549_v51  ;;  %v1560_v13 = vrot.slane %v1448_v16, 5  ;;  %v1563_v29 = vrot.slane %v1449_v52, 5  ;;  %v1464_v45 = vld [vmem:[%s8038_s30 + $0x68] sm:$0x1]  ;;  %v1465_v46 = vld [vmem:[%s8038_s30 + $0x6c] sm:$0xe] }
  0x9c   : > { %v6302_v17 = vcombine.low %v8519_v28, %v8536_v15  ;;  %v8543_v18 = vsel %vm8160_vm7, %v1555_v2, %v1556_v57  ;;  %v8548_v19 = vsel %vm448_vm0, %v8471_v42, 0  ;;  %v6288_v26 = vrot.slane %v1450_v30, 9  ;;  %v1466_v47 = vld [vmem:[%s8038_s30 + $0x70] sm:$0xf]  ;;  %v1467_v51 = vld [vmem:[%s8038_s30 + $0x74] sm:$0x1] }
  0x9d   : > { %v6303_v22 = vcombine.low %v8530_v1, %v8543_v18  ;;  %v8556_v24 = vsel %vm8160_vm7, %v6287_v11, %v1560_v13  ;;  %v1562_v25 = vrot.slane %v1560_v13, 4  ;;  %7233 = vmatmul.mubr.msk.bf16.gmra.mrb[28].mxu1 %vm399_vm1, %v6267_v5  ;;  %v1567_v32 = vrot.slane %v1451_v58, 5  ;;  %v1468_v14 = vld [vmem:[%s8038_s30 + $0x78] sm:$0xe]  ;;  %v1469_v57 = vld [vmem:[%s8038_s30 + $0x7c] sm:$0xf] }
  0x9e   : > { %v1570_v42 = vrot.slane %v1452_v59, 5  ;;  %v6289_v54 = vrot.slane %v1453_v60, 9  ;;  %v1574_v6 = vrot.slane %v1454_v61, 5  ;;  %7238 = vmatprep.mubr.msk.bf16.mxu1 %vm399_vm1, %v6301_v63  ;;  %v1577_v35 = vrot.slane %v1455_v8, 5  ;;  %v7792_v58 = vld [vmem:[%s8038_s30 + $0x84] sm:$0xff]  }
  0x9f   : > { %v8565_v33 = vsel %vm8160_vm7, %v1562_v25, %v1563_v29  ;;  %v6290_v36 = vrot.slane %v1456_v3, 9  ;;  %v1581_v38 = vrot.slane %v1457_v20, 5  ;;  %v8572_v23 = vsel %vm8160_vm7, %v6288_v26, %v1567_v32  ;;  %v1470_v63 = vld [vmem:[%s8038_s30 + $0x80] sm:$0x1]  ;;  %v1471_v1 = vld [vmem:[%s8038_s30 + $0x84] sm:$0xe] }
  0xa0   : > { %v6304_v9 = vcombine.low %v8556_v24, %v8565_v33  ;;  %v1569_v40 = vrot.slane %v1567_v32, 4  ;;  %v8576_v41 = vsel %vm8160_vm7, %v6289_v54, %v1574_v6  ;;  %v1576_v16 = vrot.slane %v1574_v6, 4  ;;  %v1472_v15 = vld [vmem:[%s8038_s30 + $0x88] sm:$0xf]  ;;  %v6641_v26 = vld [vmem:[%s8038_s30 + $0x18] sm:$0xf] }
  0xa1   : > { %7387 = vmatmul.mubr.msk.bf16.gmra.mrb[12].mxu0 %vm399_vm1, %v7790_v10  ;;  %v8585_v48 = vsel %vm8160_vm7, %v6290_v36, %v1581_v38  ;;  %v1583_v49 = vrot.slane %v1581_v38, 4  ;;  %v1584_v50 = vrot.slane %v1458_v21, 5  ;;  %v6291_v53 = vrot.slane %v1459_v27, 9  ;;  %v7793_v10 = vld [vmem:[%s8038_s30 + $0x90] sm:$0xff]   ;;  %v6642_v32 = vld [vmem:[%s8038_s30 + $0x1c] sm:$0xf] }
  0xa2   : > { %7390 = vmatprep.mubr.msk.bf16.mxu0 %vm399_vm1, %v7791_v34  ;;  %v8591_v52 = vsel %vm8160_vm7, %v1569_v40, %v1570_v42  ;;  %v1588_v12 = vrot.slane %v1460_v31, 5  ;;  %v1591_v55 = vrot.slane %v1461_v7, 5  ;;  %v8597_v30 = vsel %vm8160_vm7, %v1576_v16, %v1577_v35  ;;  %v1473_v34 = vld [vmem:[%s8038_s30 + $0x8c] sm:$0x1]  ;;  %v7943_v42 = vld [vmem:[%s9517_s1 + $0x10] sm:$0xf] }
  0xa3   : > { %v6305_v56 = vcombine.low %v8572_v23, %v8591_v52  ;;  %v8601_v37 = vsel %vm8160_vm7, %v1583_v49, %v1584_v50  ;;  %v6292_v28 = vrot.slane %v1462_v39, 9  ;;  %v6306_v59 = vcombine.low %v8576_v41, %v8597_v30  ;;  %v6786_v36 = vld [vmem:[%s9517_s1 + $0x20] sm:$0xf] }
  0xa4   : > { %v6307_v60 = vcombine.low %v8585_v48, %v8601_v37  ;;  %v8612_v61 = vsel %vm8160_vm7, %v6291_v53, %v1588_v12  ;;  %v1590_v62 = vrot.slane %v1588_v12, 4  ;;  %v1595_v2 = vrot.slane %v1463_v44, 5  ;;  %v6643_v44 = vld [vmem:[%s8038_s30 + $0x20] sm:$0x1]  ;;  %7741 = vmatprep.subr.msk.bf16.mxu0 %vm448_vm0, %v6786_v36 }
  0xa5   : > { %v1598_v8 = vrot.slane %v1464_v45, 5  ;;  %v6293_v3 = vrot.slane %v1465_v46, 9  ;;  %v1602_v5 = vrot.slane %v1466_v47, 5  ;;  %7239 = vmatmul.mubr.msk.bf16.vlgmr.msra.gmra.mrb[0].mxu1 %vm399_vm1, %v6302_v17  ;;  %v1605_v13 = vrot.slane %v1467_v51, 5  ;;  %v6644_v46 = vld [vmem:[%s8038_s30 + $0x24] sm:$0xf] }
  0xa6   : > { %v8621_v11 = vsel %vm8160_vm7, %v1590_v62, %v1591_v55  ;;  %v6294_v18 = vrot.slane %v1468_v14, 9  ;;  %v1609_v29 = vrot.slane %v1469_v57, 5  ;;  %7242 = vmatprep.mubr.msk.bf16.mxu1 %vm399_vm1, %v6303_v22  ;;  %7271 = vmatpush3.bf16.msra.mxu1 %v8548_v19  ;;  %v8630_v17 = vsel %vm8160_vm7, %v6292_v28, %v1595_v2  ;;  %v6645_v28 = vld [vmem:[%s8038_s30 + $0x28] sm:$0xf]  ;;  %v7794_v14 = vld [vmem:[%s8038_s30 + $0x9c] sm:$0xff]  }
  0xa7   : > { %v6308_v20 = vcombine.low %v8612_v61, %v8621_v11  ;;  %v1597_v21 = vrot.slane %v1595_v2, 4  ;;  %v8634_v25 = vsel %vm8160_vm7, %v6293_v3, %v1602_v5  ;;  %v1604_v27 = vrot.slane %v1602_v5, 4  ;;  %7737 = vmatprep.subr.msk.bf16.mxu1 %vm448_vm0, %v7943_v42  ;;  %v6646_v62 = vld [vmem:[%s8038_s30 + $0x2c] sm:$0x1] }
  0xa8   : > { %v8639_v31 = vsel %vm8160_vm7, %v6294_v18, %v1609_v29  ;;  %v1611_v19 = vrot.slane %v1609_v29, 4  ;;  %v1612_v22 = vrot.slane %v1470_v63, 5  ;;  %v6295_v6 = vrot.slane %v1471_v1, 9  ;;  %v7795_v2 = vld [vmem:[%s8038_s30 + $0xa8] sm:$0xff]   ;;  %v1475_v18 = vld [vmem:[%s8038_s30 + $0x94] sm:$0xf] }
  0xa9   : > { %7391 = vmatmul.mubr.msk.bf16.gmra.mrb[16].mxu0 %vm399_vm1, %v7792_v58  ;;  %v8649_v54 = vsel %vm8160_vm7, %v1597_v21, %v1598_v8  ;;  %v1616_v7 = vrot.slane %v1472_v15, 5  ;;  %v1619_v35 = vrot.slane %v1473_v34, 5  ;;  %v8659_v39 = vsel %vm8160_vm7, %v1604_v27, %v1605_v13  ;;  %v1476_v27 = vld [vmem:[%s8038_s30 + $0x98] sm:$0x1] }
  0xaa   : > { %7394 = vmatprep.mubr.msk.bf16.mxu0 %vm399_vm1, %v7793_v10  ;;  %v6309_v38 = vcombine.low %v8630_v17, %v8649_v54  ;;  %v8663_v40 = vsel %vm8160_vm7, %v1611_v19, %v1612_v22  ;;  %v4264_v45 = vshrl.u32 %v6641_v26, 16  ;;  %v6310_v47 = vcombine.low %v8634_v25, %v8659_v39  ;;  %v1474_v10 = vld [vmem:[%s8038_s30 + $0x90] sm:$0xe]  ;;  %v1477_v19 = vld [vmem:[%s8038_s30 + $0x9c] sm:$0xe] }
  0xab   : > { %v6311_v16 = vcombine.low %v8639_v31, %v8663_v40  ;;  %v8674_v49 = vsel %vm8160_vm7, %v6295_v6, %v1616_v7  ;;  %v1618_v50 = vrot.slane %v1616_v7, 4  ;;  %v4267_v53 = vshll.u32 %v6641_v26, 16  ;;  %v6654_v17 = vld [vmem:[%s8038_s30 + $0x4c] sm:$0xf]  ;;  %v6660_v39 = vld [vmem:[%s8038_s30 + $0x64] sm:$0xf] }
  0xac   : > { %v4266_v51 = vrot.slane %v4264_v45, 4  ;;  %v4273_v12 = vshll.u32 %v6642_v32, 16  ;;  %v4277_v55 = vshrl.u32 %v6642_v32, 16  ;;  %v4283_v58 = vshll.u32 %v6643_v44, 16 }
  0xad   : > { %v8680_v57 = vsel %vm8160_vm7, %v1618_v50, %v1619_v35  ;;  %v4288_v63 = vshrl.u32 %v6644_v46, 16  ;;  %v4291_v1 = vshll.u32 %v6644_v46, 16  ;;  %7243 = vmatmul.mubr.msk.bf16.gmra.mrb[4].mxu1 %vm399_vm1, %v6304_v9  ;;  %v4269_v3 = vrot.slane %v4267_v53, 5  ;;  %v1479_v50 = vld [vmem:[%s8038_s30 + $0xa4] sm:$0x1] }
  0xae   : > { %v6312_v8 = vcombine.low %v8674_v49, %v8680_v57  ;;  %v4275_v5 = vrot.slane %v4273_v12, 5  ;;  %v4279_v15 = vrot.slane %v4277_v55, 4  ;;  %7246 = vmatprep.mubr.msk.bf16.mxu1 %vm399_vm1, %v6305_v56  ;;  %v4285_v13 = vrot.slane %v4283_v58, 5  ;;  %v1478_v56 = vld [vmem:[%s8038_s30 + $0xa0] sm:$0xf]  ;;  %v7796_v58 = vld [vmem:[%s8038_s30 + $0xb4] sm:$0xff]  }
  0xaf   : > { %v4290_v24 = vrot.slane %v4288_v63, 4  ;;  %v4293_v33 = vrot.slane %v4291_v1, 5  ;;  %v4297_v9 = vshll.u32 %v6645_v28, 16  ;;  %v4270_v29 = vor.u32 %v4269_v3, %v4266_v51  ;;  %v7797_v3 = vld [vmem:[%s8038_s30 + $0xc0] sm:$0xff]  }
  0xb0   : > { %v4280_v34 = vor.u32 %v4279_v15, %v4275_v5  ;;  %v4301_v21 = vshrl.u32 %v6645_v28, 16  ;;  %v4307_v26 = vshll.u32 %v6646_v62, 16  ;;  %v8700_v23 = vsel %vm448_vm0, %v6786_v36, 0  ;;  %v6647_v28 = vld [vmem:[%s8038_s30 + $0x30] sm:$0xf] }
  0xb1   : > { %7395 = vmatmul.mubr.msk.bf16.gmra.mrb[20].mxu0 %vm399_vm1, %v7794_v14  ;;  %v4294_v22 = vor.u32 %v4293_v33, %v4290_v24  ;;  %v4299_v32 = vrot.slane %v4297_v9, 5  ;;  %v6296_v52 = vrot.slane %v1474_v10, 9  ;;  %v4271_v42 = vrot.slane %v4270_v29, 4  ;;  %v6648_v14 = vld [vmem:[%s8038_s30 + $0x34] sm:$0xf] }
  0xb2   : > { %7398 = vmatprep.mubr.msk.bf16.mxu0 %vm399_vm1, %v7795_v2  ;;  %v4281_v6 = vrot.slane %v4280_v34, 4  ;;  %v4303_v7 = vrot.slane %v4301_v21, 4  ;;  %v4309_v35 = vrot.slane %v4307_v26, 5  ;;  %v1623_v45 = vrot.slane %v1475_v18, 5  ;;  %v6649_v24 = vld [vmem:[%s8038_s30 + $0x38] sm:$0x1] }
  0xb3   : > { %v4295_v44 = vrot.slane %v4294_v22, 4  ;;  %v1626_v46 = vrot.slane %v1476_v27, 5  ;;  %v6297_v51 = vrot.slane %v1477_v19, 9  ;;  %v4276_v36 = vsel %vm8085_vm4, %v4271_v42, %v4275_v5  ;;  %v6650_v9 = vld [vmem:[%s8038_s30 + $0x3c] sm:$0xf] }
  0xb4   : > { %v4286_v53 = vsel %vm8085_vm4, %v4281_v6, %v4285_v13  ;;  %v4304_v12 = vor.u32 %v4303_v7, %v4299_v32  ;;  %v1630_v55 = vrot.slane %v1478_v56, 5  ;;  %v8718_v1 = vsel %vm8160_vm7, %v6296_v52, %v1623_v45  ;;  %v6652_v34 = vld [vmem:[%s8038_s30 + $0x44] sm:$0x1]  ;;  %v1480_v22 = vld [vmem:[%s8038_s30 + $0xa8] sm:$0xe] }
  0xb5   : > { %v8712_v62 = vcombine.low %v4276_v36, %v4286_v53  ;;  %v4300_v63 = vsel %vm8085_vm4, %v4295_v44, %v4299_v32  ;;  %v1625_v2 = vrot.slane %v1623_v45, 4  ;;  %7247 = vmatmul.mubr.msk.bf16.gmra.mrb[8].mxu1 %vm399_vm1, %v6306_v59  ;;  %v1633_v13 = vrot.slane %v1479_v50, 5  ;;  %v1481_v32 = vld [vmem:[%s8038_s30 + $0xac] sm:$0xf]  ;;  %v1482_v7 = vld [vmem:[%s8038_s30 + $0xb0] sm:$0x1] }
  0xb6   : > { %v4305_v5 = vrot.slane %v4304_v12, 4  ;;  %v8727_v15 = vsel %vm8160_vm7, %v6297_v51, %v1630_v55  ;;  %v1632_v10 = vrot.slane %v1630_v55, 4  ;;  %7250 = vmatprep.mubr.msk.bf16.mxu1 %vm399_vm1, %v6307_v60  ;;  %v4312_v30 = vshrl.u32 %v6647_v28, 16  ;;  %v6651_v60 = vld [vmem:[%s8038_s30 + $0x40] sm:$0xf]  ;;  %v7798_v51 = vld [vmem:[%s8038_s30 + $0xcc] sm:$0xff]  }
  0xb7   : > { %v8736_v41 = vsel %vm8160_vm7, %v1625_v2, %v1626_v46  ;;  %v4315_v59 = vshll.u32 %v6647_v28, 16  ;;  %v4321_v33 = vshll.u32 %v6648_v14, 16  ;;  %v4325_v37 = vshrl.u32 %v6648_v14, 16  ;;  %v1483_v50 = vld [vmem:[%s8038_s30 + $0xb4] sm:$0xe] }
  0xb8   : > { %v4310_v18 = vsel %vm8085_vm4, %v4305_v5, %v4309_v35  ;;  %v6313_v29 = vcombine.low %v8718_v1, %v8736_v41  ;;  %v8745_v48 = vsel %vm8160_vm7, %v1632_v10, %v1633_v13  ;;  %v4314_v27 = vrot.slane %v4312_v30, 4  ;;  %v1484_v28 = vld [vmem:[%s8038_s30 + $0xb8] sm:$0xf]  ;;  %v6653_v5 = vld [vmem:[%s8038_s30 + $0x48] sm:$0xf] }
  0xb9   : > { %7399 = vmatmul.mubr.msk.bf16.gmra.mrb[24].mxu0 %vm399_vm1, %v7796_v58  ;;  %v8750_v21 = vcombine.low %v4300_v63, %v4310_v18  ;;  %v6314_v26 = vcombine.low %v8727_v15, %v8745_v48  ;;  %v4317_v19 = vrot.slane %v4315_v59, 5  ;;  %v4323_v52 = vrot.slane %v4321_v33, 5 }
  0xba   : > { %7402 = vmatprep.mubr.msk.bf16.mxu0 %vm399_vm1, %v7797_v3  ;;  %v4327_v56 = vrot.slane %v4325_v37, 4  ;;  %v4331_v42 = vshll.u32 %v6649_v24, 16  ;;  %v4336_v6 = vshrl.u32 %v6650_v9, 16  ;;  %v4339_v44 = vshll.u32 %v6650_v9, 16  ;;  %v1485_v3 = vld [vmem:[%s8038_s30 + $0xbc] sm:$0x1] }
  0xbb   : > { %v4318_v35 = vor.u32 %v4317_v19, %v4314_v27  ;;  %v4345_v45 = vshll.u32 %v6651_v60, 16  ;;  %v4349_v46 = vshrl.u32 %v6651_v60, 16  ;;  %v4355_v55 = vshll.u32 %v6652_v34, 16  ;;  %v6655_v27 = vld [vmem:[%s8038_s30 + $0x50] sm:$0x1] }
  0xbc   : > { %v4328_v36 = vor.u32 %v4327_v56, %v4323_v52  ;;  %v4333_v53 = vrot.slane %v4331_v42, 5  ;;  %v4338_v12 = vrot.slane %v4336_v6, 4  ;;  %v4341_v58 = vrot.slane %v4339_v44, 5  ;;  %v6656_v56 = vld [vmem:[%s8038_s30 + $0x54] sm:$0xf] }
  0xbd   : > { %v4319_v14 = vrot.slane %v4318_v35, 4  ;;  %v4347_v63 = vrot.slane %v4345_v45, 5  ;;  %v4351_v2 = vrot.slane %v4349_v46, 4  ;;  %7251 = vmatmul.mubr.msk.bf16.gmra.mrb[12].mxu1 %vm399_vm1, %v6308_v20  ;;  %v4357_v13 = vrot.slane %v4355_v55, 5  ;;  %v6657_v35 = vld [vmem:[%s8038_s30 + $0x58] sm:$0xf] }
  0xbe   : > { %v4329_v10 = vrot.slane %v4328_v36, 4  ;;  %v6298_v24 = vrot.slane %v1480_v22, 9  ;;  %v1637_v30 = vrot.slane %v1481_v32, 5  ;;  %7254 = vmatprep.mubr.msk.bf16.mxu1 %vm399_vm1, %v6309_v38  ;;  %v4342_v33 = vor.u32 %v4341_v58, %v4338_v12  ;;  %v6659_v36 = vld [vmem:[%s8038_s30 + $0x60] sm:$0xf] }
  0xbf   : > { %v4324_v59 = vsel %vm8085_vm4, %v4319_v14, %v4323_v52  ;;  %v4352_v9 = vor.u32 %v4351_v2, %v4347_v63  ;;  %v1640_v18 = vrot.slane %v1482_v7, 5  ;;  %v6299_v37 = vrot.slane %v1483_v50, 9 }
  0xc0   : > { %v4334_v61 = vsel %vm8085_vm4, %v4329_v10, %v4333_v53  ;;  %v8777_v11 = vsel %vm8160_vm7, %v6298_v24, %v1637_v30  ;;  %v1639_v20 = vrot.slane %v1637_v30, 4  ;;  %v4343_v38 = vrot.slane %v4342_v33, 4 }
  0xc1   : > { %7403 = vmatmul.mubr.msk.bf16.gmra.mrb[28].mxu0 %vm399_vm1, %v7798_v51  ;;  %v6692_v54 = vcombine.low %v4324_v59, %v4334_v61  ;;  %v4353_v60 = vrot.slane %v4352_v9, 4  ;;  %v1644_v34 = vrot.slane %v1484_v28, 5  ;;  %v1647_v22 = vrot.slane %v1485_v3, 5  ;;  %v6658_v51 = vld [vmem:[%s8038_s30 + $0x5c] sm:$0x1] }
  0xc2   : > { %7408 = vmatprep.mubr.msk.bf16.mxu0 %vm399_vm1, %v8712_v62  ;;  %v8786_v19 = vsel %vm8160_vm7, %v1639_v20, %v1640_v18  ;;  %v4360_v32 = vshrl.u32 %v6653_v5, 16  ;;  %v4363_v52 = vshll.u32 %v6653_v5, 16  ;;  %v4348_v42 = vsel %vm8085_vm4, %v4343_v38, %v4347_v63  ;;  %v6661_v18 = vld [vmem:[%s8038_s30 + $0x68] sm:$0x1] }
  0xc3   : > { %v4358_v6 = vsel %vm8085_vm4, %v4353_v60, %v4357_v13  ;;  %v6315_v7 = vcombine.low %v8777_v11, %v8786_v19  ;;  %v8797_v62 = vsel %vm8160_vm7, %v6299_v37, %v1644_v34  ;;  %v1646_v45 = vrot.slane %v1644_v34, 4  ;;  %v6662_v37 = vld [vmem:[%s8038_s30 + $0x6c] sm:$0xf]  ;;  %v6663_v34 = vld [vmem:[%s8038_s30 + $0x70] sm:$0xf] }
  0xc4   : > { %v8800_v44 = vcombine.low %v4348_v42, %v4358_v6  ;;  %v4362_v46 = vrot.slane %v4360_v32, 4  ;;  %v4365_v50 = vrot.slane %v4363_v52, 5  ;;  %v4369_v53 = vshll.u32 %v6654_v17, 16 }
  0xc5   : > { %v4373_v12 = vshrl.u32 %v6654_v17, 16  ;;  %v4379_v55 = vshll.u32 %v6655_v27, 16  ;;  %v4384_v28 = vshrl.u32 %v6656_v56, 16  ;;  %7255 = vmatmul.mubr.msk.bf16.gmra.mrb[16].mxu1 %vm399_vm1, %v6310_v47  ;;  %v8810_v14 = vsel %vm8160_vm7, %v1646_v45, %v1647_v22 }
  0xc6   : > { %v4366_v58 = vor.u32 %v4365_v50, %v4362_v46  ;;  %v4387_v63 = vshll.u32 %v6656_v56, 16  ;;  %v4393_v2 = vshll.u32 %v6657_v35, 16  ;;  %7258 = vmatprep.mubr.msk.bf16.mxu1 %vm399_vm1, %v6311_v16  ;;  %v6316_v3 = vcombine.low %v8797_v62, %v8810_v14 }
  0xc7   : > { %v4371_v5 = vrot.slane %v4369_v53, 5  ;;  %v4375_v10 = vrot.slane %v4373_v12, 4  ;;  %v4381_v25 = vrot.slane %v4379_v55, 5  ;;  %v4386_v13 = vrot.slane %v4384_v28, 4 }
  0xc8   : > { %v4367_v47 = vrot.slane %v4366_v58, 4  ;;  %v4389_v24 = vrot.slane %v4387_v63, 5  ;;  %v4395_v30 = vrot.slane %v4393_v2, 5  ;;  %v4397_v31 = vshrl.u32 %v6657_v35, 16 }
  0xc9   : > { %7409 = vmatmul.mubr.msk.bf16.vlgmr.msra.gmra.mrb[0].mxu0 %vm399_vm1, %v8750_v21  ;;  %v4376_v59 = vor.u32 %v4375_v10, %v4371_v5  ;;  %v4403_v40 = vshll.u32 %v6658_v51, 16  ;;  %v4408_v16 = vshrl.u32 %v6659_v36, 16  ;;  %v4411_v61 = vshll.u32 %v6659_v36, 16  ;;  %v6665_v51 = vld [vmem:[%s8038_s30 + $0x78] sm:$0xf] }
  0xca   : > { %7441 = vmatpush3.bf16.msra.mxu0 %v8700_v23  ;;  %7412 = vmatprep.mubr.msk.bf16.mxu0 %vm399_vm1, %v6692_v54  ;;  %v4372_v33 = vsel %vm8085_vm4, %v4367_v47, %v4371_v5  ;;  %v4390_v9 = vor.u32 %v4389_v24, %v4386_v13  ;;  %v4417_v20 = vshll.u32 %v6660_v39, 16  ;;  %v4399_v21 = vrot.slane %v4397_v31, 4  ;;  %v6664_v54 = vld [vmem:[%s8038_s30 + $0x74] sm:$0x1]  ;;  %v6668_v47 = vld [vmem:[%s8038_s30 + $0x84] sm:$0xf] }
  0xcb   : > { %v4377_v17 = vrot.slane %v4376_v59, 4  ;;  %v4405_v38 = vrot.slane %v4403_v40, 5  ;;  %v4410_v60 = vrot.slane %v4408_v16, 4  ;;  %v4413_v22 = vrot.slane %v4411_v61, 5  ;;  %v6669_v59 = vld [vmem:[%s8038_s30 + $0x88] sm:$0xf] }
  0xcc   : > { %v4391_v27 = vrot.slane %v4390_v9, 4  ;;  %v4419_v23 = vrot.slane %v4417_v20, 5  ;;  %v4421_v32 = vshrl.u32 %v6660_v39, 16  ;;  %v4400_v56 = vor.u32 %v4399_v21, %v4395_v30  ;;  %v6667_v39 = vld [vmem:[%s8038_s30 + $0x80] sm:$0x1] }
  0xcd   : > { %v4382_v52 = vsel %vm8085_vm4, %v4377_v17, %v4381_v25  ;;  %v4427_v42 = vshll.u32 %v6661_v18, 16  ;;  %v4432_v6 = vshrl.u32 %v6662_v37, 16  ;;  %7259 = vmatmul.mubr.msk.bf16.gmra.mrb[20].mxu1 %vm399_vm1, %v6312_v8  ;;  %v4414_v46 = vor.u32 %v4413_v22, %v4410_v60 }
  0xce   : > { %v6694_v35 = vcombine.low %v4372_v33, %v4382_v52  ;;  %v4396_v45 = vsel %vm8085_vm4, %v4391_v27, %v4395_v30  ;;  %v4423_v50 = vrot.slane %v4421_v32, 4  ;;  %7262 = vmatprep.mubr.msk.bf16.mxu1 %vm399_vm1, %v6313_v29  ;;  %v4401_v36 = vrot.slane %v4400_v56, 4  ;;  %v6666_v29 = vld [vmem:[%s8038_s30 + $0x7c] sm:$0xf]  ;;  %v6672_v52 = vld [vmem:[%s8038_s30 + $0x94] sm:$0xf] }
  0xcf   : > { %v4429_v53 = vrot.slane %v4427_v42, 5  ;;  %v4434_v12 = vrot.slane %v4432_v6, 4  ;;  %v4435_v55 = vshll.u32 %v6662_v37, 16  ;;  %v4415_v49 = vrot.slane %v4414_v46, 4  ;;  %v6673_v42 = vld [vmem:[%s8038_s30 + $0x98] sm:$0x1] }
  0xd0   : > { %v4424_v57 = vor.u32 %v4423_v50, %v4419_v23  ;;  %v4441_v8 = vshll.u32 %v6663_v34, 16  ;;  %v4445_v28 = vshrl.u32 %v6663_v34, 16  ;;  %v4406_v58 = vsel %vm8085_vm4, %v4401_v36, %v4405_v38  ;;  %v6670_v38 = vld [vmem:[%s8038_s30 + $0x8c] sm:$0x1]  ;;  %v6674_v50 = vld [vmem:[%s8038_s30 + $0x9c] sm:$0xf] }
  0xd1   : > { %7413 = vmatmul.mubr.msk.bf16.gmra.mrb[4].mxu0 %vm399_vm1, %v8800_v44  ;;  %v4437_v1 = vrot.slane %v4435_v55, 5  ;;  %v4451_v41 = vshll.u32 %v6664_v54, 16  ;;  %v4456_v63 = vshrl.u32 %v6665_v51, 16  ;;  %v6695_v2 = vcombine.low %v4396_v45, %v4406_v58  ;;  %v6671_v54 = vld [vmem:[%s8038_s30 + $0x90] sm:$0xf] }
  0xd2   : > { %7416 = vmatprep.mubr.msk.bf16.mxu0 %vm399_vm1, %v6694_v35  ;;  %v4420_v5 = vsel %vm8085_vm4, %v4415_v49, %v4419_v23  ;;  %v4425_v10 = vrot.slane %v4424_v57, 4  ;;  %v4443_v25 = vrot.slane %v4441_v8, 5  ;;  %v4447_v44 = vrot.slane %v4445_v28, 4 }
  0xd3   : > { %v4438_v13 = vor.u32 %v4437_v1, %v4434_v12  ;;  %v4453_v24 = vrot.slane %v4451_v41, 5  ;;  %v4458_v30 = vrot.slane %v4456_v63, 4  ;;  %v4459_v40 = vshll.u32 %v6665_v51, 16  ;;  %v7799_v51 = vld [vmem:[%s8038_s30 + $0xc] sm:$0xff]   ;;  %v6675_v63 = vld [vmem:[%s8038_s30 + $0xa0] sm:$0xf] }
  0xd4   : > { %v4430_v31 = vsel %vm8085_vm4, %v4425_v10, %v4429_v53  ;;  %v4465_v16 = vshll.u32 %v6666_v29, 16  ;;  %v4469_v33 = vshrl.u32 %v6666_v29, 16  ;;  %v4448_v61 = vor.u32 %v4447_v44, %v4443_v25 }
  0xd5   : > { %v6696_v9 = vcombine.low %v4420_v5, %v4430_v31  ;;  %v4439_v18 = vrot.slane %v4438_v13, 4  ;;  %v4475_v20 = vshll.u32 %v6667_v39, 16  ;;  %7263 = vmatmul.mubr.msk.bf16.gmra.mrb[24].mxu1 %vm399_vm1, %v6314_v26  ;;  %v4461_v37 = vrot.slane %v4459_v40, 5  ;;  %v6676_v13 = vld [vmem:[%s8038_s30 + $0xa4] sm:$0x1]  ;;  %v7800_v31 = vld [vmem:[%s8038_s30 + $0x18] sm:$0xff]  }
  0xd6   : > { %v4467_v17 = vrot.slane %v4465_v16, 5  ;;  %v4471_v21 = vrot.slane %v4469_v33, 4  ;;  %v4480_v60 = vshrl.u32 %v6668_v47, 16  ;;  %7266 = vmatprep.mubr.msk.bf16.mxu1 %vm399_vm1, %v6315_v7  ;;  %v4449_v27 = vrot.slane %v4448_v61, 4 }
  0xd7   : > { %v4444_v34 = vsel %vm8085_vm4, %v4439_v18, %v4443_v25  ;;  %v4477_v15 = vrot.slane %v4475_v20, 5  ;;  %v4483_v48 = vshll.u32 %v6668_v47, 16  ;;  %v4462_v22 = vor.u32 %v4461_v37, %v4458_v30  ;;  %v6678_v18 = vld [vmem:[%s8038_s30 + $0xac] sm:$0xf] }
  0xd8   : > { %v4472_v26 = vor.u32 %v4471_v21, %v4467_v17  ;;  %v4482_v23 = vrot.slane %v4480_v60, 4  ;;  %v4489_v32 = vshll.u32 %v6669_v59, 16  ;;  %v4454_v11 = vsel %vm8085_vm4, %v4449_v27, %v4453_v24  ;;  %v6679_v21 = vld [vmem:[%s8038_s30 + $0xb0] sm:$0x1] }
  0xd9   : > { %7417 = vmatmul.mubr.msk.bf16.gmra.mrb[8].mxu0 %vm399_vm1, %v6695_v2  ;;  %v4485_v19 = vrot.slane %v4483_v48, 5  ;;  %v4493_v7 = vshrl.u32 %v6669_v59, 16  ;;  %v4499_v56 = vshll.u32 %v6670_v38, 16  ;;  %v6697_v6 = vcombine.low %v4444_v34, %v4454_v11  ;;  %v6677_v59 = vld [vmem:[%s8038_s30 + $0xa8] sm:$0xf] }
  0xda   : > { %7420 = vmatprep.mubr.msk.bf16.mxu0 %vm399_vm1, %v6696_v9  ;;  %v4463_v35 = vrot.slane %v4462_v22, 4  ;;  %v4473_v45 = vrot.slane %v4472_v26, 4  ;;  %v4491_v46 = vrot.slane %v4489_v32, 5  ;;  %v4504_v55 = vshrl.u32 %v6671_v54, 16  ;;  %v7801_v38 = vld [vmem:[%s8038_s30 + $0x24] sm:$0xff]  }
  0xdb   : > { %v4486_v36 = vor.u32 %v4485_v19, %v4482_v23  ;;  %v4495_v53 = vrot.slane %v4493_v7, 4  ;;  %v4501_v12 = vrot.slane %v4499_v56, 5  ;;  %v4507_v8 = vshll.u32 %v6671_v54, 16  ;;  %v6680_v48 = vld [vmem:[%s8038_s30 + $0xb4] sm:$0xf] }
  0xdc   : > { %v4468_v49 = vsel %vm8085_vm4, %v4463_v35, %v4467_v17  ;;  %v4478_v57 = vsel %vm8085_vm4, %v4473_v45, %v4477_v15  ;;  %v4513_v28 = vshll.u32 %v6672_v52, 16  ;;  %v4506_v29 = vrot.slane %v4504_v55, 4  ;;  %v6681_v35 = vld [vmem:[%s8038_s30 + $0xb8] sm:$0xf]  ;;  %v6682_v55 = vld [vmem:[%s8038_s30 + $0xbc] sm:$0x1] }
  0xdd   : > { %v6698_v58 = vcombine.low %v4468_v49, %v4478_v57  ;;  %v4487_v1 = vrot.slane %v4486_v36, 4  ;;  %v4496_v41 = vor.u32 %v4495_v53, %v4491_v46  ;;  %7267 = vmatmul.mubr.msk.bf16.gmra.mrb[28].mxu1 %vm399_vm1, %v6316_v3  ;;  %v4509_v2 = vrot.slane %v4507_v8, 5  ;;  %v7802_v36 = vld [vmem:[%s8038_s30 + $0x30] sm:$0xff]   ;;  %v7803_v8 = vld [vmem:[%s8038_s30 + $0x3c] sm:$0xff]  }
  0xde   : > { %v4515_v5 = vrot.slane %v4513_v28, 5  ;;  %v4517_v10 = vshrl.u32 %v6672_v52, 16  ;;  %v4523_v25 = vshll.u32 %v6673_v42, 16  ;;  %7272 = vmatprep.mubr.msk.bf16.mxu1 %vm399_vm1, %v7799_v51  ;;  %v4528_v44 = vshrl.u32 %v6674_v50, 16 }
  0xdf   : > { %v4492_v39 = vsel %vm8085_vm4, %v4487_v1, %v4491_v46  ;;  %v4497_v47 = vrot.slane %v4496_v41, 4  ;;  %v4531_v24 = vshll.u32 %v6674_v50, 16  ;;  %v4510_v30 = vor.u32 %v4509_v2, %v4506_v29  ;;  %v6683_v41 = vld [vmem:[%s8038_s30 + $0xc0] sm:$0xf] }
  0xe0   : > { %v4519_v62 = vrot.slane %v4517_v10, 4  ;;  %v4525_v14 = vrot.slane %v4523_v25, 5  ;;  %v4537_v3 = vshll.u32 %v6675_v63, 16  ;;  %v4530_v16 = vrot.slane %v4528_v44, 4  ;;  %v6684_v10 = vld [vmem:[%s8038_s30 + $0xc4] sm:$0xf] }
  0xe1   : > { %7421 = vmatmul.mubr.msk.bf16.gmra.mrb[12].mxu0 %vm399_vm1, %v6697_v6  ;;  %v4502_v40 = vsel %vm8085_vm4, %v4497_v47, %v4501_v12  ;;  %v4533_v33 = vrot.slane %v4531_v24, 5  ;;  %v4541_v9 = vshrl.u32 %v6675_v63, 16  ;;  %v4511_v20 = vrot.slane %v4510_v30, 4  ;;  %v6685_v44 = vld [vmem:[%s8038_s30 + $0xc8] sm:$0x1] }
  0xe2   : > { %7424 = vmatprep.mubr.msk.bf16.mxu0 %vm399_vm1, %v6698_v58  ;;  %v6699_v61 = vcombine.low %v4492_v39, %v4502_v40  ;;  %v4520_v37 = vor.u32 %v4519_v62, %v4515_v5  ;;  %v4539_v17 = vrot.slane %v4537_v3, 5  ;;  %v4547_v27 = vshll.u32 %v6676_v13, 16 }
  0xe3   : > { %v4534_v60 = vor.u32 %v4533_v33, %v4530_v16  ;;  %v4543_v34 = vrot.slane %v4541_v9, 4  ;;  %v4552_v15 = vshrl.u32 %v6677_v59, 16  ;;  %v4516_v22 = vsel %vm8085_vm4, %v4511_v20, %v4515_v5  ;;  %v6686_v16 = vld [vmem:[%s8038_s30 + $0xcc] sm:$0xf]  ;;  %v6687_v20 = vld [vmem:[%s8038_s30 + $0xd0] sm:$0xf] }
  0xe4   : > { %v4521_v26 = vrot.slane %v4520_v37, 4  ;;  %v4555_v23 = vshll.u32 %v6677_v59, 16  ;;  %v4561_v32 = vshll.u32 %v6678_v18, 16  ;;  %v4549_v11 = vrot.slane %v4547_v27, 5 }
  0xe5   : > { %v4535_v54 = vrot.slane %v4534_v60, 4  ;;  %v4544_v52 = vor.u32 %v4543_v34, %v4539_v17  ;;  %v4554_v19 = vrot.slane %v4552_v15, 4  ;;  %7273 = vmatmul.mubr.msk.bf16.vlgmr.msra.gmra.mrb[0].mxu1 %vm399_vm1, %v7800_v31  ;;  %v4565_v6 = vshrl.u32 %v6678_v18, 16  ;;  %v6688_v60 = vld [vmem:[%s8038_s30 + $0xd4] sm:$0x1]  ;;  %v7804_v34 = vld [vmem:[%s8038_s30 + $0x48] sm:$0xff]  }
  0xe6   : > { %v4526_v7 = vsel %vm8085_vm4, %v4521_v26, %v4525_v14  ;;  %v4557_v56 = vrot.slane %v4555_v23, 5  ;;  %v4563_v42 = vrot.slane %v4561_v32, 5  ;;  %7276 = vmatprep.mubr.msk.bf16.mxu1 %vm399_vm1, %v7801_v38  ;;  %7475 = vmatpush3.bf16.msra.mxu1 %v8026_v4  ;;  %v4571_v51 = vshll.u32 %v6679_v21, 16  ;;  %v6722_v26 = vld [vmem:[%s8038_s30 + $0x18] sm:$0xe] }
  0xe7   : > { %v6700_v45 = vcombine.low %v4516_v22, %v4526_v7  ;;  %v4540_v46 = vsel %vm8085_vm4, %v4535_v54, %v4539_v17  ;;  %v4545_v50 = vrot.slane %v4544_v52, 4  ;;  %v4567_v12 = vrot.slane %v4565_v6, 4  ;;  %v6723_v23 = vld [vmem:[%s8038_s30 + $0x1c] sm:$0xf]  ;;  %v7805_v32 = vld [vmem:[%s8038_s30 + $0x54] sm:$0xff]  }
  0xe8   : > { %v4558_v53 = vor.u32 %v4557_v56, %v4554_v19  ;;  %v4576_v49 = vshrl.u32 %v6680_v48, 16  ;;  %v4579_v57 = vshll.u32 %v6680_v48, 16  ;;  %v4573_v28 = vrot.slane %v4571_v51, 5  ;;  %v6724_v7 = vld [vmem:[%s8038_s30 + $0x20] sm:$0x1] }
  0xe9   : > { %7425 = vmatmul.mubr.msk.bf16.gmra.mrb[16].mxu0 %vm399_vm1, %v6699_v61  ;;  %v4550_v4 = vsel %vm8085_vm4, %v4545_v50, %v4549_v11  ;;  %v4585_v58 = vshll.u32 %v6681_v35, 16  ;;  %v4589_v1 = vshrl.u32 %v6681_v35, 16  ;;  %v4568_v2 = vor.u32 %v4567_v12, %v4563_v42  ;;  %v6726_v56 = vld [vmem:[%s8038_s30 + $0x28] sm:$0xf] }
  0xea   : > { %7428 = vmatprep.mubr.msk.bf16.mxu0 %vm399_vm1, %v6700_v45  ;;  %v6701_v29 = vcombine.low %v4540_v46, %v4550_v4  ;;  %v4559_v63 = vrot.slane %v4558_v53, 4  ;;  %v4578_v5 = vrot.slane %v4576_v49, 4  ;;  %v4581_v25 = vrot.slane %v4579_v57, 5  ;;  %v6725_v45 = vld [vmem:[%s8038_s30 + $0x24] sm:$0xe] }
  0xeb   : > { %v4587_v39 = vrot.slane %v4585_v58, 5  ;;  %v4591_v47 = vrot.slane %v4589_v1, 4  ;;  %v4595_v13 = vshll.u32 %v6682_v55, 16  ;;  %v4569_v30 = vrot.slane %v4568_v2, 4  ;;  %v6727_v57 = vld [vmem:[%s8038_s30 + $0x2c] sm:$0x1] }
  0xec   : > { %v4564_v24 = vsel %vm8085_vm4, %v4559_v63, %v4563_v42  ;;  %v4600_v62 = vshrl.u32 %v6683_v41, 16  ;;  %v4603_v14 = vshll.u32 %v6683_v41, 16  ;;  %v4582_v3 = vor.u32 %v4581_v25, %v4578_v5  ;;  %v6728_v1 = vld [vmem:[%s8038_s30 + $0x30] sm:$0xe]  ;;  %v6729_v5 = vld [vmem:[%s8038_s30 + $0x34] sm:$0xf] }
  0xed   : > { %v4592_v59 = vor.u32 %v4591_v47, %v4587_v39  ;;  %v4597_v31 = vrot.slane %v4595_v13, 5  ;;  %v4609_v40 = vshll.u32 %v6684_v10, 16  ;;  %7277 = vmatmul.mubr.msk.bf16.gmra.mrb[4].mxu1 %vm399_vm1, %v7802_v36  ;;  %v4574_v33 = vsel %vm8085_vm4, %v4569_v30, %v4573_v28  ;;  %v6730_v13 = vld [vmem:[%s8038_s30 + $0x38] sm:$0x1] }
  0xee   : > { %v4602_v9 = vrot.slane %v4600_v62, 4  ;;  %v4605_v18 = vrot.slane %v4603_v14, 5  ;;  %v4613_v61 = vshrl.u32 %v6684_v10, 16  ;;  %7280 = vmatprep.mubr.msk.bf16.mxu1 %vm399_vm1, %v7803_v8  ;;  %v6702_v37 = vcombine.low %v4564_v24, %v4574_v33  ;;  %v6731_v62 = vld [vmem:[%s8038_s30 + $0x3c] sm:$0xe]  ;;  %v7806_v14 = vld [vmem:[%s8038_s30 + $0x60] sm:$0xff]  }
  0xef   : > { %v4583_v17 = vrot.slane %v4582_v3, 4  ;;  %v4593_v21 = vrot.slane %v4592_v59, 4  ;;  %v4611_v38 = vrot.slane %v4609_v40, 5  ;;  %v4619_v48 = vshll.u32 %v6685_v44, 16  ;;  %v7807_v33 = vld [vmem:[%s8038_s30 + $0x6c] sm:$0xff]  }
  0xf0   : > { %v4606_v27 = vor.u32 %v4605_v18, %v4602_v9  ;;  %v4615_v15 = vrot.slane %v4613_v61, 4  ;;  %v4624_v22 = vshrl.u32 %v6686_v16, 16  ;;  %v4627_v11 = vshll.u32 %v6686_v16, 16  ;;  %v6732_v16 = vld [vmem:[%s8038_s30 + $0x40] sm:$0xf] }
  0xf1   : > { %7429 = vmatmul.mubr.msk.bf16.gmra.mrb[20].mxu0 %vm399_vm1, %v6701_v29  ;;  %v4588_v54 = vsel %vm8085_vm4, %v4583_v17, %v4587_v39  ;;  %v4598_v52 = vsel %vm8085_vm4, %v4593_v21, %v4597_v31  ;;  %v4633_v19 = vshll.u32 %v6687_v20, 16  ;;  %v4621_v35 = vrot.slane %v4619_v48, 5 }
  0xf2   : > { %7432 = vmatprep.mubr.msk.bf16.mxu0 %vm399_vm1, %v6702_v37  ;;  %v4607_v42 = vrot.slane %v4606_v27, 4  ;;  %v4616_v6 = vor.u32 %v4615_v15, %v4611_v38  ;;  %v4626_v46 = vrot.slane %v4624_v22, 4  ;;  %v4629_v50 = vrot.slane %v4627_v11, 5  ;;  %v6735_v37 = vld [vmem:[%s8038_s30 + $0x4c] sm:$0xf] }
  0xf3   : > { %v4635_v51 = vrot.slane %v4633_v19, 5  ;;  %v4637_v36 = vshrl.u32 %v6687_v20, 16  ;;  %v6703_v53 = vcombine.low %v4588_v54, %v4598_v52  ;;  %v4643_v49 = vshll.u32 %v6688_v60, 16  ;;  %v6734_v20 = vld [vmem:[%s8038_s30 + $0x48] sm:$0xe] }
  0xf4   : > { %v4612_v12 = vsel %vm8085_vm4, %v4607_v42, %v4611_v38  ;;  %v4617_v55 = vrot.slane %v4616_v6, 4  ;;  %v4630_v8 = vor.u32 %v4629_v50, %v4626_v46  ;;  %v6770_v28 = vrot.slane %v6722_v26, 9  ;;  %v6733_v60 = vld [vmem:[%s8038_s30 + $0x44] sm:$0x1]  ;;  %v6737_v27 = vld [vmem:[%s8038_s30 + $0x54] sm:$0xe] }
  0xf5   : > { %v4639_v4 = vrot.slane %v4637_v36, 4  ;;  %v5103_v58 = vrot.slane %v6723_v23, 5  ;;  %7281 = vmatmul.mubr.msk.bf16.gmra.mrb[8].mxu1 %vm399_vm1, %v7804_v34  ;;  %v4645_v29 = vrot.slane %v4643_v49, 5  ;;  %v5106_v63 = vrot.slane %v6724_v7, 5  ;;  %v6736_v34 = vld [vmem:[%s8038_s30 + $0x50] sm:$0x1] }
  0xf6   : > { %v4622_v41 = vsel %vm8085_vm4, %v4617_v55, %v4621_v35  ;;  %v5110_v2 = vrot.slane %v6726_v56, 5  ;;  %7284 = vmatprep.mubr.msk.bf16.mxu1 %vm399_vm1, %v7805_v32  ;;  %v4631_v25 = vrot.slane %v4630_v8, 4  ;;  %v6771_v47 = vrot.slane %v6725_v45, 9  ;;  %v6738_v23 = vld [vmem:[%s8038_s30 + $0x58] sm:$0xf] }
  0xf7   : > { %v6704_v10 = vcombine.low %v4612_v12, %v4622_v41  ;;  %v4640_v39 = vor.u32 %v4639_v4, %v4635_v51  ;;  %v5105_v44 = vrot.slane %v5103_v58, 4  ;;  %v5113_v30 = vrot.slane %v6727_v57, 5  ;;  %v6739_v19 = vld [vmem:[%s8038_s30 + $0x5c] sm:$0x1]  ;;  %v6422_v7 = vld [vmem:[%s8038_s30 + $0x6c] sm:$0xf] }
  0xf8   : > { %v5112_v24 = vrot.slane %v5110_v2, 4  ;;  %v5104_v59 = vsel %vm8160_vm7, %v6770_v28, %v5103_v58  ;;  %v6772_v31 = vrot.slane %v6728_v1, 9  ;;  %v5117_v40 = vrot.slane %v6729_v5, 5  ;;  %v6423_v45 = vld [vmem:[%s8038_s30 + $0x70] sm:$0xf]  ;;  %v7808_v41 = vld [vmem:[%s8038_s30 + $0x78] sm:$0xff]  }
  0xf9   : > { %7433 = vmatmul.mubr.msk.bf16.gmra.mrb[24].mxu0 %vm399_vm1, %v6703_v53  ;;  %v4641_v3 = vrot.slane %v4640_v39, 4  ;;  %v4636_v9 = vsel %vm8085_vm4, %v4631_v25, %v4635_v51  ;;  %v5107_v18 = vsel %vm8160_vm7, %v5105_v44, %v5106_v63  ;;  %v5120_v61 = vrot.slane %v6730_v13, 5  ;;  %v6424_v55 = vld [vmem:[%s8038_s30 + $0x74] sm:$0x1]  ;;  %v6425_v57 = vld [vmem:[%s8038_s30 + $0x78] sm:$0xf] }
  0xfa   : > { %7436 = vmatprep.mubr.msk.bf16.mxu0 %vm399_vm1, %v6704_v10  ;;  %v8968_v21 = vsel %vm8160_vm7, %v6771_v47, %v5110_v2  ;;  %v8972_v38 = vsel %vm8160_vm7, %v5112_v24, %v5113_v30  ;;  %v6787_v15 = vcombine.low %v5104_v59, %v5107_v18  ;;  %v5119_v48 = vrot.slane %v5117_v40, 4  ;;  %v6426_v1 = vld [vmem:[%s8038_s30 + $0x7c] sm:$0xf]  ;;  %v7809_v10 = vld [vmem:[%s8038_s30 + $0x84] sm:$0xff]   ;;  %v6427_v24 = vld [vmem:[%s8038_s30 + $0x80] sm:$0x1] }
  0xfb   : > { %v4646_v17 = vsel %vm8085_vm4, %v4641_v3, %v4645_v29  ;;  %v6773_v22 = vrot.slane %v6731_v62, 9  ;;  %v5124_v26 = vrot.slane %v6732_v16, 5  ;;  %v8980_v54 = vsel %vm8160_vm7, %v6772_v31, %v5117_v40  ;;  %v6740_v16 = vld [vmem:[%s8038_s30 + $0x60] sm:$0xe] }
  0xfc   : > { %v6705_v32 = vcombine.low %v4636_v9, %v4646_v17  ;;  %v6774_v52 = vrot.slane %v6734_v20, 9  ;;  %v5131_v11 = vrot.slane %v6735_v37, 5  ;;  %v8987_v56 = vsel %vm8160_vm7, %v5119_v48, %v5120_v61  ;;  %v6744_v37 = vld [vmem:[%s8038_s30 + $0x70] sm:$0xf]  ;;  %v6742_v48 = vld [vmem:[%s8038_s30 + $0x68] sm:$0x1] }
  0xfd   : > { %7285 = vmatmul.mubr.msk.bf16.gmra.mrb[12].mxu1 %vm399_vm1, %v7806_v14  ;;  %v5126_v42 = vrot.slane %v5124_v26, 4  ;;  %v5127_v6 = vrot.slane %v6733_v60, 5  ;;  %v6775_v35 = vrot.slane %v6737_v27, 9  ;;  %v6788_v46 = vcombine.low %v8968_v21, %v8972_v38 }
  0xfe   : > { %7288 = vmatprep.mubr.msk.bf16.mxu1 %vm399_vm1, %v7807_v33  ;;  %v5134_v50 = vrot.slane %v6736_v34, 5  ;;  %v5138_v51 = vrot.slane %v6738_v23, 5  ;;  %v6789_v36 = vcombine.low %v8980_v54, %v8987_v56  ;;  %v8997_v53 = vsel %vm8160_vm7, %v6773_v22, %v5124_v26  ;;  %v6741_v33 = vld [vmem:[%s8038_s30 + $0x64] sm:$0xf]  ;;  %v6743_v34 = vld [vmem:[%s8038_s30 + $0x6c] sm:$0xe] }
  0xff   : > { %v9001_v12 = vsel %vm8160_vm7, %v6774_v52, %v5131_v11  ;;  %v2674_v49 = vshrl.u32 %v6422_v7, 16  ;;  %v5133_v8 = vrot.slane %v5131_v11, 4  ;;  %v5141_v4 = vrot.slane %v6739_v19, 5  ;;  %v7810_v23 = vld [vmem:[%s8038_s30 + $0x90] sm:$0xff]   ;;  %v6428_v19 = vld [vmem:[%s8038_s30 + $0x84] sm:$0xf] }
 0x100   : > { %v2677_v28 = vshll.u32 %v6422_v7, 16  ;;  %v2683_v58 = vshll.u32 %v6423_v45, 16  ;;  %v9011_v29 = vsel %vm8160_vm7, %v5126_v42, %v5127_v6  ;;  %v9015_v63 = vsel %vm8160_vm7, %v6775_v35, %v5138_v51  ;;  %v6745_v6 = vld [vmem:[%s8038_s30 + $0x74] sm:$0x1] }
 0x101   : > { %7437 = vmatmul.mubr.msk.bf16.gmra.mrb[28].mxu0 %vm399_vm1, %v6705_v32  ;;  %v2676_v2 = vrot.slane %v2674_v49, 4  ;;  %v2687_v5 = vshrl.u32 %v6423_v45, 16  ;;  %v5140_v25 = vrot.slane %v5138_v51, 4  ;;  %v2693_v13 = vshll.u32 %v6424_v55, 16  ;;  %v6429_v45 = vld [vmem:[%s8038_s30 + $0x88] sm:$0xf] }
 0x102   : > { %7442 = vmatprep.mubr.msk.bf16.mxu0 %vm399_vm1, %v6787_v15  ;;  %v2679_v39 = vrot.slane %v2677_v28, 5  ;;  %v2685_v47 = vrot.slane %v2683_v58, 5  ;;  %v2698_v30 = vshrl.u32 %v6425_v57, 16  ;;  %v2701_v62 = vshll.u32 %v6425_v57, 16  ;;  %v6430_v57 = vld [vmem:[%s8038_s30 + $0x8c] sm:$0x1] }
 0x103   : > { %v2689_v44 = vrot.slane %v2687_v5, 4  ;;  %v2707_v14 = vshll.u32 %v6426_v1, 16  ;;  %v9021_v3 = vsel %vm8160_vm7, %v5133_v8, %v5134_v50  ;;  %v2695_v31 = vrot.slane %v2693_v13, 5 }
 0x104   : > { %v2680_v59 = vor.u32 %v2679_v39, %v2676_v2  ;;  %v2711_v40 = vshrl.u32 %v6426_v1, 16  ;;  %v2700_v18 = vrot.slane %v2698_v30, 4  ;;  %v2703_v61 = vrot.slane %v2701_v62, 5  ;;  %v6433_v39 = vld [vmem:[%s8038_s30 + $0x98] sm:$0x1] }
 0x105   : > { %7289 = vmatmul.mubr.msk.bf16.gmra.mrb[16].mxu1 %vm399_vm1, %v7808_v41  ;;  %v2690_v9 = vor.u32 %v2689_v44, %v2685_v47  ;;  %v9026_v20 = vrot.slane %v2707_v14, 5  ;;  %v9032_v17 = vsel %vm8160_vm7, %v5140_v25, %v5141_v4  ;;  %v2717_v60 = vshll.u32 %v6427_v24, 16  ;;  %v6431_v4 = vld [vmem:[%s8038_s30 + $0x90] sm:$0xf]  ;;  %v6746_v30 = vld [vmem:[%s8038_s30 + $0x78] sm:$0xe] }
 0x106   : > { %7292 = vmatprep.mubr.msk.bf16.mxu1 %vm399_vm1, %v7809_v10  ;;  %v2681_v21 = vrot.slane %v2680_v59, 4  ;;  %v2713_v38 = vrot.slane %v2711_v40, 4  ;;  %v2704_v15 = vor.u32 %v2703_v61, %v2700_v18  ;;  %v6776_v22 = vrot.slane %v6740_v16, 9  ;;  %v6748_v18 = vld [vmem:[%s8038_s30 + $0x80] sm:$0x1] }
 0x107   : > { %v2691_v27 = vrot.slane %v2690_v9, 4  ;;  %v5145_v26 = vrot.slane %v6741_v33, 5  ;;  %v6790_v32 = vcombine.low %v8997_v53, %v9011_v29  ;;  %v5152_v11 = vrot.slane %v6744_v37, 5  ;;  %v6432_v29 = vld [vmem:[%s8038_s30 + $0x94] sm:$0xf]  ;;  %v7812_v37 = vld [vmem:[%s8038_s30 + $0xa8] sm:$0xff]  }
 0x108   : > { %v2686_v54 = vsel %vm8085_vm4, %v2681_v21, %v2685_v47  ;;  %v2714_v52 = vor.u32 %v2713_v38, %v9026_v20  ;;  %v6791_v7 = vcombine.low %v9001_v12, %v9021_v3  ;;  %v9049_v42 = vrot.slane %v2704_v15, 4  ;;  %v6749_v61 = vld [vmem:[%s8038_s30 + $0x84] sm:$0xe]  ;;  %v7813_v15 = vld [vmem:[%s8038_s30 + $0xb4] sm:$0xff]  }
 0x109   : > { %7443 = vmatmul.mubr.msk.bf16.vlgmr.msra.gmra.mrb[0].mxu0 %vm399_vm1, %v6788_v46  ;;  %v2696_v56 = vsel %vm8085_vm4, %v2691_v27, %v2695_v31  ;;  %v6777_v35 = vrot.slane %v6743_v34, 9  ;;  %v7811_v46 = vld [vmem:[%s8038_s30 + $0x9c] sm:$0xff]   ;;  %v6792_v50 = vcombine.low %v9015_v63, %v9032_v17  ;;  %v9056_v51 = vrot.slane %v2717_v60, 5  ;;  %v6750_v27 = vld [vmem:[%s8038_s30 + $0x88] sm:$0xf] }
 0x10a   : > { %7446 = vmatprep.mubr.msk.bf16.mxu0 %vm399_vm1, %v6789_v36  ;;  %v5147_v36 = vrot.slane %v5145_v26, 4  ;;  %v5148_v53 = vrot.slane %v6742_v48, 5  ;;  %v9058_v55 = vcombine.low %v2686_v54, %v2696_v56  ;;  %v9060_v12 = vrot.slane %v2714_v52, 4  ;;  %v6747_v31 = vld [vmem:[%s8038_s30 + $0x7c] sm:$0xf] }
 0x10b   : > { %v9064_v49 = vsel %vm8160_vm7, %v6776_v22, %v5145_v26  ;;  %v2722_v8 = vshrl.u32 %v6428_v19, 16  ;;  %v5154_v28 = vrot.slane %v5152_v11, 4  ;;  %v5155_v58 = vrot.slane %v6745_v6, 5  ;;  %v6751_v56 = vld [vmem:[%s8038_s30 + $0x8c] sm:$0x1] }
 0x10c   : > { %v2725_v1 = vshll.u32 %v6428_v19, 16  ;;  %v2731_v41 = vshll.u32 %v6429_v45, 16  ;;  %v2710_v2 = vsel %vm8085_vm4, %v9049_v42, %v9026_v20  ;;  %v9076_v5 = vsel %vm8160_vm7, %v6777_v35, %v5152_v11 }
 0x10d   : > { %7293 = vmatmul.mubr.msk.bf16.gmra.mrb[20].mxu1 %vm399_vm1, %v7810_v23  ;;  %v2724_v10 = vrot.slane %v2722_v8, 4  ;;  %v2735_v25 = vshrl.u32 %v6429_v45, 16  ;;  %v9082_v47 = vsel %vm8160_vm7, %v5147_v36, %v5148_v53  ;;  %v2741_v24 = vshll.u32 %v6430_v57, 16  ;;  %v6434_v45 = vld [vmem:[%s8038_s30 + $0x9c] sm:$0xf] }
 0x10e   : > { %7296 = vmatprep.mubr.msk.bf16.mxu1 %vm399_vm1, %v7811_v46  ;;  %v2727_v13 = vrot.slane %v2725_v1, 5  ;;  %v9084_v44 = vrot.slane %v2731_v41, 5  ;;  %v2746_v14 = vshrl.u32 %v6431_v4, 16  ;;  %v2749_v3 = vshll.u32 %v6431_v4, 16  ;;  %v6435_v8 = vld [vmem:[%s8038_s30 + $0xa0] sm:$0xf] }
 0x10f   : > { %v2737_v62 = vrot.slane %v2735_v25, 4  ;;  %v2755_v59 = vshll.u32 %v6432_v29, 16  ;;  %v9091_v40 = vsel %vm8160_vm7, %v5154_v28, %v5155_v58  ;;  %v2759_v33 = vshrl.u32 %v6432_v29, 16  ;;  %v6437_v25 = vld [vmem:[%s8038_s30 + $0xa8] sm:$0xf] }
 0x110   : > { %v2728_v16 = vor.u32 %v2727_v13, %v2724_v10  ;;  %v2765_v9 = vshll.u32 %v6433_v39, 16  ;;  %v2748_v38 = vrot.slane %v2746_v14, 4  ;;  %v2751_v60 = vrot.slane %v2749_v3, 5 }
 0x111   : > { %7447 = vmatmul.mubr.msk.bf16.gmra.mrb[4].mxu0 %vm399_vm1, %v6790_v32  ;;  %v2738_v21 = vor.u32 %v2737_v62, %v9084_v44  ;;  %v9098_v34 = vrot.slane %v2755_v59, 5  ;;  %v9104_v22 = vrot.slane %v2741_v24, 5  ;;  %v2761_v26 = vrot.slane %v2759_v33, 4  ;;  %v6438_v24 = vld [vmem:[%s8038_s30 + $0xac] sm:$0xf] }
 0x112   : > { %7450 = vmatprep.mubr.msk.bf16.mxu0 %vm399_vm1, %v6791_v7  ;;  %v9102_v48 = vrot.slane %v2728_v16, 4  ;;  %v6778_v23 = vrot.slane %v6746_v30, 9  ;;  %v2752_v54 = vor.u32 %v2751_v60, %v2748_v38  ;;  %v5159_v52 = vrot.slane %v6747_v31, 5  ;;  %v7814_v30 = vld [vmem:[%s8038_s30 + $0xc0] sm:$0xff]  }
 0x113   : > { %v9106_v32 = vrot.slane %v2738_v21, 4  ;;  %v5162_v11 = vrot.slane %v6748_v18, 5  ;;  %v2720_v19 = vsel %vm8085_vm4, %v9060_v12, %v9056_v51  ;;  %v2762_v7 = vor.u32 %v2761_v26, %v9098_v34  ;;  %v6441_v12 = vld [vmem:[%s8038_s30 + $0xb8] sm:$0xf] }
 0x114   : > { %v6779_v6 = vrot.slane %v6749_v61, 9  ;;  %v5166_v35 = vrot.slane %v6750_v27, 5  ;;  %v6793_v46 = vcombine.low %v9064_v49, %v9082_v47  ;;  %v9118_v36 = vrot.slane %v2752_v54, 4  ;;  %v6752_v61 = vld [vmem:[%s8038_s30 + $0x90] sm:$0xe] }
 0x115   : > { %7297 = vmatmul.mubr.msk.bf16.gmra.mrb[24].mxu1 %vm399_vm1, %v7812_v37  ;;  %v9120_v53 = vrot.slane %v2765_v9, 5  ;;  %v5161_v57 = vrot.slane %v5159_v52, 4  ;;  %v6794_v4 = vcombine.low %v9076_v5, %v9091_v40  ;;  %v2734_v28 = vsel %vm8085_vm4, %v9102_v48, %v9084_v44  ;;  %v6436_v5 = vld [vmem:[%s8038_s30 + $0xa4] sm:$0x1]  ;;  %v6439_v40 = vld [vmem:[%s8038_s30 + $0xb0] sm:$0x1] }
 0x116   : > { %7300 = vmatprep.mubr.msk.bf16.mxu1 %vm399_vm1, %v7813_v15  ;;  %v2744_v49 = vsel %vm8085_vm4, %v9106_v32, %v9104_v22  ;;  %v2763_v58 = vrot.slane %v2762_v7, 4  ;;  %v5160_v1 = vsel %vm8160_vm7, %v6778_v23, %v5159_v52  ;;  %v9140_v29 = vsel %vm8160_vm7, %v6779_v6, %v5166_v35  ;;  %v6754_v27 = vld [vmem:[%s8038_s30 + $0x98] sm:$0x1]  ;;  %v6756_v23 = vld [vmem:[%s8038_s30 + $0xa0] sm:$0xf] }
 0x117   : > { %v5163_v41 = vsel %vm8160_vm7, %v5161_v57, %v5162_v11  ;;  %v2770_v10 = vshrl.u32 %v6434_v45, 16  ;;  %v5168_v39 = vrot.slane %v5166_v35, 4  ;;  %v5169_v47 = vrot.slane %v6751_v56, 5  ;;  %v6440_v57 = vld [vmem:[%s8038_s30 + $0xb4] sm:$0xf] }
 0x118   : > { %v2773_v13 = vshll.u32 %v6434_v45, 16  ;;  %v2779_v44 = vshll.u32 %v6435_v8, 16  ;;  %v2758_v62 = vsel %vm8085_vm4, %v9118_v36, %v9098_v34  ;;  %v2768_v63 = vsel %vm8085_vm4, %v2763_v58, %v9120_v53  ;;  %v6753_v34 = vld [vmem:[%s8038_s30 + $0x94] sm:$0xf]  ;;  %v6755_v45 = vld [vmem:[%s8038_s30 + $0x9c] sm:$0xe] }
 0x119   : > { %7451 = vmatmul.mubr.msk.bf16.gmra.mrb[8].mxu0 %vm399_vm1, %v6792_v50  ;;  %v2772_v17 = vrot.slane %v2770_v10, 4  ;;  %v2783_v50 = vshrl.u32 %v6435_v8, 16  ;;  %v6795_v14 = vcombine.low %v5160_v1, %v5163_v41  ;;  %v2789_v31 = vshll.u32 %v6436_v5, 16  ;;  %v6442_v5 = vld [vmem:[%s8038_s30 + $0xbc] sm:$0x1] }
 0x11a   : > { %7454 = vmatprep.mubr.msk.bf16.mxu0 %vm399_vm1, %v6793_v46  ;;  %v2775_v3 = vrot.slane %v2773_v13, 5  ;;  %v2781_v59 = vrot.slane %v2779_v44, 5  ;;  %v2794_v33 = vshrl.u32 %v6437_v25, 16  ;;  %v2797_v9 = vshll.u32 %v6437_v25, 16  ;;  %v6443_v25 = vld [vmem:[%s8038_s30 + $0xc0] sm:$0xf] }
 0x11b   : > { %v2785_v16 = vrot.slane %v2783_v50, 4  ;;  %v2803_v18 = vshll.u32 %v6438_v24, 16  ;;  %v9162_v37 = vsel %vm8160_vm7, %v5168_v39, %v5169_v47  ;;  %v2791_v38 = vrot.slane %v2789_v31, 5 }
 0x11c   : > { %v2776_v21 = vor.u32 %v2775_v3, %v2772_v17  ;;  %v2807_v60 = vshrl.u32 %v6438_v24, 16  ;;  %v2796_v48 = vrot.slane %v2794_v33, 4  ;;  %v2799_v22 = vrot.slane %v2797_v9, 5  ;;  %v6758_v33 = vld [vmem:[%s8038_s30 + $0xa8] sm:$0xe] }
 0x11d   : > { %7301 = vmatmul.mubr.msk.bf16.gmra.mrb[28].mxu1 %vm399_vm1, %v7814_v30  ;;  %v2786_v15 = vor.u32 %v2785_v16, %v2781_v59  ;;  %v9167_v26 = vrot.slane %v2803_v18, 5  ;;  %v2813_v52 = vshll.u32 %v6439_v40, 16  ;;  %v6780_v11 = vrot.slane %v6752_v61, 9 }
 0x11e   : > { %7322 = vmatprep.mubr.msk.bf16.mxu1 %vm399_vm1, %v9058_v55  ;;  %v2777_v32 = vrot.slane %v2776_v21, 4  ;;  %v2809_v54 = vrot.slane %v2807_v60, 4  ;;  %v2800_v56 = vor.u32 %v2799_v22, %v2796_v48  ;;  %v5173_v6 = vrot.slane %v6753_v34, 5  ;;  %v6759_v21 = vld [vmem:[%s8038_s30 + $0xac] sm:$0xf] }
 0x11f   : > { %v2787_v7 = vrot.slane %v2786_v15, 4  ;;  %v5176_v35 = vrot.slane %v6754_v27, 5  ;;  %v6456_v55 = vcombine.low %v2710_v2, %v2720_v19  ;;  %v5180_v53 = vrot.slane %v6756_v23, 5  ;;  %v6445_v27 = vld [vmem:[%s8038_s30 + $0xc8] sm:$0x1] }
 0x120   : > { %v2782_v46 = vsel %vm8085_vm4, %v2777_v32, %v2781_v59  ;;  %v2810_v36 = vor.u32 %v2809_v54, %v9167_v26  ;;  %v6457_v8 = vcombine.low %v2734_v28, %v2744_v49  ;;  %v9188_v51 = vcombine.low %v2758_v62, %v2768_v63  ;;  %v6757_v28 = vld [vmem:[%s8038_s30 + $0xa4] sm:$0x1]  ;;  %v6762_v22 = vld [vmem:[%s8038_s30 + $0xb8] sm:$0xf] }
 0x121   : > { %7455 = vmatmul.mubr.msk.bf16.gmra.mrb[12].mxu0 %vm399_vm1, %v6794_v4  ;;  %v2792_v20 = vsel %vm8085_vm4, %v2787_v7, %v2791_v38  ;;  %v5175_v42 = vrot.slane %v5173_v6, 4  ;;  %v6796_v2 = vcombine.low %v9140_v29, %v9162_v37  ;;  %v9196_v19 = vrot.slane %v2813_v52, 5  ;;  %v6444_v29 = vld [vmem:[%s8038_s30 + $0xc4] sm:$0xf]  ;;  %v6760_v38 = vld [vmem:[%s8038_s30 + $0xb0] sm:$0x1] }
 0x122   : > { %7458 = vmatprep.mubr.msk.bf16.mxu0 %vm399_vm1, %v6795_v14  ;;  %v5174_v4 = vsel %vm8160_vm7, %v6780_v11, %v5173_v6  ;;  %v6781_v49 = vrot.slane %v6755_v45, 9  ;;  %v6459_v58 = vcombine.low %v2782_v46, %v2792_v20  ;;  %v2801_v1 = vrot.slane %v2800_v56, 4  ;;  %v6761_v52 = vld [vmem:[%s8038_s30 + $0xb4] sm:$0xe] }
 0x123   : > { %v5177_v41 = vsel %vm8160_vm7, %v5175_v42, %v5176_v35  ;;  %v2818_v10 = vshrl.u32 %v6440_v57, 16  ;;  %v2811_v39 = vrot.slane %v2810_v36, 4  ;;  %v5182_v47 = vrot.slane %v5180_v53, 4  ;;  %v6764_v36 = vld [vmem:[%s8038_s30 + $0xc0] sm:$0xe] }
 0x124   : > { %v2821_v13 = vshll.u32 %v6440_v57, 16  ;;  %v2827_v44 = vshll.u32 %v6441_v12, 16  ;;  %v6797_v24 = vcombine.low %v5174_v4, %v5177_v41  ;;  %v5183_v30 = vrot.slane %v6757_v28, 5  ;;  %v6765_v42 = vld [vmem:[%s8038_s30 + $0xc4] sm:$0xf] }
 0x125   : > { %7323 = vmatmul.mubr.msk.bf16.vlgmr.msra.gmra.mrb[16].mxu1 %vm399_vm1, %v6456_v55  ;;  %v2820_v62 = vrot.slane %v2818_v10, 4  ;;  %v2831_v63 = vshrl.u32 %v6441_v12, 16  ;;  %v5181_v17 = vsel %vm8160_vm7, %v6781_v49, %v5180_v53  ;;  %v2837_v3 = vshll.u32 %v6442_v5, 16  ;;  %v6763_v55 = vld [vmem:[%s8038_s30 + $0xbc] sm:$0x1] }
 0x126   : > { %7326 = vmatprep.mubr.msk.bf16.mxu1 %vm399_vm1, %v6457_v8  ;;  %v2823_v50 = vrot.slane %v2821_v13, 5  ;;  %v2829_v14 = vrot.slane %v2827_v44, 5  ;;  %v2842_v31 = vshrl.u32 %v6443_v25, 16  ;;  %v2845_v40 = vshll.u32 %v6443_v25, 16  ;;  %v6766_v12 = vld [vmem:[%s8038_s30 + $0xc8] sm:$0x1] }
 0x127   : > { %v2833_v59 = vrot.slane %v2831_v63, 4  ;;  %v2851_v16 = vshll.u32 %v6444_v29, 16  ;;  %v2806_v9 = vsel %vm8085_vm4, %v2801_v1, %v9167_v26  ;;  %v2816_v18 = vsel %vm8085_vm4, %v2811_v39, %v9196_v19  ;;  %v6768_v49 = vld [vmem:[%s8038_s30 + $0xd0] sm:$0xf] }
 0x128   : > { %v2824_v61 = vor.u32 %v2823_v50, %v2820_v62  ;;  %v2855_v37 = vshrl.u32 %v6444_v29, 16  ;;  %v5184_v60 = vsel %vm8160_vm7, %v5182_v47, %v5183_v30  ;;  %v2844_v15 = vrot.slane %v2842_v31, 4  ;;  %v6769_v50 = vld [vmem:[%s8038_s30 + $0xd4] sm:$0x1] }
 0x129   : > { %7459 = vmatmul.mubr.msk.bf16.gmra.mrb[16].mxu0 %vm399_vm1, %v6796_v2  ;;  %v2834_v34 = vor.u32 %v2833_v59, %v2829_v14  ;;  %v2847_v48 = vrot.slane %v2845_v40, 5  ;;  %v2853_v23 = vrot.slane %v2851_v16, 5  ;;  %v6782_v54 = vrot.slane %v6758_v33, 9 }
 0x12a   : > { %7462 = vmatprep.mubr.msk.bf16.mxu0 %vm399_vm1, %v6797_v24  ;;  %v2825_v26 = vrot.slane %v2824_v61, 4  ;;  %v2857_v32 = vrot.slane %v2855_v37, 4  ;;  %v2839_v7 = vrot.slane %v2837_v3, 5  ;;  %v5187_v56 = vrot.slane %v6759_v21, 5 }
 0x12b   : > { %v2835_v11 = vrot.slane %v2834_v34, 4  ;;  %v5190_v6 = vrot.slane %v6760_v38, 5  ;;  %v6798_v35 = vcombine.low %v5181_v17, %v5184_v60  ;;  %v2861_v45 = vshll.u32 %v6445_v27, 16  ;;  %v6767_v17 = vld [vmem:[%s8038_s30 + $0xcc] sm:$0xe] }
 0x12c   : > { %v5194_v46 = vrot.slane %v6762_v22, 5  ;;  %v2848_v53 = vor.u32 %v2847_v48, %v2844_v15  ;;  %v5188_v57 = vsel %vm8160_vm7, %v6782_v54, %v5187_v56  ;;  %v5189_v8 = vrot.slane %v5187_v56, 4 }
 0x12d   : > { %7327 = vmatmul.mubr.msk.bf16.gmra.mrb[20].mxu1 %vm399_vm1, %v9188_v51  ;;  %v6783_v20 = vrot.slane %v6761_v52, 9  ;;  %v6460_v2 = vcombine.low %v2806_v9, %v2816_v18  ;;  %v2830_v19 = vsel %vm8085_vm4, %v2825_v26, %v2829_v14  ;;  %v2858_v4 = vor.u32 %v2857_v32, %v2853_v23 }
 0x12e   : > { %7330 = vmatprep.mubr.msk.bf16.mxu1 %vm399_vm1, %v6459_v58  ;;  %v5196_v28 = vrot.slane %v5194_v46, 4  ;;  %v2840_v51 = vsel %vm8085_vm4, %v2835_v11, %v2839_v7  ;;  %v5191_v1 = vsel %vm8160_vm7, %v5189_v8, %v5190_v6  ;;  %v5197_v41 = vrot.slane %v6763_v55, 5  ;;  %v9281_v6 = vld [vmem:[%s9518_s2] ss:$0 sm:$0xff] }
 0x12f   : > { %v6784_v5 = vrot.slane %v6764_v36, 9  ;;  %v2863_v58 = vrot.slane %v2861_v45, 5  ;;  %v6799_v10 = vcombine.low %v5188_v57, %v5191_v1  ;;  %v5201_v25 = vrot.slane %v6765_v42, 5  ;;  %v9286_v55 = vld [vmem:[%s9519_s3] ss:$0 sm:$0xff] }
 0x130   : > { %v5204_v39 = vrot.slane %v6766_v12, 5  ;;  %v2849_v47 = vrot.slane %v2848_v53, 4  ;;  %v5195_v13 = vsel %vm8160_vm7, %v6783_v20, %v5194_v46  ;;  %v5198_v44 = vsel %vm8160_vm7, %v5196_v28, %v5197_v41 }
 0x131   : > { %7463 = vmatmul.mubr.msk.bf16.gmra.mrb[20].mxu0 %vm399_vm1, %v6798_v35  ;;  %v5208_v29 = vrot.slane %v6768_v49, 5  ;;  %v6461_v24 = vcombine.low %v2830_v19, %v2840_v51  ;;  %v2859_v30 = vrot.slane %v2858_v4, 4  ;;  %v5202_v62 = vsel %vm8160_vm7, %v6784_v5, %v5201_v25 }
 0x132   : > { %7466 = vmatprep.mubr.msk.bf16.mxu0 %vm399_vm1, %v6799_v10  ;;  %v5203_v63 = vrot.slane %v5201_v25, 4  ;;  %v6800_v14 = vcombine.low %v5195_v13, %v5198_v44  ;;  %v6785_v31 = vrot.slane %v6767_v17, 9  ;;  %v5211_v16 = vrot.slane %v6769_v50, 5 }
 0x133   : > { %v5210_v40 = vrot.slane %v5208_v29, 4  ;;  %v2854_v33 = vsel %vm8085_vm4, %v2849_v47, %v2853_v23  ;;  %v2864_v9 = vsel %vm8085_vm4, %v2859_v30, %v2863_v58 }
 0x134   : > { %v5205_v3 = vsel %vm8160_vm7, %v5203_v63, %v5204_v39  ;;  %v6462_v18 = vcombine.low %v2854_v33, %v2864_v9  ;;  %v5209_v61 = vsel %vm8160_vm7, %v6785_v31, %v5208_v29 }
 0x135   : > { %7331 = vmatmul.mubr.msk.bf16.gmra.mrb[24].mxu1 %vm399_vm1, %v6460_v2  ;;  %v6801_v59 = vcombine.low %v5202_v62, %v5205_v3  ;;  %v5212_v37 = vsel %vm8160_vm7, %v5210_v40, %v5211_v16 }
 0x136   : > { %7334 = vmatprep.mubr.msk.bf16.mxu1 %vm399_vm1, %v6461_v24  ;;  %v6802_v21 = vcombine.low %v5209_v61, %v5212_v37 }
 0x139   : > { %7467 = vmatmul.mubr.msk.bf16.gmra.mrb[24].mxu0 %vm399_vm1, %v6800_v14 }
 0x13a   : > { %7470 = vmatprep.mubr.msk.bf16.mxu0 %vm399_vm1, %v6801_v59 }
 0x13d   : > { %7335 = vmatmul.mubr.msk.bf16.gmra.mrb[28].mxu1 %vm399_vm1, %v6462_v18 }
 0x141   : > { %7471 = vmatmul.mubr.msk.bf16.gmra.mrb[28].mxu0 %vm399_vm1, %v6802_v21 }
 0x1b8   : > { %v7274_v38 = vpop.f32.mrb[0].mxu1 }
 0x1b9   : > { %v2210_v60 = vpop.f32.mrb[1].mxu1 }
 0x1ba   : > { %v7275_v43 = vpop.f32.mrb[2].mxu1 }
 0x1bb   : > { %v2213_v34 = vpop.f32.mrb[3].mxu1 }
 0x1c0   : > { %v7278_v27 = vpop.f32.mrb[4].mxu1 }
 0x1c1   : > { %v2226_v15 = vpop.f32.mrb[5].mxu1 }
 0x1c2   : > { %v7279_v48 = vpop.f32.mrb[6].mxu1 }
 0x1c3   : > { %v2229_v22 = vpop.f32.mrb[7].mxu1 }
 0x1c8   : > { %v7282_v26 = vpop.f32.mrb[8].mxu1 }
 0x1c9   : > { %v2242_v23 = vpop.f32.mrb[9].mxu1 }
 0x1ca   : > { %v7283_v32 = vpop.f32.mrb[10].mxu1 }
 0x1cb   : > { %v9268_v54 = vpop.f32.mrb[11].mxu1 }
 0x1d0   : > { %v9270_v0 = vpop.f32.mrb[12].mxu1 }
 0x1d1   : > { %v9272_v52 = vpop.f32.mrb[13].mxu1 }
 0x1d2   : > { %v9274_v11 = vpop.f32.mrb[14].mxu1 }
 0x1d3   : > { %v9276_v7 = vpop.f32.mrb[15].mxu1 }
 0x1dc   : > { %v7444_v56 = vpop.f32.mrb[0].mxu0 }
 0x1dd   : > { %v7476_v35 = vadd.f32 %v7444_v56, %v7274_v38  ;;  %v5348_v45 = vpop.f32.mrb[1].mxu0 }
 0x1de   : > { %v7477_v46 = vadd.f32 %v5348_v45, %v2210_v60  ;;  %v7445_v36 = vpop.f32.mrb[2].mxu0 }
 0x1df   : > { %v5612_v53 = vmul.f32 %v7476_v35, %v9281_v6  ;;  %v7478_v57 = vadd.f32 %v7445_v36, %v7275_v43  ;;  %v5351_v8 = vpop.f32.mrb[3].mxu0 }
 0x1e0   : > { %v5610_v20 = vmul.f32 %v7477_v46, %v9281_v6  ;;  %v7479_v42 = vadd.f32 %v5351_v8, %v2213_v34 }
 0x1e1   : > { %v9291_v12 = vadd.f32 %v9286_v55, %v5612_v53  ;;  %v5613_v2 = vmul.f32 %v7478_v57, %v9281_v6 }
 0x1e2   : > { %v9295_v19 = vadd.f32 %v9286_v55, %v5610_v20  ;;  %v5611_v4 = vmul.f32 %v7479_v42, %v9281_v6 }
 0x1e3   : > { %v6823_v28 = vmul.f32 -1.442695, %v9291_v12  ;;  %v9300_v49 = vadd.f32 %v9286_v55, %v5613_v2 }
 0x1e4   : > { %v6821_v51 = vmul.f32 -1.442695, %v9295_v19  ;;  %v9304_v1 = vadd.f32 %v9286_v55, %v5611_v4  ;;  %v7448_v41 = vpop.f32.mrb[4].mxu0 }
 0x1e5   : > { %7815 = vpow2.f32 %v6823_v28  ;;  %v6824_v5 = vmul.f32 -1.442695, %v9300_v49  ;;  %v7480_v58 = vadd.f32 %v7448_v41, %v7278_v27  ;;  %v5364_v10 = vpop.f32.mrb[5].mxu0 }
 0x1e6   : > { %7817 = vpow2.f32 %v6821_v51  ;;  %v6822_v25 = vmul.f32 -1.442695, %v9304_v1  ;;  %v7481_v39 = vadd.f32 %v5364_v10, %v2226_v15  ;;  %v7449_v47 = vpop.f32.mrb[6].mxu0 }
 0x1e7   : > { %7819 = vpow2.f32 %v6824_v5  ;;  %v5616_v13 = vmul.f32 %v7480_v58, %v9281_v6  ;;  %v7482_v44 = vadd.f32 %v7449_v47, %v7279_v48  ;;  %v5367_v29 = vpop.f32.mrb[7].mxu0 }
 0x1e8   : > { %7821 = vpow2.f32 %v6822_v25  ;;  %v5614_v24 = vmul.f32 %v7481_v39, %v9281_v6  ;;  %v7483_v30 = vadd.f32 %v5367_v29, %v2229_v22 }
 0x1e9   : > { %v9311_v62 = vadd.f32 %v9286_v55, %v5616_v13  ;;  %v5617_v63 = vmul.f32 %v7482_v44, %v9281_v6 }
 0x1ea   : > { %v9315_v17 = vadd.f32 %v9286_v55, %v5614_v24  ;;  %v5615_v50 = vmul.f32 %v7483_v30, %v9281_v6 }
 0x1eb   : > { %v6827_v14 = vmul.f32 -1.442695, %v9311_v62  ;;  %v9320_v3 = vadd.f32 %v9286_v55, %v5617_v63 }
 0x1ec   : > { %v6825_v59 = vmul.f32 -1.442695, %v9315_v17  ;;  %v9324_v31 = vadd.f32 %v9286_v55, %v5615_v50  ;;  %v7452_v40 = vpop.f32.mrb[8].mxu0 }
 0x1ed   : > { %7823 = vpow2.f32 %v6827_v14  ;;  %v6828_v16 = vmul.f32 -1.442695, %v9320_v3  ;;  %v7484_v33 = vadd.f32 %v7452_v40, %v7282_v26  ;;  %v5380_v9 = vpop.f32.mrb[9].mxu0 }
 0x1ee   : > { %7825 = vpow2.f32 %v6825_v59  ;;  %v6826_v18 = vmul.f32 -1.442695, %v9324_v31  ;;  %v7485_v61 = vadd.f32 %v5380_v9, %v2242_v23  ;;  %v7453_v37 = vpop.f32.mrb[10].mxu0 }
 0x1ef   : > { %v7816_v21 = vpop.eup %7815  ;;  %7827 = vpow2.f32 %v6828_v16  ;;  %v5620_v38 = vmul.f32 %v7484_v33, %v9281_v6  ;;  %v7486_v60 = vadd.f32 %v7453_v37, %v7283_v32  ;;  %v5383_v43 = vpop.f32.mrb[11].mxu0 }
 0x1f0   : > { %v7818_v34 = vpop.eup %7817  ;;  %v5779_v27 = vadd.f32 1.0, %v7816_v21  ;;  %7829 = vpow2.f32 %v6826_v18  ;;  %v5618_v15 = vmul.f32 %v7485_v61, %v9281_v6  ;;  %v7487_v48 = vadd.f32 %v5383_v43, %v9268_v54 }
 0x1f1   : > { %v7820_v22 = vpop.eup %7819  ;;  %v5777_v26 = vadd.f32 1.0, %v7818_v34  ;;  %v9332_v56 = vadd.f32 %v9286_v55, %v5620_v38  ;;  %v5621_v23 = vmul.f32 %v7486_v60, %v9281_v6 }
 0x1f2   : > { %v7822_v35 = vpop.eup %7821  ;;  %7831 = vrcp.f32 %v5779_v27  ;;  %v5780_v45 = vadd.f32 1.0, %v7820_v22  ;;  %v9336_v32 = vadd.f32 %v9286_v55, %v5618_v15  ;;  %v5619_v46 = vmul.f32 %v7487_v48, %v9281_v6 }
 0x1f3   : > { %7833 = vrcp.f32 %v5777_v26  ;;  %v5778_v36 = vadd.f32 1.0, %v7822_v35  ;;  %v6831_v53 = vmul.f32 -1.442695, %v9332_v56  ;;  %v9341_v54 = vadd.f32 %v9286_v55, %v5621_v23 }
 0x1f4   : > { %7835 = vrcp.f32 %v5780_v45  ;;  %v6829_v57 = vmul.f32 -1.442695, %v9336_v32  ;;  %v9345_v8 = vadd.f32 %v9286_v55, %v5619_v46  ;;  %v7456_v20 = vpop.f32.mrb[12].mxu0 }
 0x1f5   : > { %7837 = vrcp.f32 %v5778_v36  ;;  %v6832_v42 = vmul.f32 -1.442695, %v9341_v54  ;;  %v7488_v2 = vadd.f32 %v7456_v20, %v9270_v0  ;;  %v5396_v4 = vpop.f32.mrb[13].mxu0 }
 0x1f6   : > { %7839 = vpow2.f32 %v6831_v53  ;;  %v6830_v28 = vmul.f32 -1.442695, %v9345_v8  ;;  %v7489_v51 = vadd.f32 %v5396_v4, %v9272_v52  ;;  %v7457_v41 = vpop.f32.mrb[14].mxu0 }
 0x1f7   : > { %v7824_v5 = vpop.eup %7823  ;;  %7841 = vpow2.f32 %v6829_v57  ;;  %v5624_v58 = vmul.f32 %v7488_v2, %v9281_v6  ;;  %v7490_v10 = vadd.f32 %v7457_v41, %v9274_v11  ;;  %v5399_v25 = vpop.f32.mrb[15].mxu0 }
 0x1f8   : > { %v7826_v39 = vpop.eup %7825  ;;  %v5783_v47 = vadd.f32 1.0, %v7824_v5  ;;  %7843 = vpow2.f32 %v6832_v42  ;;  %v5622_v13 = vmul.f32 %v7489_v51, %v9281_v6  ;;  %v7491_v0 = vadd.f32 %v5399_v25, %v9276_v7  ;;  %v7324_v24 = vpop.f32.mrb[16].mxu1 }
 0x1f9   : > { %v7828_v44 = vpop.eup %7827  ;;  %v5781_v29 = vadd.f32 1.0, %v7826_v39  ;;  %7845 = vpow2.f32 %v6830_v28  ;;  %v9356_v52 = vadd.f32 %v9286_v55, %v5624_v58  ;;  %v5625_v30 = vmul.f32 %v7490_v10, %v9281_v6  ;;  %v3064_v50 = vpop.f32.mrb[17].mxu1 }
 0x1fa   : > { %v7830_v63 = vpop.eup %7829  ;;  %7847 = vrcp.f32 %v5783_v47  ;;  %v5784_v11 = vadd.f32 1.0, %v7828_v44  ;;  %v9360_v14 = vadd.f32 %v9286_v55, %v5622_v13  ;;  %v5623_v59 = vmul.f32 %v7491_v0, %v9281_v6  ;;  %v7325_v16 = vpop.f32.mrb[18].mxu1 }
 0x1fb   : > { %7849 = vrcp.f32 %v5781_v29  ;;  %v5782_v7 = vadd.f32 1.0, %v7830_v63  ;;  %v6835_v40 = vmul.f32 -1.442695, %v9356_v52  ;;  %v9365_v33 = vadd.f32 %v9286_v55, %v5625_v30  ;;  %v3067_v61 = vpop.f32.mrb[19].mxu1 }
 0x1fc   : > { %v7832_v9 = vpop.eup %7831  ;;  %7851 = vrcp.f32 %v5784_v11  ;;  %v6833_v18 = vmul.f32 -1.442695, %v9360_v14  ;;  %v9369_v37 = vadd.f32 %v9286_v55, %v5623_v59  ;;  %v7460_v21 = vpop.f32.mrb[16].mxu0 }
 0x1fd   : > { %v7834_v38 = vpop.eup %7833  ;;  %v5875_v60 = vmul.f32 %v7832_v9, %v9291_v12  ;;  %7853 = vrcp.f32 %v5782_v7  ;;  %v6836_v43 = vmul.f32 -1.442695, %v9365_v33  ;;  %v7492_v34 = vadd.f32 %v7460_v21, %v7324_v24  ;;  %v5412_v27 = vpop.f32.mrb[17].mxu0 }
 0x1fe   : > { %v7836_v15 = vpop.eup %7835  ;;  %v5873_v48 = vmul.f32 %v7834_v38, %v9295_v19  ;;  %7855 = vpow2.f32 %v6835_v40  ;;  %v6834_v22 = vmul.f32 -1.442695, %v9369_v37  ;;  %v7493_v26 = vadd.f32 %v5412_v27, %v3064_v50  ;;  %v7461_v23 = vpop.f32.mrb[18].mxu0 }
 0x1ff   : > { %v7838_v35 = vpop.eup %7837  ;;  %v5876_v45 = vmul.f32 %v7836_v15, %v9300_v49  ;;  %7857 = vpow2.f32 %v6833_v18  ;;  %v5628_v12 = vmul.f32 %v7492_v34, %v9281_v6  ;;  %v7494_v46 = vadd.f32 %v7461_v23, %v7325_v16  ;;  %v5415_v36 = vpop.f32.mrb[19].mxu0 }
 0x200   : > { %v7840_v53 = vpop.eup %7839  ;;  %v5874_v19 = vmul.f32 %v7838_v35, %v9304_v1  ;;  %7859 = vpow2.f32 %v6836_v43  ;;  %v5626_v57 = vmul.f32 %v7493_v26, %v9281_v6  ;;  %v7495_v20 = vadd.f32 %v5415_v36, %v3067_v61  ;;  %v7328_v4 = vpop.f32.mrb[20].mxu1 }
 0x201   : > { %v7842_v42 = vpop.eup %7841  ;;  %v6928_v49 = vpack.c.bf16 %v5876_v45, %v5875_v60  ;;  %v5787_v2 = vadd.f32 1.0, %v7840_v53  ;;  %7861 = vpow2.f32 %v6834_v22  ;;  %v9386_v28 = vadd.f32 %v9286_v55, %v5628_v12  ;;  %v3080_v58 = vpop.f32.mrb[21].mxu1 }
 0x202   : > { %v7844_v51 = vpop.eup %7843  ;;  %v6923_v41 = vpack.c.bf16 %v5874_v19, %v5873_v48  ;;  %v5785_v5 = vadd.f32 1.0, %v7842_v42  ;;  %v9389_v1 = vadd.f32 %v9286_v55, %v5626_v57  ;;  %v5629_v10 = vmul.f32 %v7494_v46, %v9281_v6  ;;  %v7329_v13 = vpop.f32.mrb[22].mxu1 }
 0x203   : > { %v7846_v25 = vpop.eup %7845  ;;  %7000 = vst [vmem:[%s9381_s27 + $0x8] sm:$0xff] %v6928_v49   ;;  %7863 = vrcp.f32 %v5787_v2  ;;  %v5788_v39 = vadd.f32 1.0, %v7844_v51  ;;  %v6839_v47 = vmul.f32 -1.442695, %v9386_v28  ;;  %v5627_v0 = vmul.f32 %v7495_v20, %v9281_v6  ;;  %v3083_v30 = vpop.f32.mrb[23].mxu1 }
 0x204   : > { %v7848_v44 = vpop.eup %7847  ;;  %6924 = vst [vmem:[%s9381_s27] sm:$0xff] %v6923_v41   ;;  %7865 = vrcp.f32 %v5785_v5  ;;  %v5786_v29 = vadd.f32 1.0, %v7846_v25  ;;  %v6837_v24 = vmul.f32 -1.442695, %v9389_v1  ;;  %v9398_v63 = vadd.f32 %v9286_v55, %v5629_v10  ;;  %v7464_v11 = vpop.f32.mrb[20].mxu0 }
 0x205   : > { %v7850_v50 = vpop.eup %7849  ;;  %v5879_v59 = vmul.f32 %v7848_v44, %v9311_v62  ;;  %7867 = vrcp.f32 %v5788_v39  ;;  %v9402_v7 = vadd.f32 %v9286_v55, %v5627_v0  ;;  %v7496_v40 = vadd.f32 %v7464_v11, %v7328_v4  ;;  %v5428_v16 = vpop.f32.mrb[21].mxu0 }
 0x206   : > { %v7852_v9 = vpop.eup %7851  ;;  %v5877_v18 = vmul.f32 %v7850_v50, %v9315_v17  ;;  %7869 = vrcp.f32 %v5786_v29  ;;  %v6840_v61 = vmul.f32 -1.442695, %v9398_v63  ;;  %v7497_v21 = vadd.f32 %v5428_v16, %v3080_v58  ;;  %v7465_v38 = vpop.f32.mrb[22].mxu0 }
 0x207   : > { %v7854_v60 = vpop.eup %7853  ;;  %v5880_v43 = vmul.f32 %v7852_v9, %v9320_v3  ;;  %7871 = vpow2.f32 %v6839_v47  ;;  %v6838_v62 = vmul.f32 -1.442695, %v9402_v7  ;;  %v5632_v34 = vmul.f32 %v7496_v40, %v9281_v6  ;;  %v5431_v27 = vpop.f32.mrb[23].mxu0 }
 0x208   : > { %v7856_v15 = vpop.eup %7855  ;;  %v5878_v48 = vmul.f32 %v7854_v60, %v9324_v31  ;;  %7873 = vpow2.f32 %v6837_v24  ;;  %v5630_v17 = vmul.f32 %v7497_v21, %v9281_v6  ;;  %v7498_v22 = vadd.f32 %v7465_v38, %v7329_v13  ;;  %v7332_v3 = vpop.f32.mrb[24].mxu1 }
 0x209   : > { %v7858_v26 = vpop.eup %7857  ;;  %v6938_v23 = vpack.c.bf16 %v5880_v43, %v5879_v59  ;;  %v5791_v35 = vadd.f32 1.0, %v7856_v15  ;;  %7875 = vpow2.f32 %v6840_v61  ;;  %v9412_v45 = vadd.f32 %v9286_v55, %v5632_v34  ;;  %v3096_v53 = vpop.f32.mrb[25].mxu1 }
 0x20a   : > { %v7860_v12 = vpop.eup %7859  ;;  %v6933_v46 = vpack.c.bf16 %v5878_v48, %v5877_v18  ;;  %v5789_v36 = vadd.f32 1.0, %v7858_v26  ;;  %7877 = vpow2.f32 %v6838_v62  ;;  %v9415_v31 = vadd.f32 %v9286_v55, %v5630_v17  ;;  %v7333_v42 = vpop.f32.mrb[26].mxu1 }
 0x20b   : > { %v7862_v19 = vpop.eup %7861  ;;  %7002 = vst [vmem:[%s9381_s27 + $0x18] sm:$0xff] %v6938_v23   ;;  %7879 = vrcp.f32 %v5791_v35  ;;  %v5792_v57 = vadd.f32 1.0, %v7860_v12  ;;  %v6843_v20 = vmul.f32 -1.442695, %v9412_v45  ;;  %v5633_v49 = vmul.f32 %v7498_v22, %v9281_v6  ;;  %v3099_v51 = vpop.f32.mrb[27].mxu1 }
 0x20c   : > { %7001 = vst [vmem:[%s9381_s27 + $0x10] sm:$0xff] %v6933_v46   ;;  %7881 = vrcp.f32 %v5789_v36  ;;  %v5790_v2 = vadd.f32 1.0, %v7862_v19  ;;  %v6841_v4 = vmul.f32 -1.442695, %v9415_v31  ;;  %v7499_v41 = vadd.f32 %v5431_v27, %v3083_v30  ;;  %v7468_v5 = vpop.f32.mrb[24].mxu0 }
 0x20d   : > { %v7864_v58 = vpop.eup %7863  ;;  %7883 = vrcp.f32 %v5792_v57  ;;  %v9423_v10 = vadd.f32 %v9286_v55, %v5633_v49  ;;  %v7500_v25 = vadd.f32 %v7468_v5, %v7332_v3  ;;  %v5444_v39 = vpop.f32.mrb[25].mxu0 }
 0x20e   : > { %v7866_v47 = vpop.eup %7865  ;;  %v5883_v13 = vmul.f32 %v7864_v58, %v9332_v56  ;;  %7885 = vrcp.f32 %v5790_v2  ;;  %v5631_v0 = vmul.f32 %v7499_v41, %v9281_v6  ;;  %v7501_v44 = vadd.f32 %v5444_v39, %v3096_v53  ;;  %v7469_v29 = vpop.f32.mrb[26].mxu0 }
 0x20f   : > { %v7868_v24 = vpop.eup %7867  ;;  %v5881_v11 = vmul.f32 %v7866_v47, %v9336_v32  ;;  %7887 = vpow2.f32 %v6843_v20  ;;  %v6844_v30 = vmul.f32 -1.442695, %v9423_v10  ;;  %v5636_v50 = vmul.f32 %v7500_v25, %v9281_v6  ;;  %v5447_v59 = vpop.f32.mrb[27].mxu0 }
 0x210   : > { %v7870_v40 = vpop.eup %7869  ;;  %v5884_v16 = vmul.f32 %v7868_v24, %v9341_v54  ;;  %7889 = vpow2.f32 %v6841_v4  ;;  %v9432_v56 = vadd.f32 %v9286_v55, %v5631_v0  ;;  %v5634_v9 = vmul.f32 %v7501_v44, %v9281_v6  ;;  %v7336_v32 = vpop.f32.mrb[28].mxu1 }
 0x211   : > { %v7872_v18 = vpop.eup %7871  ;;  %v5882_v61 = vmul.f32 %v7870_v40, %v9345_v8  ;;  %7891 = vpow2.f32 %v6844_v30  ;;  %v9437_v21 = vadd.f32 %v9286_v55, %v5636_v50  ;;  %v7502_v38 = vadd.f32 %v7469_v29, %v7333_v42  ;;  %v3112_v34 = vpop.f32.mrb[29].mxu1 }
 0x212   : > { %v7874_v60 = vpop.eup %7873  ;;  %v6948_v43 = vpack.c.bf16 %v5884_v16, %v5883_v13  ;;  %v5795_v62 = vadd.f32 1.0, %v7872_v18  ;;  %v6842_v54 = vmul.f32 -1.442695, %v9432_v56  ;;  %v9441_v27 = vadd.f32 %v9286_v55, %v5634_v9  ;;  %v7337_v22 = vpop.f32.mrb[30].mxu1 }
 0x213   : > { %v7876_v15 = vpop.eup %7875  ;;  %v6943_v48 = vpack.c.bf16 %v5882_v61, %v5881_v11  ;;  %v5793_v8 = vadd.f32 1.0, %v7874_v60  ;;  %v6847_v17 = vmul.f32 -1.442695, %v9437_v21  ;;  %v5637_v26 = vmul.f32 %v7502_v38, %v9281_v6  ;;  %v3115_v12 = vpop.f32.mrb[31].mxu1 }
 0x214   : > { %v7878_v23 = vpop.eup %7877  ;;  %7004 = vst [vmem:[%s9381_s27 + $0x28] sm:$0xff] %v6948_v43   ;;  %7893 = vrcp.f32 %v5795_v62  ;;  %v5796_v35 = vadd.f32 1.0, %v7876_v15  ;;  %v6845_v3 = vmul.f32 -1.442695, %v9441_v27  ;;  %v7503_v46 = vadd.f32 %v5447_v59, %v3099_v51  ;;  %v7472_v36 = vpop.f32.mrb[28].mxu0 }
 0x215   : > { %v7880_v53 = vpop.eup %7879  ;;  %7003 = vst [vmem:[%s9381_s27 + $0x20] sm:$0xff] %v6943_v48   ;;  %7895 = vrcp.f32 %v5793_v8  ;;  %v5794_v19 = vadd.f32 1.0, %v7878_v23  ;;  %v9449_v57 = vadd.f32 %v9286_v55, %v5637_v26  ;;  %v7504_v20 = vadd.f32 %v7472_v36, %v7336_v32  ;;  %v5460_v42 = vpop.f32.mrb[29].mxu0 }
 0x216   : > { %v7882_v49 = vpop.eup %7881  ;;  %v5887_v2 = vmul.f32 %v7880_v53, %v9356_v52  ;;  %7897 = vrcp.f32 %v5796_v35  ;;  %v5635_v4 = vmul.f32 %v7503_v46, %v9281_v6  ;;  %v7505_v41 = vadd.f32 %v5460_v42, %v3112_v34  ;;  %v7473_v5 = vpop.f32.mrb[30].mxu0 }
 0x217   : > { %v7884_v58 = vpop.eup %7883  ;;  %v5885_v51 = vmul.f32 %v7882_v49, %v9360_v14  ;;  %7899 = vrcp.f32 %v5794_v19  ;;  %v6848_v25 = vmul.f32 -1.442695, %v9449_v57  ;;  %v5640_v39 = vmul.f32 %v7504_v20, %v9281_v6  ;;  %v5463_v47 = vpop.f32.mrb[31].mxu0 }
 0x218   : > { %v7886_v13 = vpop.eup %7885  ;;  %v5888_v0 = vmul.f32 %v7884_v58, %v9365_v33  ;;  %7901 = vpow2.f32 %v6842_v54  ;;  %v9458_v52 = vadd.f32 %v9286_v55, %v5635_v4  ;;  %v5638_v44 = vmul.f32 %v7505_v41, %v9281_v6 }
 0x219   : > { %v7888_v29 = vpop.eup %7887  ;;  %v5886_v24 = vmul.f32 %v7886_v13, %v9369_v37  ;;  %7903 = vpow2.f32 %v6847_v17  ;;  %v9463_v14 = vadd.f32 %v9286_v55, %v5640_v39  ;;  %v7506_v11 = vadd.f32 %v7473_v5, %v7337_v22 }
 0x21a   : > { %v7890_v30 = vpop.eup %7889  ;;  %v6958_v50 = vpack.c.bf16 %v5888_v0, %v5887_v2  ;;  %v5799_v59 = vadd.f32 1.0, %v7888_v29  ;;  %7905 = vpow2.f32 %v6845_v3  ;;  %v6846_v16 = vmul.f32 -1.442695, %v9458_v52 }
 0x21b   : > { %v7892_v33 = vpop.eup %7891  ;;  %v6953_v40 = vpack.c.bf16 %v5886_v24, %v5885_v51  ;;  %7907 = vpow2.f32 %v6848_v25  ;;  %v6851_v9 = vmul.f32 -1.442695, %v9463_v14  ;;  %v9469_v18 = vadd.f32 %v9286_v55, %v5638_v44 }
 0x21c   : > { %7006 = vst [vmem:[%s9381_s27 + $0x38] sm:$0xff] %v6958_v50   ;;  %7909 = vrcp.f32 %v5799_v59  ;;  %v5800_v37 = vadd.f32 1.0, %v7892_v33  ;;  %v5641_v61 = vmul.f32 %v7506_v11, %v9281_v6  ;;  %v5797_v32 = vadd.f32 1.0, %v7890_v30 }
 0x21d   : > { %7005 = vst [vmem:[%s9381_s27 + $0x30] sm:$0xff] %v6953_v40   ;;  %v7507_v38 = vadd.f32 %v5463_v47, %v3115_v12  ;;  %v6849_v54 = vmul.f32 -1.442695, %v9469_v18 }
 0x21e   : > { %v7894_v60 = vpop.eup %7893  ;;  %7911 = vrcp.f32 %v5800_v37  ;;  %v9474_v43 = vadd.f32 %v9286_v55, %v5641_v61 }
 0x21f   : > { %v7896_v62 = vpop.eup %7895  ;;  %7913 = vpow2.f32 %v6846_v16  ;;  %v5639_v34 = vmul.f32 %v7507_v38, %v9281_v6  ;;  %v5891_v17 = vmul.f32 %v7894_v60, %v9386_v28 }
 0x220   : > { %v7898_v15 = vpop.eup %7897  ;;  %7915 = vpow2.f32 %v6851_v9  ;;  %v6852_v48 = vmul.f32 -1.442695, %v9474_v43  ;;  %v5889_v35 = vmul.f32 %v7896_v62, %v9389_v1 }
 0x221   : > { %v7900_v8 = vpop.eup %7899  ;;  %v5892_v22 = vmul.f32 %v7898_v15, %v9398_v63  ;;  %7917 = vrcp.f32 %v5797_v32  ;;  %v9482_v26 = vadd.f32 %v9286_v55, %v5639_v34 }
 0x222   : > { %v7902_v23 = vpop.eup %7901  ;;  %v5890_v6 = vmul.f32 %v7900_v8, %v9402_v7  ;;  %7919 = vpow2.f32 %v6852_v48 }
 0x223   : > { %v7904_v3 = vpop.eup %7903  ;;  %v6968_v12 = vpack.c.bf16 %v5892_v22, %v5891_v17  ;;  %v5798_v46 = vadd.f32 1.0, %v7902_v23  ;;  %7921 = vpow2.f32 %v6849_v54  ;;  %v6850_v55 = vmul.f32 -1.442695, %v9482_v26 }
 0x224   : > { %v7906_v36 = vpop.eup %7905  ;;  %v6963_v28 = vpack.c.bf16 %v5890_v6, %v5889_v35  ;;  %v5803_v53 = vadd.f32 1.0, %v7904_v3 }
 0x225   : > { %v7908_v19 = vpop.eup %7907  ;;  %7008 = vst [vmem:[%s9381_s27 + $0x48] sm:$0xff] %v6968_v12   ;;  %7923 = vrcp.f32 %v5798_v46  ;;  %v5801_v20 = vadd.f32 1.0, %v7906_v36 }
 0x226   : > { %v7910_v63 = vpop.eup %7909  ;;  %7007 = vst [vmem:[%s9381_s27 + $0x40] sm:$0xff] %v6963_v28   ;;  %7925 = vrcp.f32 %v5803_v53  ;;  %v5804_v1 = vadd.f32 1.0, %v7908_v19 }
 0x227   : > { %v5895_v49 = vmul.f32 %v7910_v63, %v9412_v45 }
 0x228   : > { %v7912_v7 = vpop.eup %7911  ;;  %7927 = vrcp.f32 %v5804_v1 }
 0x229   : > { %v7914_v42 = vpop.eup %7913  ;;  %v5896_v2 = vmul.f32 %v7912_v7, %v9423_v10  ;;  %7929 = vpow2.f32 %v6850_v55 }
 0x22a   : > { %v7916_v4 = vpop.eup %7915  ;;  %7931 = vrcp.f32 %v5801_v20  ;;  %v5802_v41 = vadd.f32 1.0, %v7914_v42 }
 0x22b   : > { %v7918_v5 = vpop.eup %7917  ;;  %v6978_v58 = vpack.c.bf16 %v5896_v2, %v5895_v49  ;;  %v5807_v51 = vadd.f32 1.0, %v7916_v4 }
 0x22c   : > { %v7920_v25 = vpop.eup %7919  ;;  %7933 = vrcp.f32 %v5802_v41  ;;  %v5893_v45 = vmul.f32 %v7918_v5, %v9415_v31 }
 0x22d   : > { %v7922_v39 = vpop.eup %7921  ;;  %7010 = vst [vmem:[%s9381_s27 + $0x58] sm:$0xff] %v6978_v58   ;;  %7935 = vrcp.f32 %v5807_v51  ;;  %v5808_v47 = vadd.f32 1.0, %v7920_v25 }
 0x22e   : > { %v5805_v44 = vadd.f32 1.0, %v7922_v39 }
 0x22f   : > { %v7924_v13 = vpop.eup %7923  ;;  %7937 = vrcp.f32 %v5808_v47 }
 0x230   : > { %v7926_v0 = vpop.eup %7925  ;;  %v5894_v10 = vmul.f32 %v7924_v13, %v9432_v56  ;;  %7939 = vrcp.f32 %v5805_v44 }
 0x231   : > { %v5899_v30 = vmul.f32 %v7926_v0, %v9437_v21 }
 0x232   : > { %v7928_v29 = vpop.eup %7927  ;;  %v6973_v24 = vpack.c.bf16 %v5894_v10, %v5893_v45 }
 0x233   : > { %v7930_v11 = vpop.eup %7929  ;;  %v5900_v50 = vmul.f32 %v7928_v29, %v9449_v57 }
 0x234   : > { %v7932_v59 = vpop.eup %7931  ;;  %7009 = vst [vmem:[%s9381_s27 + $0x50] sm:$0xff] %v6973_v24   ;;  %v5806_v33 = vadd.f32 1.0, %v7930_v11 }
 0x235   : > { %v6988_v40 = vpack.c.bf16 %v5900_v50, %v5899_v30  ;;  %v5897_v56 = vmul.f32 %v7932_v59, %v9441_v27 }
 0x236   : > { %v7934_v16 = vpop.eup %7933  ;;  %7941 = vrcp.f32 %v5806_v33 }
 0x237   : > { %v7936_v31 = vpop.eup %7935  ;;  %7012 = vst [vmem:[%s9381_s27 + $0x68] sm:$0xff] %v6988_v40   ;;  %v5898_v9 = vmul.f32 %v7934_v16, %v9458_v52 }
 0x238   : > { %v5903_v57 = vmul.f32 %v7936_v31, %v9463_v14 }
 0x239   : > { %v7938_v37 = vpop.eup %7937  ;;  %v6983_v21 = vpack.c.bf16 %v5898_v9, %v5897_v56 }
 0x23a   : > { %v5904_v61 = vmul.f32 %v7938_v37, %v9474_v43  ;;  %v7940_v38 = vpop.eup %7939 }
 0x23b   : > { %7011 = vst [vmem:[%s9381_s27 + $0x60] sm:$0xff] %v6983_v21   ;;  %v5901_v62 = vmul.f32 %v7940_v38, %v9469_v18 }
 0x23c   : > { %v6998_v32 = vpack.c.bf16 %v5904_v61, %v5903_v57 }
 0x23e   : > { %7014 = vst [vmem:[%s9381_s27 + $0x78] sm:$0xff] %v6998_v32  }
 0x240   : > { %v7942_v60 = vpop.eup %7941 }
 0x241   : > { %v5902_v54 = vmul.f32 %v7942_v60, %v9482_v26 }
 0x243   : > { %v6993_v34 = vpack.c.bf16 %v5902_v54, %v5901_v62 }
 0x245   : > { %7013 = vst [vmem:[%s9381_s27 + $0x70] sm:$0xff] %v6993_v34  }
 0x246 PF: > { %s14_s17 = sadd.s32 1, %s7966_s17   ;;  %s9525_s15 = smov %s7962_s16 }
 0x247   : > { %p11_p5 = scmp.ge.s32.totalorder %s14_s17, 4   ;;  %s9526_s16 = smov %s9528_s18 }
 0x249   :  { %13 = sbr.rel (!%p11_p5) target bundleno = 2 (0x2), region = 86 }

</bundles_post_ra>
